<compile_context>
chip_gen: v6e
topology: v6e:2x2x1
jax: 0.10.0
libtpu: 0.0.40
codegen_flags: <defaults>
</compile_context>

<pallas_src>
import functools

import jax
import jax.numpy as jnp
from jax.experimental import pallas as pl
from jax.experimental.pallas import tpu as pltpu


# ------------------------------ Pallas kernel -------------------------------


def _mhsa_fused_kernel(x_ref, wq_ref, wk_ref, wv_ref, wc_ref,
                       bq_ref, bk_ref, bv_ref, bc_ref, gamma_ref, o_ref):
    # x_ref:     (1, N, C)   f32   current batch element (token-major)
    # wq_ref:    (C, H*C8)   bf16  stacked, pre-transposed query weights
    # wk_ref:    (C, H*C8)   bf16  stacked, pre-transposed key weights
    # wv_ref:    (C, H*C)    bf16  stacked, pre-transposed value weights
    # wc_ref:    (H*C, C)    bf16  pre-transposed output-projection weight
    # bq_ref:    (1, H*C8)   f32   stacked biases
    # bk_ref:    (1, H*C8)   f32
    # bv_ref:    (1, H*C)    f32
    # bc_ref:    (1, C)      f32
    # gamma_ref: (H,)        f32   per-head gamma scalars, SMEM
    # o_ref:     (1, N, C)
    num_heads = gamma_ref.shape[0]
    N = x_ref.shape[1]
    C = x_ref.shape[2]
    C8 = wq_ref.shape[1] // num_heads

    x = x_ref[0]                                      # (N, C) f32
    x_bf = x.astype(jnp.bfloat16)

    # Stacked 1x1 convs == wide per-token matmuls (bf16 operands, f32 acc).
    q_all = (jnp.dot(x_bf, wq_ref[...], preferred_element_type=jnp.float32)
             + bq_ref[...]).astype(jnp.bfloat16)      # (N, H*C8)
    k_all = (jnp.dot(x_bf, wk_ref[...], preferred_element_type=jnp.float32)
             + bk_ref[...]).astype(jnp.bfloat16)      # (N, H*C8)
    v_all = (jnp.dot(x_bf, wv_ref[...], preferred_element_type=jnp.float32)
             + bv_ref[...]).astype(jnp.bfloat16)      # (N, H*C)

    # Per-head attention + fused output projection (accumulated in f32).
    # TODO(synk): for real ESRGAN feature-map sizes (N in the thousands) the
    # full (N, N) energy will not fit VMEM (esp. v7x, 64 MiB); switch this
    # section to key-block tiling with an online-softmax accumulator.
    acc = jnp.zeros((N, C), jnp.float32)
    for h in range(num_heads):                        # static unroll, H = 8
        qh = q_all[:, h * C8:(h + 1) * C8]            # (N, C8) bf16
        kh = k_all[:, h * C8:(h + 1) * C8]            # (N, C8) bf16
        vh = v_all[:, h * C:(h + 1) * C]              # (N, C)  bf16

        # energy[i, j] = <q_i, k_j>   (== torch.bmm(query^T, key))
        energy = jax.lax.dot_general(
            qh, kh, (((1,), (1,)), ((), ())),
            preferred_element_type=jnp.float32)       # (N, N) f32

        # Softmax over keys, f32 on the VPU/EUP (max-subtraction is exact).
        energy = energy - jnp.max(energy, axis=-1, keepdims=True)
        p = jnp.exp(energy)
        attn = p / jnp.sum(p, axis=-1, keepdims=True)  # (N, N) f32

        # out_tok[i, :] = sum_j attn[i, j] * v[j, :]
        out_h = jnp.dot(attn.astype(jnp.bfloat16), vh,
                        preferred_element_type=jnp.float32)       # (N, C)

        # gamma * out + x  (residual, f32), then fold this head's slice of the
        # final 1x1 conv directly into the accumulator (fused concat+conv).
        head_h = (gamma_ref[h] * out_h + x).astype(jnp.bfloat16)  # (N, C)
        wc_h = wc_ref[h * C:(h + 1) * C, :]                       # (C, C) bf16
        acc = acc + jnp.dot(head_h, wc_h,
                            preferred_element_type=jnp.float32)

    o_ref[0] = (acc + bc_ref[...]).astype(o_ref.dtype)


# -------------------------------- Wrapper ------------------------------------


def multi_head_self_attention(x_nchw, params):
    """x_nchw: (B, C, W, H) float32.  Returns (B, C, W, H)."""
    B, C, W, Hsp = x_nchw.shape
    N = W * Hsp
    num_heads = params["Wq"].shape[0]
    C8 = params["Wq"].shape[1]
    HC8 = num_heads * C8
    HC = num_heads * C

    # NCHW -> token-major (B, N, C)
    x_tok = x_nchw.reshape(B, C, N).transpose(0, 2, 1)

    # Stack per-head weights, pre-transpose to (C_in, C_out), pre-cast to bf16.
    # Column h*C8+d of wq_t is head h, output-channel d  (same for wk/wv).
    wq_t = params["Wq"].transpose(2, 0, 1).reshape(C, HC8).astype(jnp.bfloat16)
    wk_t = params["Wk"].transpose(2, 0, 1).reshape(C, HC8).astype(jnp.bfloat16)
    wv_t = params["Wv"].transpose(2, 0, 1).reshape(C, HC).astype(jnp.bfloat16)
    wc_t = params["Wc"].T.astype(jnp.bfloat16)                    # (H*C, C)

    bq = params["bq"].reshape(1, HC8)
    bk = params["bk"].reshape(1, HC8)
    bv = params["bv"].reshape(1, HC)
    bc = params["bc"].reshape(1, C)
    gamma = params["gamma"].reshape(num_heads)

    # Advisory cost estimate (real matmul FLOPs + exp count + bytes moved).
    flops = B * (
        2 * N * C * HC8 * 2                               # q + k projections
        + 2 * N * C * HC                                  # v projection
        + num_heads * (2 * N * N * C8 + 2 * N * N * C)    # energy + attn@v
        + 2 * N * HC * C)                                 # output projection
    transcendentals = B * num_heads * N * N               # exp in softmax
    bytes_accessed = (
        4 * (x_tok.size + B * N * C)                      # x in + out (f32)
        + 2 * (wq_t.size + wk_t.size + wv_t.size + wc_t.size)   # bf16 weights
        + 4 * (bq.size + bk.size + bv.size + bc.size + gamma.size))

    out_tok = pl.pallas_call(
        _mhsa_fused_kernel,
        out_shape=jax.ShapeDtypeStruct((B, N, C), x_nchw.dtype),
        grid_spec=pltpu.PrefetchScalarGridSpec(
            num_scalar_prefetch=0,
            grid=(B,),
            in_specs=[
                pl.BlockSpec((1, N, C), lambda b: (b, 0, 0)),          # x
                pl.BlockSpec((C, HC8), lambda b: (0, 0)),              # WqT
                pl.BlockSpec((C, HC8), lambda b: (0, 0)),              # WkT
                pl.BlockSpec((C, HC), lambda b: (0, 0)),               # WvT
                pl.BlockSpec((HC, C), lambda b: (0, 0)),               # WcT
                pl.BlockSpec((1, HC8), lambda b: (0, 0)),              # bq
                pl.BlockSpec((1, HC8), lambda b: (0, 0)),              # bk
                pl.BlockSpec((1, HC), lambda b: (0, 0)),               # bv
                pl.BlockSpec((1, C), lambda b: (0, 0)),                # bc
                pl.BlockSpec(memory_space=pltpu.MemorySpace.SMEM),     # gamma
            ],
            out_specs=pl.BlockSpec((1, N, C), lambda b: (b, 0, 0)),
        ),
        compiler_params=pltpu.CompilerParams(
            dimension_semantics=("parallel",)),
        cost_estimate=pl.CostEstimate(
            flops=flops, transcendentals=transcendentals,
            bytes_accessed=bytes_accessed),
    )(x_tok, wq_t, wk_t, wv_t, wc_t, bq, bk, bv, bc, gamma)

    # token-major -> NCHW
    return out_tok.transpose(0, 2, 1).reshape(B, C, W, Hsp)


# ----------------------------- Pure-JAX reference ----------------------------


def reference(x_nchw, params):
    B, C, W, Hsp = x_nchw.shape
    N = W * Hsp
    num_heads = params["Wq"].shape[0]
    x_tok = x_nchw.reshape(B, C, N).transpose(0, 2, 1)
    outs = []
    for h in range(num_heads):
        q = x_tok @ params["Wq"][h].T + params["bq"][h]
        k = x_tok @ params["Wk"][h].T + params["bk"][h]
        v = x_tok @ params["Wv"][h].T + params["bv"][h]
        energy = jnp.einsum("bnc,bmc->bnm", q, k)
        attn = jax.nn.softmax(energy, axis=-1)
        o = jnp.einsum("bnm,bmc->bnc", attn, v)
        outs.append(params["gamma"][h] * o + x_tok)
    cat = jnp.concatenate(outs, axis=-1)
    out_tok = cat @ params["Wc"].T + params["bc"]
    return out_tok.transpose(0, 2, 1).reshape(B, C, W, Hsp)


# ----------------------------------- Main -------------------------------------


def make_params(key, in_channels, num_heads):
    C = in_channels
    C8 = C // 8
    ks = jax.random.split(key, 9)
    scale = 0.1
    # NOTE: torch inits gamma to 0; we use small random values so the
    # attention path is actually exercised numerically.
    return dict(
        Wq=scale * jax.random.normal(ks[0], (num_heads, C8, C), jnp.float32),
        Wk=scale * jax.random.normal(ks[1], (num_heads, C8, C), jnp.float32),
        Wv=scale * jax.random.normal(ks[2], (num_heads, C, C), jnp.float32),
        bq=scale * jax.random.normal(ks[3], (num_heads, 1, C8), jnp.float32),
        bk=scale * jax.random.normal(ks[4], (num_heads, 1, C8), jnp.float32),
        bv=scale * jax.random.normal(ks[5], (num_heads, 1, C), jnp.float32),
        gamma=scale * jax.random.normal(ks[6], (num_heads, 1, 1), jnp.float32),
        Wc=scale * jax.random.normal(ks[7], (C, num_heads * C), jnp.float32),
        bc=scale * jax.random.normal(ks[8], (1, C), jnp.float32),
    )


if __name__ == "__main__":
    key = jax.random.PRNGKey(0)
    k_x, k_p = jax.random.split(key)

    B, C, W, Hsp = 2, 32, 8, 8          # in_channels=32 (C//8 = 4), num_heads=8
    num_heads = 8

    x = jax.random.normal(k_x, (B, C, W, Hsp), jnp.float32)
    params = make_params(k_p, C, num_heads)

    fn = jax.jit(functools.partial(multi_head_self_attention, params=params))
    out = jax.block_until_ready(fn(x))

    ref = reference(x, params)
    assert out.shape == (B, C, W, Hsp)
    # bf16 MXU operands (with f32 accumulation) -> tolerance loosened vs the
    # f32 reference, as anticipated in the perf review.
    max_abs = float(jnp.max(jnp.abs(out - ref)))
    rel = float(jnp.linalg.norm(out - ref) / jnp.linalg.norm(ref))
    assert max_abs < 1e-1 and rel < 3e-2, (max_abs, rel)

    print("KERNEL_OK")
</pallas_src>

<mosaic_0001>
module attributes {stable_mosaic.version = 11 : i64} {
  func.func @_mhsa_fused_kernel(%arg0: i32, %arg1: memref<1x64x32xf32, #tpu.memory_space<vmem>>, %arg2: memref<32x32xbf16, #tpu.memory_space<vmem>>, %arg3: memref<32x32xbf16, #tpu.memory_space<vmem>>, %arg4: memref<32x256xbf16, #tpu.memory_space<vmem>>, %arg5: memref<256x32xbf16, #tpu.memory_space<vmem>>, %arg6: memref<1x32xf32, #tpu.memory_space<vmem>>, %arg7: memref<1x32xf32, #tpu.memory_space<vmem>>, %arg8: memref<1x256xf32, #tpu.memory_space<vmem>>, %arg9: memref<1x32xf32, #tpu.memory_space<vmem>>, %arg10: memref<8xf32, #tpu.memory_space<smem>>, %arg11: memref<1x64x32xf32, #tpu.memory_space<vmem>>) attributes {dimension_semantics = [#tpu.dimension_semantics<parallel>], iteration_bounds = array<i64: 2>, scalar_prefetch = 0 : i64, scratch_operands = 0 : i64, tpu.core_type = #tpu.core_type<tc>, window_params = [{transform_indices = @transform_0, window_bounds = array<i64: 1, 64, 32>}, {pipeline_mode = #tpu.pipeline_mode<synchronous>, transform_indices = @transform_1, window_bounds = array<i64: 32, 32>}, {pipeline_mode = #tpu.pipeline_mode<synchronous>, transform_indices = @transform_2, window_bounds = array<i64: 32, 32>}, {pipeline_mode = #tpu.pipeline_mode<synchronous>, transform_indices = @transform_3, window_bounds = array<i64: 32, 256>}, {pipeline_mode = #tpu.pipeline_mode<synchronous>, transform_indices = @transform_4, window_bounds = array<i64: 256, 32>}, {pipeline_mode = #tpu.pipeline_mode<synchronous>, transform_indices = @transform_5, window_bounds = array<i64: 1, 32>}, {pipeline_mode = #tpu.pipeline_mode<synchronous>, transform_indices = @transform_6, window_bounds = array<i64: 1, 32>}, {pipeline_mode = #tpu.pipeline_mode<synchronous>, transform_indices = @transform_7, window_bounds = array<i64: 1, 256>}, {pipeline_mode = #tpu.pipeline_mode<synchronous>, transform_indices = @transform_8, window_bounds = array<i64: 1, 32>}, {transform_indices = @transform_9, window_bounds = array<i64: 8>}, {transform_indices = @transform_10, window_bounds = array<i64: 1, 64, 32>}]} {
    %c0 = arith.constant 0 : index
    %c0_0 = arith.constant 0 : index
    %c0_1 = arith.constant 0 : index
    %0 = vector.load %arg1[%c0, %c0_0, %c0_1] : memref<1x64x32xf32, #tpu.memory_space<vmem>>, vector<1x64x32xf32>
    %1 = vector.shape_cast %0 : vector<1x64x32xf32> to vector<64x32xf32>
    %2 = arith.truncf %1 : vector<64x32xf32> to vector<64x32xbf16>
    %c0_2 = arith.constant 0 : index
    %c0_3 = arith.constant 0 : index
    %3 = vector.load %arg2[%c0_2, %c0_3] : memref<32x32xbf16, #tpu.memory_space<vmem>>, vector<32x32xbf16>
    %cst = arith.constant dense<0.000000e+00> : vector<64x32xf32>
    %4 = tpu.matmul %2, %3, %cst {dimension_numbers = #tpu.dot_dimension_numbers<[1], [0], [0], [1], [0, 0, 1, 1], [], []>} : vector<64x32xbf16>, vector<32x32xbf16>, vector<64x32xf32> -> vector<64x32xf32>
    %c0_4 = arith.constant 0 : index
    %c0_5 = arith.constant 0 : index
    %5 = vector.load %arg6[%c0_4, %c0_5] : memref<1x32xf32, #tpu.memory_space<vmem>>, vector<1x32xf32>
    %6 = vector.broadcast %5 : vector<1x32xf32> to vector<64x32xf32>
    %7 = arith.addf %4, %6 : vector<64x32xf32>
    %8 = arith.truncf %7 : vector<64x32xf32> to vector<64x32xbf16>
    %c0_6 = arith.constant 0 : index
    %c0_7 = arith.constant 0 : index
    %9 = vector.load %arg3[%c0_6, %c0_7] : memref<32x32xbf16, #tpu.memory_space<vmem>>, vector<32x32xbf16>
    %cst_8 = arith.constant dense<0.000000e+00> : vector<64x32xf32>
    %10 = tpu.matmul %2, %9, %cst_8 {dimension_numbers = #tpu.dot_dimension_numbers<[1], [0], [0], [1], [0, 0, 1, 1], [], []>} : vector<64x32xbf16>, vector<32x32xbf16>, vector<64x32xf32> -> vector<64x32xf32>
    %c0_9 = arith.constant 0 : index
    %c0_10 = arith.constant 0 : index
    %11 = vector.load %arg7[%c0_9, %c0_10] : memref<1x32xf32, #tpu.memory_space<vmem>>, vector<1x32xf32>
    %12 = vector.broadcast %11 : vector<1x32xf32> to vector<64x32xf32>
    %13 = arith.addf %10, %12 : vector<64x32xf32>
    %14 = arith.truncf %13 : vector<64x32xf32> to vector<64x32xbf16>
    %c0_11 = arith.constant 0 : index
    %c0_12 = arith.constant 0 : index
    %15 = vector.load %arg4[%c0_11, %c0_12] : memref<32x256xbf16, #tpu.memory_space<vmem>>, vector<32x256xbf16>
    %cst_13 = arith.constant dense<0.000000e+00> : vector<64x256xf32>
    %16 = tpu.matmul %2, %15, %cst_13 {dimension_numbers = #tpu.dot_dimension_numbers<[1], [0], [0], [1], [0, 0, 1, 1], [], []>} : vector<64x32xbf16>, vector<32x256xbf16>, vector<64x256xf32> -> vector<64x256xf32>
    %c0_14 = arith.constant 0 : index
    %c0_15 = arith.constant 0 : index
    %17 = vector.load %arg8[%c0_14, %c0_15] : memref<1x256xf32, #tpu.memory_space<vmem>>, vector<1x256xf32>
    %18 = vector.broadcast %17 : vector<1x256xf32> to vector<64x256xf32>
    %19 = arith.addf %16, %18 : vector<64x256xf32>
    %20 = arith.truncf %19 : vector<64x256xf32> to vector<64x256xbf16>
    %cst_16 = arith.constant 0.000000e+00 : f32
    %21 = vector.broadcast %cst_16 : f32 to vector<64x32xf32>
    %22 = vector.extract_strided_slice %8 {offsets = [0, 0], sizes = [64, 4], strides = [1, 1]} : vector<64x32xbf16> to vector<64x4xbf16>
    %23 = vector.extract_strided_slice %14 {offsets = [0, 0], sizes = [64, 4], strides = [1, 1]} : vector<64x32xbf16> to vector<64x4xbf16>
    %24 = vector.extract_strided_slice %20 {offsets = [0, 0], sizes = [64, 32], strides = [1, 1]} : vector<64x256xbf16> to vector<64x32xbf16>
    %cst_17 = arith.constant dense<0.000000e+00> : vector<64x64xf32>
    %25 = tpu.matmul %22, %23, %cst_17 {dimension_numbers = #tpu.dot_dimension_numbers<[1], [1], [0], [0], [0, 0, 1, 0], [], []>} : vector<64x4xbf16>, vector<64x4xbf16>, vector<64x64xf32> -> vector<64x64xf32>
    %cst_18 = arith.constant dense<0xFF800000> : vector<64xf32>
    %26 = vector.multi_reduction <maximumf>, %25, %cst_18 [1] : vector<64x64xf32> to vector<64xf32>
    %27 = vector.shape_cast %26 : vector<64xf32> to vector<64x1xf32>
    %28 = vector.broadcast %27 : vector<64x1xf32> to vector<64x64xf32>
    %29 = arith.subf %25, %28 : vector<64x64xf32>
    %30 = math.exp %29 : vector<64x64xf32>
    %cst_19 = arith.constant dense<0.000000e+00> : vector<64xf32>
    %31 = vector.multi_reduction <add>, %30, %cst_19 [1] : vector<64x64xf32> to vector<64xf32>
    %32 = vector.shape_cast %31 : vector<64xf32> to vector<64x1xf32>
    %33 = vector.broadcast %32 : vector<64x1xf32> to vector<64x64xf32>
    %34 = arith.divf %30, %33 : vector<64x64xf32>
    %35 = arith.truncf %34 : vector<64x64xf32> to vector<64x64xbf16>
    %cst_20 = arith.constant dense<0.000000e+00> : vector<64x32xf32>
    %36 = tpu.matmul %35, %24, %cst_20 {dimension_numbers = #tpu.dot_dimension_numbers<[1], [0], [0], [1], [0, 0, 1, 1], [], []>} : vector<64x64xbf16>, vector<64x32xbf16>, vector<64x32xf32> -> vector<64x32xf32>
    %c0_21 = arith.constant 0 : index
    %37 = memref.load %arg10[%c0_21] : memref<8xf32, #tpu.memory_space<smem>>
    %38 = vector.broadcast %37 : f32 to vector<64x32xf32>
    %39 = arith.mulf %38, %36 : vector<64x32xf32>
    %40 = arith.addf %39, %1 : vector<64x32xf32>
    %41 = arith.truncf %40 : vector<64x32xf32> to vector<64x32xbf16>
    %c0_22 = arith.constant 0 : index
    %c0_23 = arith.constant 0 : index
    %42 = vector.load %arg5[%c0_22, %c0_23] : memref<256x32xbf16, #tpu.memory_space<vmem>>, vector<32x32xbf16>
    %cst_24 = arith.constant dense<0.000000e+00> : vector<64x32xf32>
    %43 = tpu.matmul %41, %42, %cst_24 {dimension_numbers = #tpu.dot_dimension_numbers<[1], [0], [0], [1], [0, 0, 1, 1], [], []>} : vector<64x32xbf16>, vector<32x32xbf16>, vector<64x32xf32> -> vector<64x32xf32>
    %44 = arith.addf %21, %43 : vector<64x32xf32>
    %45 = vector.extract_strided_slice %8 {offsets = [0, 4], sizes = [64, 4], strides = [1, 1]} : vector<64x32xbf16> to vector<64x4xbf16>
    %46 = vector.extract_strided_slice %14 {offsets = [0, 4], sizes = [64, 4], strides = [1, 1]} : vector<64x32xbf16> to vector<64x4xbf16>
    %47 = vector.extract_strided_slice %20 {offsets = [0, 32], sizes = [64, 32], strides = [1, 1]} : vector<64x256xbf16> to vector<64x32xbf16>
    %cst_25 = arith.constant dense<0.000000e+00> : vector<64x64xf32>
    %48 = tpu.matmul %45, %46, %cst_25 {dimension_numbers = #tpu.dot_dimension_numbers<[1], [1], [0], [0], [0, 0, 1, 0], [], []>} : vector<64x4xbf16>, vector<64x4xbf16>, vector<64x64xf32> -> vector<64x64xf32>
    %cst_26 = arith.constant dense<0xFF800000> : vector<64xf32>
    %49 = vector.multi_reduction <maximumf>, %48, %cst_26 [1] : vector<64x64xf32> to vector<64xf32>
    %50 = vector.shape_cast %49 : vector<64xf32> to vector<64x1xf32>
    %51 = vector.broadcast %50 : vector<64x1xf32> to vector<64x64xf32>
    %52 = arith.subf %48, %51 : vector<64x64xf32>
    %53 = math.exp %52 : vector<64x64xf32>
    %cst_27 = arith.constant dense<0.000000e+00> : vector<64xf32>
    %54 = vector.multi_reduction <add>, %53, %cst_27 [1] : vector<64x64xf32> to vector<64xf32>
    %55 = vector.shape_cast %54 : vector<64xf32> to vector<64x1xf32>
    %56 = vector.broadcast %55 : vector<64x1xf32> to vector<64x64xf32>
    %57 = arith.divf %53, %56 : vector<64x64xf32>
    %58 = arith.truncf %57 : vector<64x64xf32> to vector<64x64xbf16>
    %cst_28 = arith.constant dense<0.000000e+00> : vector<64x32xf32>
    %59 = tpu.matmul %58, %47, %cst_28 {dimension_numbers = #tpu.dot_dimension_numbers<[1], [0], [0], [1], [0, 0, 1, 1], [], []>} : vector<64x64xbf16>, vector<64x32xbf16>, vector<64x32xf32> -> vector<64x32xf32>
    %c1 = arith.constant 1 : index
    %60 = memref.load %arg10[%c1] : memref<8xf32, #tpu.memory_space<smem>>
    %61 = vector.broadcast %60 : f32 to vector<64x32xf32>
    %62 = arith.mulf %61, %59 : vector<64x32xf32>
    %63 = arith.addf %62, %1 : vector<64x32xf32>
    %64 = arith.truncf %63 : vector<64x32xf32> to vector<64x32xbf16>
    %c32 = arith.constant 32 : index
    %c0_29 = arith.constant 0 : index
    %65 = vector.load %arg5[%c32, %c0_29] : memref<256x32xbf16, #tpu.memory_space<vmem>>, vector<32x32xbf16>
    %cst_30 = arith.constant dense<0.000000e+00> : vector<64x32xf32>
    %66 = tpu.matmul %64, %65, %cst_30 {dimension_numbers = #tpu.dot_dimension_numbers<[1], [0], [0], [1], [0, 0, 1, 1], [], []>} : vector<64x32xbf16>, vector<32x32xbf16>, vector<64x32xf32> -> vector<64x32xf32>
    %67 = arith.addf %44, %66 : vector<64x32xf32>
    %68 = vector.extract_strided_slice %8 {offsets = [0, 8], sizes = [64, 4], strides = [1, 1]} : vector<64x32xbf16> to vector<64x4xbf16>
    %69 = vector.extract_strided_slice %14 {offsets = [0, 8], sizes = [64, 4], strides = [1, 1]} : vector<64x32xbf16> to vector<64x4xbf16>
    %70 = vector.extract_strided_slice %20 {offsets = [0, 64], sizes = [64, 32], strides = [1, 1]} : vector<64x256xbf16> to vector<64x32xbf16>
    %cst_31 = arith.constant dense<0.000000e+00> : vector<64x64xf32>
    %71 = tpu.matmul %68, %69, %cst_31 {dimension_numbers = #tpu.dot_dimension_numbers<[1], [1], [0], [0], [0, 0, 1, 0], [], []>} : vector<64x4xbf16>, vector<64x4xbf16>, vector<64x64xf32> -> vector<64x64xf32>
    %cst_32 = arith.constant dense<0xFF800000> : vector<64xf32>
    %72 = vector.multi_reduction <maximumf>, %71, %cst_32 [1] : vector<64x64xf32> to vector<64xf32>
    %73 = vector.shape_cast %72 : vector<64xf32> to vector<64x1xf32>
    %74 = vector.broadcast %73 : vector<64x1xf32> to vector<64x64xf32>
    %75 = arith.subf %71, %74 : vector<64x64xf32>
    %76 = math.exp %75 : vector<64x64xf32>
    %cst_33 = arith.constant dense<0.000000e+00> : vector<64xf32>
    %77 = vector.multi_reduction <add>, %76, %cst_33 [1] : vector<64x64xf32> to vector<64xf32>
    %78 = vector.shape_cast %77 : vector<64xf32> to vector<64x1xf32>
    %79 = vector.broadcast %78 : vector<64x1xf32> to vector<64x64xf32>
    %80 = arith.divf %76, %79 : vector<64x64xf32>
    %81 = arith.truncf %80 : vector<64x64xf32> to vector<64x64xbf16>
    %cst_34 = arith.constant dense<0.000000e+00> : vector<64x32xf32>
    %82 = tpu.matmul %81, %70, %cst_34 {dimension_numbers = #tpu.dot_dimension_numbers<[1], [0], [0], [1], [0, 0, 1, 1], [], []>} : vector<64x64xbf16>, vector<64x32xbf16>, vector<64x32xf32> -> vector<64x32xf32>
    %c2 = arith.constant 2 : index
    %83 = memref.load %arg10[%c2] : memref<8xf32, #tpu.memory_space<smem>>
    %84 = vector.broadcast %83 : f32 to vector<64x32xf32>
    %85 = arith.mulf %84, %82 : vector<64x32xf32>
    %86 = arith.addf %85, %1 : vector<64x32xf32>
    %87 = arith.truncf %86 : vector<64x32xf32> to vector<64x32xbf16>
    %c64 = arith.constant 64 : index
    %c0_35 = arith.constant 0 : index
    %88 = vector.load %arg5[%c64, %c0_35] : memref<256x32xbf16, #tpu.memory_space<vmem>>, vector<32x32xbf16>
    %cst_36 = arith.constant dense<0.000000e+00> : vector<64x32xf32>
    %89 = tpu.matmul %87, %88, %cst_36 {dimension_numbers = #tpu.dot_dimension_numbers<[1], [0], [0], [1], [0, 0, 1, 1], [], []>} : vector<64x32xbf16>, vector<32x32xbf16>, vector<64x32xf32> -> vector<64x32xf32>
    %90 = arith.addf %67, %89 : vector<64x32xf32>
    %91 = vector.extract_strided_slice %8 {offsets = [0, 12], sizes = [64, 4], strides = [1, 1]} : vector<64x32xbf16> to vector<64x4xbf16>
    %92 = vector.extract_strided_slice %14 {offsets = [0, 12], sizes = [64, 4], strides = [1, 1]} : vector<64x32xbf16> to vector<64x4xbf16>
    %93 = vector.extract_strided_slice %20 {offsets = [0, 96], sizes = [64, 32], strides = [1, 1]} : vector<64x256xbf16> to vector<64x32xbf16>
    %cst_37 = arith.constant dense<0.000000e+00> : vector<64x64xf32>
    %94 = tpu.matmul %91, %92, %cst_37 {dimension_numbers = #tpu.dot_dimension_numbers<[1], [1], [0], [0], [0, 0, 1, 0], [], []>} : vector<64x4xbf16>, vector<64x4xbf16>, vector<64x64xf32> -> vector<64x64xf32>
    %cst_38 = arith.constant dense<0xFF800000> : vector<64xf32>
    %95 = vector.multi_reduction <maximumf>, %94, %cst_38 [1] : vector<64x64xf32> to vector<64xf32>
    %96 = vector.shape_cast %95 : vector<64xf32> to vector<64x1xf32>
    %97 = vector.broadcast %96 : vector<64x1xf32> to vector<64x64xf32>
    %98 = arith.subf %94, %97 : vector<64x64xf32>
    %99 = math.exp %98 : vector<64x64xf32>
    %cst_39 = arith.constant dense<0.000000e+00> : vector<64xf32>
    %100 = vector.multi_reduction <add>, %99, %cst_39 [1] : vector<64x64xf32> to vector<64xf32>
    %101 = vector.shape_cast %100 : vector<64xf32> to vector<64x1xf32>
    %102 = vector.broadcast %101 : vector<64x1xf32> to vector<64x64xf32>
    %103 = arith.divf %99, %102 : vector<64x64xf32>
    %104 = arith.truncf %103 : vector<64x64xf32> to vector<64x64xbf16>
    %cst_40 = arith.constant dense<0.000000e+00> : vector<64x32xf32>
    %105 = tpu.matmul %104, %93, %cst_40 {dimension_numbers = #tpu.dot_dimension_numbers<[1], [0], [0], [1], [0, 0, 1, 1], [], []>} : vector<64x64xbf16>, vector<64x32xbf16>, vector<64x32xf32> -> vector<64x32xf32>
    %c3 = arith.constant 3 : index
    %106 = memref.load %arg10[%c3] : memref<8xf32, #tpu.memory_space<smem>>
    %107 = vector.broadcast %106 : f32 to vector<64x32xf32>
    %108 = arith.mulf %107, %105 : vector<64x32xf32>
    %109 = arith.addf %108, %1 : vector<64x32xf32>
    %110 = arith.truncf %109 : vector<64x32xf32> to vector<64x32xbf16>
    %c96 = arith.constant 96 : index
    %c0_41 = arith.constant 0 : index
    %111 = vector.load %arg5[%c96, %c0_41] : memref<256x32xbf16, #tpu.memory_space<vmem>>, vector<32x32xbf16>
    %cst_42 = arith.constant dense<0.000000e+00> : vector<64x32xf32>
    %112 = tpu.matmul %110, %111, %cst_42 {dimension_numbers = #tpu.dot_dimension_numbers<[1], [0], [0], [1], [0, 0, 1, 1], [], []>} : vector<64x32xbf16>, vector<32x32xbf16>, vector<64x32xf32> -> vector<64x32xf32>
    %113 = arith.addf %90, %112 : vector<64x32xf32>
    %114 = vector.extract_strided_slice %8 {offsets = [0, 16], sizes = [64, 4], strides = [1, 1]} : vector<64x32xbf16> to vector<64x4xbf16>
    %115 = vector.extract_strided_slice %14 {offsets = [0, 16], sizes = [64, 4], strides = [1, 1]} : vector<64x32xbf16> to vector<64x4xbf16>
    %116 = vector.extract_strided_slice %20 {offsets = [0, 128], sizes = [64, 32], strides = [1, 1]} : vector<64x256xbf16> to vector<64x32xbf16>
    %cst_43 = arith.constant dense<0.000000e+00> : vector<64x64xf32>
    %117 = tpu.matmul %114, %115, %cst_43 {dimension_numbers = #tpu.dot_dimension_numbers<[1], [1], [0], [0], [0, 0, 1, 0], [], []>} : vector<64x4xbf16>, vector<64x4xbf16>, vector<64x64xf32> -> vector<64x64xf32>
    %cst_44 = arith.constant dense<0xFF800000> : vector<64xf32>
    %118 = vector.multi_reduction <maximumf>, %117, %cst_44 [1] : vector<64x64xf32> to vector<64xf32>
    %119 = vector.shape_cast %118 : vector<64xf32> to vector<64x1xf32>
    %120 = vector.broadcast %119 : vector<64x1xf32> to vector<64x64xf32>
    %121 = arith.subf %117, %120 : vector<64x64xf32>
    %122 = math.exp %121 : vector<64x64xf32>
    %cst_45 = arith.constant dense<0.000000e+00> : vector<64xf32>
    %123 = vector.multi_reduction <add>, %122, %cst_45 [1] : vector<64x64xf32> to vector<64xf32>
    %124 = vector.shape_cast %123 : vector<64xf32> to vector<64x1xf32>
    %125 = vector.broadcast %124 : vector<64x1xf32> to vector<64x64xf32>
    %126 = arith.divf %122, %125 : vector<64x64xf32>
    %127 = arith.truncf %126 : vector<64x64xf32> to vector<64x64xbf16>
    %cst_46 = arith.constant dense<0.000000e+00> : vector<64x32xf32>
    %128 = tpu.matmul %127, %116, %cst_46 {dimension_numbers = #tpu.dot_dimension_numbers<[1], [0], [0], [1], [0, 0, 1, 1], [], []>} : vector<64x64xbf16>, vector<64x32xbf16>, vector<64x32xf32> -> vector<64x32xf32>
    %c4 = arith.constant 4 : index
    %129 = memref.load %arg10[%c4] : memref<8xf32, #tpu.memory_space<smem>>
    %130 = vector.broadcast %129 : f32 to vector<64x32xf32>
    %131 = arith.mulf %130, %128 : vector<64x32xf32>
    %132 = arith.addf %131, %1 : vector<64x32xf32>
    %133 = arith.truncf %132 : vector<64x32xf32> to vector<64x32xbf16>
    %c128 = arith.constant 128 : index
    %c0_47 = arith.constant 0 : index
    %134 = vector.load %arg5[%c128, %c0_47] : memref<256x32xbf16, #tpu.memory_space<vmem>>, vector<32x32xbf16>
    %cst_48 = arith.constant dense<0.000000e+00> : vector<64x32xf32>
    %135 = tpu.matmul %133, %134, %cst_48 {dimension_numbers = #tpu.dot_dimension_numbers<[1], [0], [0], [1], [0, 0, 1, 1], [], []>} : vector<64x32xbf16>, vector<32x32xbf16>, vector<64x32xf32> -> vector<64x32xf32>
    %136 = arith.addf %113, %135 : vector<64x32xf32>
    %137 = vector.extract_strided_slice %8 {offsets = [0, 20], sizes = [64, 4], strides = [1, 1]} : vector<64x32xbf16> to vector<64x4xbf16>
    %138 = vector.extract_strided_slice %14 {offsets = [0, 20], sizes = [64, 4], strides = [1, 1]} : vector<64x32xbf16> to vector<64x4xbf16>
    %139 = vector.extract_strided_slice %20 {offsets = [0, 160], sizes = [64, 32], strides = [1, 1]} : vector<64x256xbf16> to vector<64x32xbf16>
    %cst_49 = arith.constant dense<0.000000e+00> : vector<64x64xf32>
    %140 = tpu.matmul %137, %138, %cst_49 {dimension_numbers = #tpu.dot_dimension_numbers<[1], [1], [0], [0], [0, 0, 1, 0], [], []>} : vector<64x4xbf16>, vector<64x4xbf16>, vector<64x64xf32> -> vector<64x64xf32>
    %cst_50 = arith.constant dense<0xFF800000> : vector<64xf32>
    %141 = vector.multi_reduction <maximumf>, %140, %cst_50 [1] : vector<64x64xf32> to vector<64xf32>
    %142 = vector.shape_cast %141 : vector<64xf32> to vector<64x1xf32>
    %143 = vector.broadcast %142 : vector<64x1xf32> to vector<64x64xf32>
    %144 = arith.subf %140, %143 : vector<64x64xf32>
    %145 = math.exp %144 : vector<64x64xf32>
    %cst_51 = arith.constant dense<0.000000e+00> : vector<64xf32>
    %146 = vector.multi_reduction <add>, %145, %cst_51 [1] : vector<64x64xf32> to vector<64xf32>
    %147 = vector.shape_cast %146 : vector<64xf32> to vector<64x1xf32>
    %148 = vector.broadcast %147 : vector<64x1xf32> to vector<64x64xf32>
    %149 = arith.divf %145, %148 : vector<64x64xf32>
    %150 = arith.truncf %149 : vector<64x64xf32> to vector<64x64xbf16>
    %cst_52 = arith.constant dense<0.000000e+00> : vector<64x32xf32>
    %151 = tpu.matmul %150, %139, %cst_52 {dimension_numbers = #tpu.dot_dimension_numbers<[1], [0], [0], [1], [0, 0, 1, 1], [], []>} : vector<64x64xbf16>, vector<64x32xbf16>, vector<64x32xf32> -> vector<64x32xf32>
    %c5 = arith.constant 5 : index
    %152 = memref.load %arg10[%c5] : memref<8xf32, #tpu.memory_space<smem>>
    %153 = vector.broadcast %152 : f32 to vector<64x32xf32>
    %154 = arith.mulf %153, %151 : vector<64x32xf32>
    %155 = arith.addf %154, %1 : vector<64x32xf32>
    %156 = arith.truncf %155 : vector<64x32xf32> to vector<64x32xbf16>
    %c160 = arith.constant 160 : index
    %c0_53 = arith.constant 0 : index
    %157 = vector.load %arg5[%c160, %c0_53] : memref<256x32xbf16, #tpu.memory_space<vmem>>, vector<32x32xbf16>
    %cst_54 = arith.constant dense<0.000000e+00> : vector<64x32xf32>
    %158 = tpu.matmul %156, %157, %cst_54 {dimension_numbers = #tpu.dot_dimension_numbers<[1], [0], [0], [1], [0, 0, 1, 1], [], []>} : vector<64x32xbf16>, vector<32x32xbf16>, vector<64x32xf32> -> vector<64x32xf32>
    %159 = arith.addf %136, %158 : vector<64x32xf32>
    %160 = vector.extract_strided_slice %8 {offsets = [0, 24], sizes = [64, 4], strides = [1, 1]} : vector<64x32xbf16> to vector<64x4xbf16>
    %161 = vector.extract_strided_slice %14 {offsets = [0, 24], sizes = [64, 4], strides = [1, 1]} : vector<64x32xbf16> to vector<64x4xbf16>
    %162 = vector.extract_strided_slice %20 {offsets = [0, 192], sizes = [64, 32], strides = [1, 1]} : vector<64x256xbf16> to vector<64x32xbf16>
    %cst_55 = arith.constant dense<0.000000e+00> : vector<64x64xf32>
    %163 = tpu.matmul %160, %161, %cst_55 {dimension_numbers = #tpu.dot_dimension_numbers<[1], [1], [0], [0], [0, 0, 1, 0], [], []>} : vector<64x4xbf16>, vector<64x4xbf16>, vector<64x64xf32> -> vector<64x64xf32>
    %cst_56 = arith.constant dense<0xFF800000> : vector<64xf32>
    %164 = vector.multi_reduction <maximumf>, %163, %cst_56 [1] : vector<64x64xf32> to vector<64xf32>
    %165 = vector.shape_cast %164 : vector<64xf32> to vector<64x1xf32>
    %166 = vector.broadcast %165 : vector<64x1xf32> to vector<64x64xf32>
    %167 = arith.subf %163, %166 : vector<64x64xf32>
    %168 = math.exp %167 : vector<64x64xf32>
    %cst_57 = arith.constant dense<0.000000e+00> : vector<64xf32>
    %169 = vector.multi_reduction <add>, %168, %cst_57 [1] : vector<64x64xf32> to vector<64xf32>
    %170 = vector.shape_cast %169 : vector<64xf32> to vector<64x1xf32>
    %171 = vector.broadcast %170 : vector<64x1xf32> to vector<64x64xf32>
    %172 = arith.divf %168, %171 : vector<64x64xf32>
    %173 = arith.truncf %172 : vector<64x64xf32> to vector<64x64xbf16>
    %cst_58 = arith.constant dense<0.000000e+00> : vector<64x32xf32>
    %174 = tpu.matmul %173, %162, %cst_58 {dimension_numbers = #tpu.dot_dimension_numbers<[1], [0], [0], [1], [0, 0, 1, 1], [], []>} : vector<64x64xbf16>, vector<64x32xbf16>, vector<64x32xf32> -> vector<64x32xf32>
    %c6 = arith.constant 6 : index
    %175 = memref.load %arg10[%c6] : memref<8xf32, #tpu.memory_space<smem>>
    %176 = vector.broadcast %175 : f32 to vector<64x32xf32>
    %177 = arith.mulf %176, %174 : vector<64x32xf32>
    %178 = arith.addf %177, %1 : vector<64x32xf32>
    %179 = arith.truncf %178 : vector<64x32xf32> to vector<64x32xbf16>
    %c192 = arith.constant 192 : index
    %c0_59 = arith.constant 0 : index
    %180 = vector.load %arg5[%c192, %c0_59] : memref<256x32xbf16, #tpu.memory_space<vmem>>, vector<32x32xbf16>
    %cst_60 = arith.constant dense<0.000000e+00> : vector<64x32xf32>
    %181 = tpu.matmul %179, %180, %cst_60 {dimension_numbers = #tpu.dot_dimension_numbers<[1], [0], [0], [1], [0, 0, 1, 1], [], []>} : vector<64x32xbf16>, vector<32x32xbf16>, vector<64x32xf32> -> vector<64x32xf32>
    %182 = arith.addf %159, %181 : vector<64x32xf32>
    %183 = vector.extract_strided_slice %8 {offsets = [0, 28], sizes = [64, 4], strides = [1, 1]} : vector<64x32xbf16> to vector<64x4xbf16>
    %184 = vector.extract_strided_slice %14 {offsets = [0, 28], sizes = [64, 4], strides = [1, 1]} : vector<64x32xbf16> to vector<64x4xbf16>
    %185 = vector.extract_strided_slice %20 {offsets = [0, 224], sizes = [64, 32], strides = [1, 1]} : vector<64x256xbf16> to vector<64x32xbf16>
    %cst_61 = arith.constant dense<0.000000e+00> : vector<64x64xf32>
    %186 = tpu.matmul %183, %184, %cst_61 {dimension_numbers = #tpu.dot_dimension_numbers<[1], [1], [0], [0], [0, 0, 1, 0], [], []>} : vector<64x4xbf16>, vector<64x4xbf16>, vector<64x64xf32> -> vector<64x64xf32>
    %cst_62 = arith.constant dense<0xFF800000> : vector<64xf32>
    %187 = vector.multi_reduction <maximumf>, %186, %cst_62 [1] : vector<64x64xf32> to vector<64xf32>
    %188 = vector.shape_cast %187 : vector<64xf32> to vector<64x1xf32>
    %189 = vector.broadcast %188 : vector<64x1xf32> to vector<64x64xf32>
    %190 = arith.subf %186, %189 : vector<64x64xf32>
    %191 = math.exp %190 : vector<64x64xf32>
    %cst_63 = arith.constant dense<0.000000e+00> : vector<64xf32>
    %192 = vector.multi_reduction <add>, %191, %cst_63 [1] : vector<64x64xf32> to vector<64xf32>
    %193 = vector.shape_cast %192 : vector<64xf32> to vector<64x1xf32>
    %194 = vector.broadcast %193 : vector<64x1xf32> to vector<64x64xf32>
    %195 = arith.divf %191, %194 : vector<64x64xf32>
    %196 = arith.truncf %195 : vector<64x64xf32> to vector<64x64xbf16>
    %cst_64 = arith.constant dense<0.000000e+00> : vector<64x32xf32>
    %197 = tpu.matmul %196, %185, %cst_64 {dimension_numbers = #tpu.dot_dimension_numbers<[1], [0], [0], [1], [0, 0, 1, 1], [], []>} : vector<64x64xbf16>, vector<64x32xbf16>, vector<64x32xf32> -> vector<64x32xf32>
    %c7 = arith.constant 7 : index
    %198 = memref.load %arg10[%c7] : memref<8xf32, #tpu.memory_space<smem>>
    %199 = vector.broadcast %198 : f32 to vector<64x32xf32>
    %200 = arith.mulf %199, %197 : vector<64x32xf32>
    %201 = arith.addf %200, %1 : vector<64x32xf32>
    %202 = arith.truncf %201 : vector<64x32xf32> to vector<64x32xbf16>
    %c224 = arith.constant 224 : index
    %c0_65 = arith.constant 0 : index
    %203 = vector.load %arg5[%c224, %c0_65] : memref<256x32xbf16, #tpu.memory_space<vmem>>, vector<32x32xbf16>
    %cst_66 = arith.constant dense<0.000000e+00> : vector<64x32xf32>
    %204 = tpu.matmul %202, %203, %cst_66 {dimension_numbers = #tpu.dot_dimension_numbers<[1], [0], [0], [1], [0, 0, 1, 1], [], []>} : vector<64x32xbf16>, vector<32x32xbf16>, vector<64x32xf32> -> vector<64x32xf32>
    %205 = arith.addf %182, %204 : vector<64x32xf32>
    %c0_67 = arith.constant 0 : index
    %c0_68 = arith.constant 0 : index
    %206 = vector.load %arg9[%c0_67, %c0_68] : memref<1x32xf32, #tpu.memory_space<vmem>>, vector<1x32xf32>
    %207 = vector.broadcast %206 : vector<1x32xf32> to vector<64x32xf32>
    %208 = arith.addf %205, %207 : vector<64x32xf32>
    %c0_69 = arith.constant 0 : index
    %c0_70 = arith.constant 0 : index
    %c0_71 = arith.constant 0 : index
    %209 = vector.load %arg11[%c0_69, %c0_70, %c0_71] : memref<1x64x32xf32, #tpu.memory_space<vmem>>, vector<1x64x32xf32>
    %210 = vector.shape_cast %209 : vector<1x64x32xf32> to vector<64x32xf32>
    %211 = vector.shape_cast %208 : vector<64x32xf32> to vector<1x64x32xf32>
    tpu.vector_store %arg11[%c0_69, %c0_70, %c0_71], %211 {strides = array<i32>} : memref<1x64x32xf32, #tpu.memory_space<vmem>>, vector<1x64x32xf32>,
    return
  }
  func.func @transform_0(%arg0: i32) -> (i32, i32, i32) {
    %c0_i32 = arith.constant 0 : i32
    %c0_i32_0 = arith.constant 0 : i32
    %c0_i32_1 = arith.constant 0 : i32
    return %arg0, %c0_i32, %c0_i32_0 : i32, i32, i32
  }
  func.func @transform_1(%arg0: i32) -> (i32, i32) {
    %c0_i32 = arith.constant 0 : i32
    %c0_i32_0 = arith.constant 0 : i32
    %c0_i32_1 = arith.constant 0 : i32
    return %c0_i32, %c0_i32_0 : i32, i32
  }
  func.func @transform_2(%arg0: i32) -> (i32, i32) {
    %c0_i32 = arith.constant 0 : i32
    %c0_i32_0 = arith.constant 0 : i32
    %c0_i32_1 = arith.constant 0 : i32
    return %c0_i32, %c0_i32_0 : i32, i32
  }
  func.func @transform_3(%arg0: i32) -> (i32, i32) {
    %c0_i32 = arith.constant 0 : i32
    %c0_i32_0 = arith.constant 0 : i32
    %c0_i32_1 = arith.constant 0 : i32
    return %c0_i32, %c0_i32_0 : i32, i32
  }
  func.func @transform_4(%arg0: i32) -> (i32, i32) {
    %c0_i32 = arith.constant 0 : i32
    %c0_i32_0 = arith.constant 0 : i32
    %c0_i32_1 = arith.constant 0 : i32
    return %c0_i32, %c0_i32_0 : i32, i32
  }
  func.func @transform_5(%arg0: i32) -> (i32, i32) {
    %c0_i32 = arith.constant 0 : i32
    %c0_i32_0 = arith.constant 0 : i32
    %c0_i32_1 = arith.constant 0 : i32
    return %c0_i32, %c0_i32_0 : i32, i32
  }
  func.func @transform_6(%arg0: i32) -> (i32, i32) {
    %c0_i32 = arith.constant 0 : i32
    %c0_i32_0 = arith.constant 0 : i32
    %c0_i32_1 = arith.constant 0 : i32
    return %c0_i32, %c0_i32_0 : i32, i32
  }
  func.func @transform_7(%arg0: i32) -> (i32, i32) {
    %c0_i32 = arith.constant 0 : i32
    %c0_i32_0 = arith.constant 0 : i32
    %c0_i32_1 = arith.constant 0 : i32
    return %c0_i32, %c0_i32_0 : i32, i32
  }
  func.func @transform_8(%arg0: i32) -> (i32, i32) {
    %c0_i32 = arith.constant 0 : i32
    %c0_i32_0 = arith.constant 0 : i32
    %c0_i32_1 = arith.constant 0 : i32
    return %c0_i32, %c0_i32_0 : i32, i32
  }
  func.func @transform_9(%arg0: i32) -> i32 {
    %c0_i32 = arith.constant 0 : i32
    %c0_i32_0 = arith.constant 0 : i32
    return %c0_i32 : i32
  }
  func.func @transform_10(%arg0: i32) -> (i32, i32, i32) {
    %c0_i32 = arith.constant 0 : i32
    %c0_i32_0 = arith.constant 0 : i32
    %c0_i32_1 = arith.constant 0 : i32
    return %arg0, %c0_i32, %c0_i32_0 : i32, i32, i32
  }
}

</mosaic_0001>

<bundles_post_ra>
// kernel: multi_head_self_attention.1
= control target key start
LH: loop header
LB: loop body
LE: loop exit
PB: predicated region body
PF: predicated region fallthrough
CT: control target
= control target key end

     0   :  { %s7360_s0 = inlined_call_operand.hbm [shape: f32[2,64,32], index: 0, kind: input, shape index: {}]   ;;  %s7361_s1 = inlined_call_operand.vmem [shape: bf16[32,32], index: 1, kind: input, shape index: {}]   ;;  %s7362_s2 = inlined_call_operand.hbm [shape: bf16[32,32], index: 2, kind: input, shape index: {}]   ;;  %s7363_s3 = inlined_call_operand.hbm [shape: bf16[32,256], index: 3, kind: input, shape index: {}]   ;;  %s7364_s4 = inlined_call_operand.hbm [shape: bf16[256,32], index: 4, kind: input, shape index: {}]   ;;  %s7365_s5 = inlined_call_operand.hbm [shape: f32[1,32], index: 5, kind: input, shape index: {}]   ;;  %s7366_s6 = inlined_call_operand.hbm [shape: f32[1,32], index: 6, kind: input, shape index: {}]   ;;  %s7367_s7 = inlined_call_operand.hbm [shape: f32[1,256], index: 7, kind: input, shape index: {}]   ;;  %s7368_s8 = inlined_call_operand.vmem [shape: f32[1,32], index: 8, kind: input, shape index: {}]   ;;  %s7369_s9 = inlined_call_operand.hbm [shape: f32[8], index: 9, kind: input, shape index: {}]   ;;  %s7370_s10 = inlined_call_operand.hbm [shape: f32[2,64,32], index: 10, kind: output, shape index: {}]  }
   0x1   :  { %7380 = sst [smem:[#allocation26_spill]] %s7362_s2 }
   0x2   :  { %7381 = sst [smem:[#allocation27_spill]] %s7363_s3 }
   0x3   :  { %7382 = sst [smem:[#allocation28_spill]] %s7364_s4 }
   0x4   :  { %7383 = sst [smem:[#allocation29_spill]] %s7365_s5 }
   0x5   :  { %15 = vsyncpa [#allocation3], 0 }
   0x6   :  { %17 = vsyncpa [#allocation3 + $0x1], 0 }
   0x7   :  { %18 = vsyncpa [#allocation7], 0 }
   0x8   :  { %19 = vsyncpa [#allocation10], 0 }
   0x9   :  { %20 = vsyncpa [#allocation13], 0 }
   0xa   :  { %21 = vsyncpa [#allocation5], 0 }
   0xb   :  { %22 = vsyncpa [#allocation4], 0 }
   0xc   :  { %24 = vsyncpa [#allocation4 + $0x1], 0  ;;  %s5777_s13 = smov 0   ;;  %s5779_s14 = smov 0  }
   0xd   :  { %s5781_s15 = smov 0   ;;  %s5783_s16 = smov 0  }
   0xe LB: > { %s5696_s17 = smov [#allocation6]   ;;  %s5798_s19 = sadd.s32 4294967295, %s5694_s16   ;;  %s5694_s16 = sphi %s5783_s16, %s7420_s16   ;;  %s5690_s15 = sphi %s5781_s15, %s7419_s15   ;;  %s5686_s14 = sphi %s5779_s14, %s7418_s14   ;;  %s5682_s13 = sphi %s5777_s13, %s7417_s13  }
   0xf   : > { %s291_s18 = sshll.u32 %s5696_s17, 4  ;;  %p4212_p0 = scmp.ge.s32.totalorder %s5694_s16, 1  ;;  %s292_s18 = int_to_ptr.vmem [resolvable:$true] %s291_s18 }
  0x10   : > { %p7371_p1 = scmp.eq.s32.totalorder %s5798_s19, 0  ;;  %p276_p2 = scmp.lt.s32.totalorder %s5694_s16, 3 }
  0x11   : > { %s5697_s21 = smov [#allocation9]   ;;  %s5698_s24 = smov [#allocation12]  }
  0x12   : > { %p5803_p3 = pnand %p4212_p0, %p276_p2  ;;  %s317_s22 = sshll.u32 %s5697_s21, 4  ;;  %s5816_s22 = int_to_ptr.vmem [resolvable:$true] %s317_s22 }
  0x13   : > { %s342_s25 = sshll.u32 %s5698_s24, 4  ;;  %s5430_s27 = scalar_lea.vmem %s292_s18, 256  ;;  %s5818_s25 = int_to_ptr.vmem [resolvable:$true] %s342_s25 }
  0x14   : > { %s7384_s20 = scalar_select %p5803_p3, 1, 0 }
  0x15   : > { %p5011_p5 = pneg %p5803_p3  ;;  %p5431_p8 = scmp.ne.s32.totalorder %s292_s18, %s5430_s27 }
  0x16   : > { %p5438_p11 = scmp.lt.s32.totalorder %s292_s18, %s292_s18  ;;  %p5439_p12 = scmp.lt.s32.totalorder %s5430_s27, %s5430_s27 }
  0x17   : > { %p5812_p6 = pnand %p5011_p5, %p7371_p1 }
  0x18   : > { %p5440_p13 = por %p5439_p12, %p5438_p11 }
  0x19   : > { %p5822_p7 = pneg %p5812_p6 }
  0x1b   : > { %p5433_p9 = pnand %p5431_p8, %p5822_p7 }
  0x1d   : > { %p5434_p10 = pneg %p5433_p9 }
  0x1f   : > { %p5441_p0 = pnand %p5440_p13, %p5434_p10 }
  0x21   : > { %5444 = shalt.err (!%p5441_p0)
}
  0x22   : > { %s5699_s28 = smov 64   ;;  %s5700_s29 = smov 4  }
  0x23   : > { %s7387_s2 = sld [smem:[#allocation26_spill]]  ;;  %s5456_s12 = scalar_lea.vmem %s5816_s22, 2048 }
  0x24   : > { %p5457_p2 = scmp.ne.s32.totalorder %s5816_s22, %s5456_s12  ;;  %p5464_p9 = scmp.lt.s32.totalorder %s5816_s22, %s5816_s22 }
  0x25   : > { %p5465_p10 = scmp.lt.s32.totalorder %s5456_s12, %s5456_s12 }
  0x26   : > { %p5459_p5 = pnand %p5457_p2, %p5822_p7 }
  0x27   : > { %p5466_p11 = por %p5465_p10, %p5464_p9 }
  0x28   : > { %p5460_p8 = pneg %p5459_p5 }
  0x29   : > { %5014 = dma.hbm_to_vmem [thread:$0]  (!%p5812_p6), %s7387_s2, 256, %s292_s18, [#allocation7], %s5699_s28, %s5699_s28, %s5700_s29  }
  0x2a   : > { %p5467_p12 = pnand %p5466_p11, %p5460_p8 }
  0x2c   : > { %5470 = shalt.err (!%p5467_p12)
}
  0x2d   : > { %s7388_s4 = sld [smem:[#allocation28_spill]]  ;;  %s5482_s18 = scalar_lea.vmem %s5818_s25, 16 }
  0x2e   : > { %p5483_p13 = scmp.ne.s32.totalorder %s5818_s25, %s5482_s18  ;;  %s5489_s24 = scalar_lea.vmem %s5818_s25, 32 }
  0x2f   : > { %p5490_p5 = scmp.lt.s32.totalorder %s5818_s25, %s5818_s25  ;;  %p5491_p8 = scmp.lt.s32.totalorder %s5489_s24, %s5482_s18 }
  0x30   : > { %p5485_p0 = pnand %p5483_p13, %p5822_p7 }
  0x31   : > { %p5492_p9 = por %p5491_p8, %p5490_p5 }
  0x32   : > { %p5486_p2 = pneg %p5485_p0 }
  0x33   : > { %5020 = dma.hbm_to_vmem [thread:$0]  (!%p5812_p6), %s7388_s4, 2048, %s5816_s22, [#allocation10], %s5699_s28, %s5699_s28, %s5700_s29  }
  0x34   : > { %p5493_p10 = pnand %p5492_p9, %p5486_p2 }
  0x36   : > { %5496 = shalt.err (!%p5493_p10)
}
  0x37   : > { %5026 = dma.hbm_to_vmem [thread:$0]  (!%p5812_p6), %s7366_s6, 16, %s5818_s25, [#allocation13]  }
  0x38   : > { %s5701_s22 = smov [#allocation8]  }
  0x39   : > { %s304_s28 = sshll.u32 %s5701_s22, 4  ;;  %s305_s28 = int_to_ptr.vmem [resolvable:$true] %s304_s28 }
  0x3a   : > { %s5508_s29 = scalar_lea.vmem %s305_s28, 512  ;;  %p5516_p0 = scmp.lt.s32.totalorder %s305_s28, %s305_s28 }
  0x3b   : > { %p5509_p11 = scmp.ne.s32.totalorder %s305_s28, %s5508_s29  ;;  %p5517_p5 = scmp.lt.s32.totalorder %s5508_s29, %s5508_s29 }
  0x3d   : > { %p5511_p12 = pnand %p5509_p11, %p5822_p7  ;;  %p5518_p2 = por %p5517_p5, %p5516_p0 }
  0x3f   : > { %p5512_p13 = pneg %p5511_p12 }
  0x41   : > { %p5519_p8 = pnand %p5518_p2, %p5512_p13 }
  0x43   : > { %5522 = shalt.err (!%p5519_p8)
}
  0x44   : > { %s7373_s11 = smov 128   ;;  %s7374_s12 = smov 8  }
  0x45   : > { %s7389_s3 = sld [smem:[#allocation27_spill]]  ;;  %s5704_s21 = smov [#allocation11]  }
  0x46   : > { %s331_s18 = sshll.u32 %s5704_s21, 4  ;;  %s5705_s24 = smov [#allocation14]   ;;  %s332_s18 = int_to_ptr.vmem [resolvable:$true] %s331_s18 }
  0x47   : > { %s353_s27 = sshll.u32 %s5705_s24, 4  ;;  %s5534_s30 = scalar_lea.vmem %s332_s18, 16  ;;  %s354_s27 = int_to_ptr.vmem [resolvable:$true] %s353_s27 }
  0x48   : > { %p5535_p9 = scmp.ne.s32.totalorder %s332_s18, %s5534_s30  ;;  %s5541_s22 = scalar_lea.vmem %s332_s18, 32 }
  0x49   : > { %p5542_p12 = scmp.lt.s32.totalorder %s332_s18, %s332_s18  ;;  %p5543_p13 = scmp.lt.s32.totalorder %s5541_s22, %s5534_s30 }
  0x4a   : > { %p5537_p10 = pnand %p5535_p9, %p5822_p7 }
  0x4b   : > { %5017 = dma.hbm_to_vmem [thread:$0]  (!%p5812_p6), %s7389_s3, 512, %s305_s28, [#allocation7], %s7373_s11, %s7373_s11, %s7374_s12  }
  0x4c   : > { %p5538_p11 = pneg %p5537_p10  ;;  %p5544_p0 = por %p5543_p13, %p5542_p12 }
  0x4e   : > { %p5545_p5 = pnand %p5544_p0, %p5538_p11 }
  0x50   : > { %5548 = shalt.err (!%p5545_p5)
}
  0x51   : > { %s7390_s5 = sld [smem:[#allocation29_spill]]  ;;  %s5560_s25 = scalar_lea.vmem %s354_s27, 32 }
  0x52   : > { %p5561_p2 = scmp.ne.s32.totalorder %s354_s27, %s5560_s25  ;;  %p5568_p9 = scmp.lt.s32.totalorder %s354_s27, %s354_s27 }
  0x53   : > { %p5569_p10 = scmp.lt.s32.totalorder %s5560_s25, %s5560_s25 }
  0x54   : > { %p5563_p8 = pnand %p5561_p2, %p5822_p7 }
  0x55   : > { %p5570_p1 = por %p5569_p10, %p5568_p9 }
  0x56   : > { %p5564_p4 = pneg %p5563_p8 }
  0x57   : > { %5023 = dma.hbm_to_vmem [thread:$0]  (!%p5812_p6), %s7390_s5, 16, %s332_s18, [#allocation10]  }
  0x58   : > { %p5571_p3 = pnand %p5570_p1, %p5564_p4 }
  0x5a   : > { %5574 = shalt.err (!%p5571_p3)
}
  0x5b   : > { %5029 = dma.hbm_to_vmem [thread:$0]  (!%p5812_p6), %s7367_s7, 32, %s354_s27, [#allocation13]  }
  0x5c   : > { %s5706_s26 = smov [#allocation15]   ;;  %s4211_s30 = sadd.s32 4294967294, %s5694_s16  }
  0x5d   : > { %5032 = dma.hbm_to_smem (!%p5812_p6), %s7369_s9, 16, %s5706_s26, [#allocation5]  }
  0x5e   : > { %s5889_s22 = sadd.s32 1, %s5694_s16   ;;  %s37_s28 = sadd.s32 1, %s5690_s15 }
  0x5f   : > { %s34_s29 = ssub.s32 %s5694_s16, %s5889_s22  ;;  %p44_p1 = scmp.ne.s32.totalorder %s5690_s15, %s5686_s14 }
  0x60   : > { %p35_p3 = scmp.eq.s32.totalorder %s34_s29, 0  ;;  %p45_p4 = scmp.eq.s32.totalorder %s5694_s16, 0 }
  0x61   : > { %p50_p7 = scmp.ne.s32.totalorder %s5686_s14, %s5682_s13  ;;  %p263_p11 = scmp.eq.s32.totalorder %s5798_s19, 1 }
  0x62   : > { %s5901_s27 = scalar_select %p35_p3, %s5690_s15, %s37_s28  }
  0x63   : > { %p46_p12 = por %p45_p4, %p44_p1  ;;  %p7391_p13 = scmp.eq.s32.totalorder %s5798_s19, 0 }
  0x64   : > { %p5909_p6 = por %p263_p11, %p44_p1  ;;  %p269_p5 = scmp.eq.s32.totalorder %s4211_s30, 1 }
  0x65   : > { %p5905_p0 = por %p7391_p13, %p50_p7  ;;  %p5048_p2 = scmp.lt.s32.totalorder %s5694_s16, 2 }
  0x66   : > { %s7393_s25 = scalar_select %p5909_p6, 1, 0 }
  0x67   : > { %s7392_s23 = scalar_select %p5905_p0, 1, 0 }
  0x68   : > { %s376_s17 = sand.u32 1, %s5690_s15   ;;  %p5915_p8 = por %p269_p5, %p50_p7 }
  0x69   : > { %s4221_s26 = sshll.u32 %s376_s17, 6  ;;  %s4381_s18 = sshll.u32 %s5694_s16, 10 }
  0x6a   : > { %s7394_s21 = scalar_select %p5915_p8, 1, 0 }
  0x6b   : > { %s5923_s29 = scalar_lea.hbm %s7360_s0, %s4381_s18  ;;  %s380_s11 = scalar_lea.vmem [#allocation2], %s4221_s26 }
  0x6c   : > { %s387_s12 = sshll.u32 %s380_s11, 4  ;;  %p5925_p9 = pnand %p5048_p2, %p46_p12  ;;  %s5929_s12 = int_to_ptr.vmem [resolvable:$true] %s387_s12 }
  0x6d   : > { %s5931_s2 = scalar_lea.sflag [#allocation3], %s376_s17  ;;  %s5586_s3 = scalar_lea.hbm %s5923_s29, 1024 }
  0x6e   : > { %p5587_p10 = scmp.ne.s32.totalorder %s5923_s29, %s5586_s3  ;;  %p5588_p1 = pneg %p5925_p9 }
  0x6f   : > { %s5591_s26 = scalar_lea.hbm %s7360_s0, 2048  ;;  %p5592_p7 = scmp.lt.s32.totalorder %s5923_s29, %s7360_s0 }
  0x70   : > { %p5589_p3 = pnand %p5588_p1, %p5587_p10  ;;  %p5593_p11 = scmp.lt.s32.totalorder %s5591_s26, %s5586_s3 }
  0x72   : > { %p5590_p4 = pneg %p5589_p3  ;;  %p5594_p12 = por %p5593_p11, %p5592_p7 }
  0x74   : > { %p5595_p13 = pnand %p5594_p12, %p5590_p4 }
  0x76   : > { %5598 = shalt.err (!%p5595_p13)
}
  0x77   : > { %s5599_s17 = scalar_lea.vmem %s5929_s12, 1024  ;;  %s5707_s4 = smov [#allocation2]  }
  0x78   : > { %p5600_p5 = scmp.ne.s32.totalorder %s5929_s12, %s5599_s17  ;;  %s5604_s5 = sshll.u32 %s5707_s4, 4  ;;  %s5605_s5 = int_to_ptr.vmem [resolvable:$false] %s5604_s5 }
  0x79   : > { %s5606_s18 = scalar_lea.vmem %s5605_s5, 2048  ;;  %p5607_p3 = scmp.lt.s32.totalorder %s5929_s12, %s5605_s5 }
  0x7a   : > { %p5602_p2 = pnand %p5600_p5, %p5588_p1  ;;  %p5608_p8 = scmp.lt.s32.totalorder %s5606_s18, %s5599_s17 }
  0x7c   : > { %p5603_p10 = pneg %p5602_p2  ;;  %p5609_p6 = por %p5608_p8, %p5607_p3 }
  0x7e   : > { %p5610_p0 = pnand %p5609_p6, %p5603_p10 }
  0x80   : > { %5613 = shalt.err (!%p5610_p0)
}
  0x81   : > { %s7396_s3 = smov 8   ;;  %s7397_s24 = smov 128  }
  0x82   : > { %5036 = dma.hbm_to_vmem [thread:$0]  (!%p5925_p9), %s5923_s29, 1024, %s5929_s12, %s5931_s2, %s7397_s24, %s7397_s24, %s7396_s3  }
  0x83   : > { %p7398_p1 = scmp.ne.s32.totalorder %s7384_s20, 0 }
  0x85   : > { %399 = sbr.rel (%p7398_p1) target bundleno = 3585 (0xe01), region = 60 }
  0x8a   : > { %s5958_s4 = sand.u32 1, %s5686_s14   ;;  %p7399_p0 = scmp.ne.s32.totalorder %s7392_s23, 0 }
  0x8b   : > { %s4225_s5 = sshll.u32 %s5958_s4, 6  ;;  %s402_s26 = scalar_lea.sflag [#allocation3], %s5958_s4 }
  0x8c   : > { %s5964_s30 = scalar_lea.vmem [#allocation2], %s4225_s5 }
  0x8d   : > { %5657 = dma.done.wait (%p7399_p0), %s402_s26, 1024  }
  0x8e   : > { %5659 = vsyncadd (%p7399_p0), %s402_s26, 4294966272  ;;  %p7400_p6 = scmp.eq.s32.totalorder %s5798_s19, 0 }
  0x90   : > { %5661 = dma.done.wait (%p7400_p6), [#allocation7], 768   ;;  %p7401_p8 = pmov %p7400_p6 }
  0x91   : > { %p7402_p9 = pmov %p7400_p6 }
  0x92   : > { %5663 = vsyncadd (%p7401_p8), [#allocation7], 4294966528 }
  0x93   : > { %5665 = dma.done.wait (%p7402_p9), [#allocation10], 2064   ;;  %p7403_p4 = pmov %p7400_p6 }
  0x95   : > { %5667 = vsyncadd (%p7403_p4), [#allocation10], 4294965232  ;;  %p7404_p7 = pmov %p7403_p4 }
  0x96   : > { %p7405_p11 = pmov %p7403_p4 }
  0x97   : > { %5669 = dma.done.wait (%p7404_p7), [#allocation13], 48  }
  0x98   : > { %5671 = vsyncadd (%p7405_p11), [#allocation13], 4294967248  ;;  %p7406_p12 = pmov %p7403_p4 }
  0x99   : > { %p7407_p13 = pmov %p7403_p4 }
  0x9a   : > { %5673 = dma.done.wait (%p7406_p12), [#allocation5], 16  }
  0x9b   : > { %5675 = vsyncadd (%p7407_p13), [#allocation5], 4294967280 }
  0x9c   : > { %438 = sfence }
  0x9d   : > { %v5113_v0 = vld [vmem:[#allocation6 + $0x8] sm:$0xff]   ;;  %v5114_v1 = vld [vmem:[#allocation6] sm:$0xff]   ;;  %vm507_vm0 = vcmask 261120   ;;  %v474_v5 = vld [vmem:[%s5964_s30 + $0x10] sm:$0xff]  ;;  %s5708_s29 = smov 124   ;;  %vm798_vm1 = vcmask 31744  }
  0x9e   : > { %4583 = vmatprep.subr.bf16.mxu1 %v5113_v0  ;;  %v472_v2 = vld [vmem:[%s5964_s30] sm:$0xff]  ;;  %v473_v3 = vld [vmem:[%s5964_s30 + $0x8] sm:$0xff]  ;;  %v475_v6 = vld [vmem:[%s5964_s30 + $0x18] sm:$0xff]  ;;  %vm888_vm2 = vcmask 523264   ;;  %s5710_s11 = smov 96   ;;  %s5711_s28 = smov 120  }
  0x9f   : > { %4584 = vmatpush3.bf16.msra.mxu1 %v5113_v0  ;;  %v5988_v4 = vpack.c.bf16 %v473_v3, %v472_v2  ;;  %v476_v7 = vld [vmem:[%s5964_s30 + $0x20] sm:$0xff]  ;;  %v477_v8 = vld [vmem:[%s5964_s30 + $0x28] sm:$0xff]  ;;  %v6001_v10 = vpack.c.bf16 %v475_v6, %v474_v5  ;;  %v478_v13 = vld [vmem:[%s5964_s30 + $0x30] sm:$0xff]  ;;  %v5709_v0 = vmov 0   ;;  %s5712_s17 = smov 116   ;;  %s1058_s18 = sld [smem:[#allocation15]] }
  0xa0   : > { %4585 = vmatprep.subr.bf16.mxu1 %v5114_v1  ;;  %v5115_v9 = vld [vmem:[%s7361_s1 + $0x8] sm:$0xff]   ;;  %v5116_v11 = vld [vmem:[%s7361_s1] sm:$0xff]   ;;  %v6006_v12 = vpack.c.bf16 %v477_v8, %v476_v7  ;;  %v479_v14 = vld [vmem:[%s5964_s30 + $0x38] sm:$0xff]  ;;  %s4272_s3 = sld [smem:[#allocation15 + $0x1]]  ;;  %s5713_s24 = smov 64  }
  0xa1   : > { %4587 = vmatprep.mubr.msk.bf16.mxu1 %vm507_vm0, %v5988_v4  ;;  %4575 = vmatprep.mubr.msk.bf16.mxu0 %vm507_vm0, %v5988_v4  ;;  %v6014_v15 = vpack.c.bf16 %v479_v14, %v478_v13  ;;  %v4241_v17 = vld [vmem:[#allocation12] ss:$0 sm:$0xff]  ;;  %v4234_v26 = vld [vmem:[#allocation11] ss:$0 sm:$0xff]  ;;  %v5117_v58 = vld [vmem:[#allocation8 + $0x10] ss:$8 sps:$4 sm:$0xff]  }
  0xa2   : > { %4571 = vmatprep.subr.bf16.mxu0 %v5115_v9  ;;  %v5119_v59 = vld [vmem:[#allocation8 + $0x14] ss:$8 sps:$4 sm:$0xff]   ;;  %v5122_v62 = vld [vmem:[#allocation8 + $0x4] ss:$8 sps:$4 sm:$0xff]   ;;  %v5120_v63 = vld [vmem:[#allocation8] ss:$8 sps:$4 sm:$0xff]  }
  0xa3   : > { %4586 = vmatpush3.bf16.msra.mxu1 %v5114_v1  ;;  %4572 = vmatpush3.bf16.msra.mxu0 %v5115_v9  ;;  %v685_v9 = vld [vmem:[#allocation14] sm:$0x3]  ;;  %s5714_s26 = smov 112   ;;  %s5715_s2 = smov 32  }
  0xa4   : > { %4573 = vmatprep.subr.bf16.mxu0 %v5116_v11  ;;  %s5716_s20 = smov 108   ;;  %s4293_s12 = sld [smem:[#allocation15 + $0x2]] }
  0xa5   : > { %s5717_s23 = smov 104   ;;  %p7414_p2 = scmp.ne.s32.totalorder %s7393_s25, 0 }
  0xa6   : > { %4588 = vmatmul.mubr.msk.bf16.vlgmr.msra.gmra.mxu1 %vm507_vm0, %v6001_v10 }
  0xa7   : > { %4591 = vmatprep.mubr.msk.bf16.mxu1 %vm507_vm0, %v6006_v12  ;;  %4574 = vmatpush3.bf16.msra.mxu0 %v5116_v11 }
  0xa8   : > { %729 = vmatprep.subr.bf16.mxu0 %v5119_v59 }
  0xaa   : > { %4576 = vmatmul.mubr.msk.bf16.vlgmr.msra.gmra.mxu0 %vm507_vm0, %v6001_v10 }
  0xab   : > { %4579 = vmatprep.mubr.msk.bf16.mxu0 %vm507_vm0, %v6006_v12  ;;  %730 = vmatpush1.bf16.msra.mxu0 %v5117_v58 }
  0xac   : > { %731 = vmatprep.subr.bf16.mxu0 %v5122_v62 }
  0xae   : > { %4592 = vmatmul.mubr.msk.bf16.gmra.mxu1 %vm507_vm0, %v6014_v15 }
  0xaf   : > { %732 = vmatpush1.bf16.msra.mxu0 %v5120_v63 }
  0xb2   : > { %4580 = vmatmul.mubr.msk.bf16.gmra.mxu0 %vm507_vm0, %v6014_v15 }
  0xb3   : > { %749 = vmatprep.mubr.bf16.mxu0 %v5709_v0 }
  0xba   : > { %4252 = vmatmul.mubr.msk.bf16.vlgmr.msra.gmra.mxu0 %vm507_vm0, %v5988_v4  ;;  %v687_v4 = vlaneseq }
  0xbb   : > { %759 = vmatprep.mubr.bf16.mxu0 %v5709_v0 }
  0xbc   : > { %v688_v6 = vshrl.u32 %v687_v4, 7 }
  0xbe   : > { %v693_v8 = vsub.s32 1, %v688_v6 }
  0xc2   : > { %4253 = vmatmul.mubr.msk.bf16.gmra.mxu0 %vm507_vm0, %v6001_v10  ;;  %v6091_v10 = vrot.slane %v685_v9, %v693_v8 }
  0xc3   : > { %769 = vmatprep.mubr.bf16.mxu0 %v5709_v0 }
  0xca   : > { %4254 = vmatmul.mubr.msk.bf16.gmra.mxu0 %vm507_vm0, %v6006_v12 }
  0xcb   : > { %779 = vmatprep.mubr.bf16.mxu0 %v5709_v0 }
  0xd2   : > { %4255 = vmatmul.mubr.msk.bf16.gmra.mxu0 %vm507_vm0, %v6014_v15 }
 0x166   : > { %v4589_v16 = vpop.f32.mrf.mxu1 }
 0x167   : > { %v655_v20 = vadd.f32 %v4589_v16, %v4241_v17 }
 0x168   : > { %v646_v18 = vpop.f32.mrf.mxu1 }
 0x169   : > { %v647_v29 = vadd.f32 %v4241_v17, %v646_v18 }
 0x16a   : > { %v4590_v19 = vpop.f32.mrf.mxu1  ;;  %v4577_v22 = vpop.f32.mrf.mxu0 }
 0x16b   : > { %v658_v21 = vadd.f32 %v4590_v19, %v4241_v17  ;;  %v563_v32 = vadd.f32 %v4577_v22, %v4234_v26 }
 0x16c   : > { %v649_v23 = vpop.f32.mrf.mxu1  ;;  %v554_v27 = vpop.f32.mrf.mxu0 }
 0x16d   : > { %v6024_v24 = vpack.c.bf16 %v658_v21, %v655_v20  ;;  %v650_v25 = vadd.f32 %v4241_v17, %v649_v23  ;;  %v555_v33 = vadd.f32 %v4234_v26, %v554_v27 }
 0x16e   : > { %v4593_v28 = vpop.f32.mrf.mxu1  ;;  %v4578_v30 = vpop.f32.mrf.mxu0 }
 0x16f   : > { %1102 = vrot.lane.b32.xlu1 %v6024_v24, %s5708_s29  ;;  %v566_v34 = vadd.f32 %v4578_v30, %v4234_v26  ;;  %v6028_v35 = vpack.c.bf16 %v650_v25, %v647_v29  ;;  %v671_v39 = vadd.f32 %v4593_v28, %v4241_v17  ;;  %v815_v1 = vsel %vm798_vm1, %v6024_v24, 0 }
 0x170   : > { %v662_v31 = vpop.f32.mrf.mxu1  ;;  %v557_v36 = vpop.f32.mrf.mxu0 }
 0x171   : > { %v558_v38 = vadd.f32 %v4234_v26, %v557_v36  ;;  %v6032_v43 = vpack.c.bf16 %v566_v34, %v563_v32  ;;  %v663_v45 = vadd.f32 %v4241_v17, %v662_v31  ;;  %v812_v2 = vsel %vm798_vm1, %v6028_v35, 0 }
 0x172   : > { %v4594_v37 = vpop.f32.mrf.mxu1  ;;  %v4581_v41 = vpop.f32.mrf.mxu0 }
 0x173   : > { %v674_v40 = vadd.f32 %v4594_v37, %v4241_v17  ;;  %1100 = vrot.lane.b32.xlu1 %v6028_v35, %s5708_s29  ;;  %v6034_v44 = vpack.c.bf16 %v558_v38, %v555_v33  ;;  %v579_v49 = vadd.f32 %v4581_v41, %v4234_v26 }
 0x174   : > { %v665_v42 = vpop.f32.mrf.mxu1  ;;  %v570_v48 = vpop.f32.mrf.mxu0 }
 0x175   : > { %v6036_v46 = vpack.c.bf16 %v674_v40, %v671_v39  ;;  %v666_v47 = vadd.f32 %v4241_v17, %v665_v42  ;;  %4603 = vmatprep.mubr.msk.bf16.mxu1 %vm798_vm1, %v6034_v44  ;;  %v571_v56 = vadd.f32 %v4234_v26, %v570_v48  ;;  %v689_v42 = vsub.s32 0, %v688_v6 }
 0x176   : > { %v4582_v52 = vpop.f32.mrf.mxu0 }
 0x177   : > { %v6040_v50 = vpack.c.bf16 %v666_v47, %v663_v45  ;;  %1106 = vrot.lane.b32.xlu0 %v6036_v46, %s5708_s29  ;;  %4947 = vmatprep.subr.msk.bf16.mxu1 %vm798_vm1, %v6036_v46  ;;  %v821_v51 = vsel %vm798_vm1, %v6036_v46, 0  ;;  %v582_v53 = vadd.f32 %v4582_v52, %v4234_v26 }
 0x178   : > { %4596 = vmatpush3.bf16.xpose.msra.mxu1 %v821_v51  ;;  %1090 = vrot.lane.b32.xlu1 %v6032_v43, %s5708_s29  ;;  %v573_v54 = vpop.f32.mrf.mxu0 }
 0x179   : > { %4948 = vmatprep.subr.msk.bf16.mxu1 %vm798_vm1, %v6040_v50  ;;  %v6052_v55 = vpack.c.bf16 %v582_v53, %v579_v49  ;;  %v574_v57 = vadd.f32 %v4234_v26, %v573_v54  ;;  %v818_v60 = vsel %vm798_vm1, %v6040_v50, 0  ;;  %v690_v54 = vrot.slane %v685_v9, %v689_v42 }
 0x17a   : > { %v751_v20 = vpop.f32.mrf.mxu0 }
 0x17b   : > { %1104 = vrot.lane.b32.xlu0 %v6040_v50, %s5708_s29  ;;  %v6062_v61 = vpack.c.bf16 %v574_v57, %v571_v56 }
 0x17c   : > { %1094 = vrot.lane.b32.xlu1 %v6052_v55, %s5708_s29  ;;  %v753_v21 = vpop.f32.mrf.mxu0 }
 0x17d   : > { %v754_v23 = vadd.f32 %v753_v21, %v6091_v10 }
 0x17e   : > { %v755_v22 = vpop.f32.mrf.mxu0 }
 0x17f   : > { %1088 = vrot.lane.b32.xlu0 %v6034_v44, %s5708_s29 }
 0x180   : > { %4598 = vmatpush3.bf16.xpose.msra.mxu1 %v818_v60  ;;  %v757_v25 = vpop.f32.mrf.mxu0 }
 0x181   : > { %4949 = vmatprep.subr.msk.bf16.mxu1 %vm798_vm1, %v6024_v24  ;;  %v758_v26 = vadd.f32 %v757_v25, %v6091_v10 }
 0x182   : > { %v761_v27 = vpop.f32.mrf.mxu0 }
 0x183   : > { %1092 = vrot.lane.b32.xlu0 %v6062_v61, %s5708_s29  ;;  %v6104_v28 = vpack.c.bf16 %v758_v26, %v754_v23  ;;  %v762_v9 = vadd.f32 %v761_v27, %v690_v54  ;;  %s4308_s29 = sld [smem:[#allocation15 + $0x3]] }
 0x184   : > { %v763_v29 = vpop.f32.mrf.mxu0 }
 0x185   : > { %7408 = vst [vmem:[#allocation23_spill] sm:$0xff] %v6104_v28  ;;  %v764_v31 = vadd.f32 %v763_v29, %v6091_v10 }
 0x186   : > { %v765_v30 = vpop.f32.mrf.mxu0 }
 0x188   : > { %4600 = vmatpush3.bf16.xpose.msra.mxu1 %v815_v1  ;;  %v767_v32 = vpop.f32.mrf.mxu0 }
 0x189   : > { %4950 = vmatprep.subr.msk.bf16.mxu1 %vm798_vm1, %v6028_v35  ;;  %v768_v34 = vadd.f32 %v767_v32, %v6091_v10 }
 0x18a   : > { %v771_v37 = vpop.f32.mrf.mxu0 }
 0x18b   : > { %v6114_v39 = vpack.c.bf16 %v768_v34, %v764_v31 }
 0x18c   : > { %v773_v40 = vpop.f32.mrf.mxu0 }
 0x18d   : > { %7409 = vst [vmem:[#allocation24_spill] sm:$0xff] %v6114_v39  ;;  %v774_v49 = vadd.f32 %v773_v40, %v6091_v10 }
 0x18e   : > { %v775_v47 = vpop.f32.mrf.mxu0 }
 0x18f   : > { %v776_v6 = vadd.f32 %v775_v47, %v690_v54 }
 0x190   : > { %4602 = vmatpush3.bf16.xpose.msra.mxu1 %v812_v2  ;;  %v777_v52 = vpop.f32.mrf.mxu0 }
 0x191   : > { %v778_v56 = vadd.f32 %v777_v52, %v6091_v10 }
 0x192   : > { %v781_v58 = vpop.f32.mrf.mxu0 }
 0x193   : > { %v6132_v60 = vpack.c.bf16 %v778_v56, %v774_v49  ;;  %v782_v1 = vadd.f32 %v781_v58, %v690_v54 }
 0x194   : > { %v6136_v63 = vpop.f32.mrf.mxu0 }
 0x195   : > { %7410 = vst [vmem:[#allocation25_spill] sm:$0xff] %v6132_v60 }
 0x197   : > { %4604 = vmatmul.mubr.msk.bf16.vlgmr.msra.gmra.mxu1 %vm798_vm1, %v6032_v43 }
 0x198   : > { %4607 = vmatprep.mubr.msk.bf16.mxu1 %vm798_vm1, %v6062_v61 }
 0x19f   : > { %4608 = vmatmul.mubr.msk.bf16.gmra.mxu1 %vm798_vm1, %v6052_v55 }
 0x1e1   : > { %v1103_v13 = vpop.permute.xlu1 %1102 }
 0x1e2   : > { %v1124_v14 = vsel %vm798_vm1, %v1103_v13, 0 }
 0x1e5   : > { %v1101_v15 = vpop.permute.xlu1 %1100 }
 0x1e6   : > { %v1121_v16 = vsel %vm798_vm1, %v1101_v15, 0 }
 0x1e9   : > { %v1107_v3 = vpop.permute.xlu0 %1106 }
 0x1ea   : > { %4951 = vmatprep.subr.msk.bf16.mxu1 %vm798_vm1, %v1107_v3  ;;  %v1130_v5 = vsel %vm798_vm1, %v1107_v3, 0  ;;  %v1091_v18 = vpop.permute.xlu1 %1090  ;;  %v785_v3 = vpop.f32.mrf.mxu0 }
 0x1eb   : > { %4628 = vmatpush3.bf16.xpose.msra.mxu1 %v1130_v5  ;;  %v772_v5 = vadd.f32 %v771_v37, %v690_v54 }
 0x1ed   : > { %v1105_v7 = vpop.permute.xlu0 %1104 }
 0x1ee   : > { %4952 = vmatprep.subr.msk.bf16.mxu1 %vm798_vm1, %v1105_v7  ;;  %v1127_v12 = vsel %vm798_vm1, %v1105_v7, 0  ;;  %v1095_v19 = vpop.permute.xlu1 %1094  ;;  %v786_v7 = vadd.f32 %v785_v3, %v690_v54 }
 0x1f1   : > { %v1089_v11 = vpop.permute.xlu0 %1088 }
 0x1f2   : > { %4635 = vmatprep.mubr.msk.bf16.mxu1 %vm798_vm1, %v1089_v11  ;;  %v766_v11 = vadd.f32 %v765_v30, %v690_v54 }
 0x1f3   : > { %4630 = vmatpush3.bf16.xpose.msra.mxu1 %v1127_v12  ;;  %v6146_v12 = vpack.c.bf16 %v786_v7, %v782_v1 }
 0x1f4   : > { %4953 = vmatprep.subr.msk.bf16.mxu1 %vm798_vm1, %v1103_v13 }
 0x1f5   : > { %v1093_v17 = vpop.permute.xlu0 %1092  ;;  %4611 = vmatprep.subr.bf16.mxu0 %v6146_v12 }
 0x1f6   : > { %4612 = vmatpush3.bf16.msra.mxu0 %v6146_v12 }
 0x1fb   : > { %4632 = vmatpush3.bf16.xpose.msra.mxu1 %v1124_v14  ;;  %v6150_v14 = vpack.c.bf16 %v776_v6, %v772_v5 }
 0x1fc   : > { %4954 = vmatprep.subr.msk.bf16.mxu1 %vm798_vm1, %v1101_v15  ;;  %v752_v15 = vadd.f32 %v751_v20, %v690_v54 }
 0x1fd   : > { %4613 = vmatprep.subr.bf16.mxu0 %v6150_v14 }
 0x1fe   : > { %4614 = vmatpush3.bf16.msra.mxu0 %v6150_v14 }
 0x203   : > { %4634 = vmatpush3.bf16.xpose.msra.mxu1 %v1121_v16  ;;  %v756_v16 = vadd.f32 %v755_v22, %v690_v54 }
 0x20a   : > { %4636 = vmatmul.mubr.msk.bf16.vlgmr.msra.gmra.mxu1 %vm798_vm1, %v1091_v18  ;;  %v6158_v18 = vpack.c.bf16 %v756_v16, %v752_v15 }
 0x20b   : > { %4639 = vmatprep.mubr.msk.bf16.mxu1 %vm798_vm1, %v1093_v17  ;;  %v6154_v17 = vpack.c.bf16 %v766_v11, %v762_v9 }
 0x20d   : > { %4615 = vmatprep.subr.bf16.mxu0 %v6154_v17 }
 0x20e   : > { %4616 = vmatpush3.bf16.msra.mxu0 %v6154_v17 }
 0x20f   : > { %4617 = vmatprep.subr.bf16.mxu0 %v6158_v18 }
 0x212   : > { %4640 = vmatmul.mubr.msk.bf16.gmra.mxu1 %vm798_vm1, %v1095_v19  ;;  %4618 = vmatpush3.bf16.msra.mxu0 %v6158_v18 }
 0x257   : > { %v6107_v33 = vpop.f32.mrf.mxu1 }
 0x258   : > { %v895_v36 = vsel %vm888_vm2, %v6107_v33, -inf }
 0x259   : > { %896 = vmax.xlane.f32.xlu0 %v895_v36  ;;  %v6112_v38 = vpop.f32.mrf.mxu1 }
 0x25a   : > { %v889_v45 = vsel %vm888_vm2, %v6112_v38, -inf }
 0x25b   : > { %v6116_v41 = vpop.f32.mrf.mxu1 }
 0x25c   : > { %v898_v57 = vsel %vm888_vm2, %v6116_v41, -inf }
 0x25d   : > { %890 = vmax.xlane.f32.xlu0 %v889_v45  ;;  %v6120_v48 = vpop.f32.mrf.mxu1 }
 0x25e   : > { %v892_v51 = vsel %vm888_vm2, %v6120_v48, -inf }
 0x25f   : > { %893 = vmax.xlane.f32.xlu1 %v892_v51  ;;  %v6125_v53 = vpop.f32.mrf.mxu1 }
 0x260   : > { %v907_v62 = vsel %vm888_vm2, %v6125_v53, -inf }
 0x261   : > { %899 = vmax.xlane.f32.xlu0 %v898_v57  ;;  %v6130_v59 = vpop.f32.mrf.mxu1 }
 0x262   : > { %v901_v8 = vsel %vm888_vm2, %v6130_v59, -inf }
 0x263   : > { %908 = vmax.xlane.f32.xlu1 %v907_v62  ;;  %v6138_v0 = vpop.f32.mrf.mxu1 }
 0x264   : > { %v910_v2 = vsel %vm888_vm2, %v6138_v0, -inf }
 0x265   : > { %911 = vmax.xlane.f32.xlu0 %v910_v2  ;;  %v6142_v4 = vpop.f32.mrf.mxu1 }
 0x266   : > { %v904_v13 = vsel %vm888_vm2, %v6142_v4, -inf }
 0x267   : > { %902 = vmax.xlane.f32.xlu1 %v901_v8 }
 0x269   : > { %905 = vmax.xlane.f32.xlu0 %v904_v13 }
 0x2ca   : > { %v6164_v19 = vpop.f32.mrf.mxu1 }
 0x2cb   : > { %v1203_v20 = vsel %vm888_vm2, %v6164_v19, -inf }
 0x2cc   : > { %1204 = vmax.xlane.f32.xlu1 %v1203_v20  ;;  %v6168_v21 = vpop.f32.mrf.mxu1 }
 0x2cd   : > { %v1197_v23 = vsel %vm888_vm2, %v6168_v21, -inf }
 0x2ce   : > { %v6170_v22 = vpop.f32.mrf.mxu1 }
 0x2cf   : > { %v1206_v25 = vsel %vm888_vm2, %v6170_v22, -inf }
 0x2d0   : > { %1198 = vmax.xlane.f32.xlu1 %v1197_v23  ;;  %v6176_v26 = vpop.f32.mrf.mxu1  ;;  %1207 = vmax.xlane.f32.xlu0 %v1206_v25 }
 0x2d1   : > { %v1200_v30 = vsel %vm888_vm2, %v6176_v26, -inf }
 0x2d2   : > { %v6178_v27 = vpop.f32.mrf.mxu1 }
 0x2d3   : > { %v1215_v29 = vsel %vm888_vm2, %v6178_v27, -inf }
 0x2d4   : > { %1216 = vmax.xlane.f32.xlu1 %v1215_v29  ;;  %v6184_v31 = vpop.f32.mrf.mxu1  ;;  %1201 = vmax.xlane.f32.xlu0 %v1200_v30 }
 0x2d5   : > { %v1209_v34 = vsel %vm888_vm2, %v6184_v31, -inf }
 0x2d6   : > { %v6186_v32 = vpop.f32.mrf.mxu1 }
 0x2d7   : > { %v1218_v36 = vsel %vm888_vm2, %v6186_v32, -inf }
 0x2d8   : > { %1210 = vmax.xlane.f32.xlu1 %v1209_v34  ;;  %v6192_v37 = vpop.f32.mrf.mxu1  ;;  %1219 = vmax.xlane.f32.xlu0 %v1218_v36 }
 0x2d9   : > { %v1212_v40 = vsel %vm888_vm2, %v6192_v37, -inf }
 0x2dc   : > { %1213 = vmax.xlane.f32.xlu0 %v1212_v40 }
 0x2e2   : > { %v897_v42 = vpop.xlane.xlu0 %896 }
 0x2e3   : > { %v915_v49 = vsub.f32 %v6107_v33, %v897_v42 }
 0x2e5   : > { %v925_v56 = vmul.f32 1.442695, %v915_v49 }
 0x2e6   : > { %v891_v45 = vpop.xlane.xlu0 %890 }
 0x2e7   : > { %v913_v52 = vsub.f32 %v6112_v38, %v891_v45  ;;  %5139 = vpow2.f32 %v925_v56 }
 0x2e8   : > { %v894_v47 = vpop.xlane.xlu1 %893 }
 0x2e9   : > { %1299 = vrot.lane.b32.xlu1 %v6146_v12, %s5710_s11  ;;  %v921_v58 = vmul.f32 1.442695, %v913_v52  ;;  %v914_v62 = vsub.f32 %v6120_v48, %v894_v47 }
 0x2ea   : > { %v900_v51 = vpop.xlane.xlu0 %899 }
 0x2eb   : > { %v916_v57 = vsub.f32 %v6116_v41, %v900_v51  ;;  %5141 = vpow2.f32 %v921_v58  ;;  %v923_v6 = vmul.f32 1.442695, %v914_v62 }
 0x2ec   : > { %v909_v54 = vpop.xlane.xlu1 %908 }
 0x2ed   : > { %v927_v2 = vmul.f32 1.442695, %v916_v57  ;;  %v919_v3 = vsub.f32 %v6125_v53, %v909_v54 }
 0x2ee   : > { %v912_v1 = vpop.xlane.xlu0 %911 }
 0x2ef   : > { %v920_v33 = vsub.f32 %v6138_v0, %v912_v1  ;;  %5143 = vpow2.f32 %v927_v2  ;;  %v933_v7 = vmul.f32 1.442695, %v919_v3 }
 0x2f0   : > { %v903_v5 = vpop.xlane.xlu1 %902  ;;  %5145 = vpow2.f32 %v923_v6 }
 0x2f1   : > { %v917_v38 = vsub.f32 %v6130_v59, %v903_v5  ;;  %v935_v41 = vmul.f32 1.442695, %v920_v33  ;;  %5147 = vpow2.f32 %v933_v7 }
 0x2f2   : > { %1297 = vrot.lane.b32.xlu0 %v6150_v14, %s5710_s11  ;;  %v906_v8 = vpop.xlane.xlu0 %905 }
 0x2f3   : > { %v929_v9 = vmul.f32 1.442695, %v917_v38  ;;  %v918_v48 = vsub.f32 %v6142_v4, %v906_v8  ;;  %5149 = vpow2.f32 %v935_v41 }
 0x2f4   : > { %v6208_v53 = vpop.eup %5139 }
 0x2f5   : > { %5151 = vpow2.f32 %v929_v9  ;;  %v931_v11 = vmul.f32 1.442695, %v918_v48  ;;  %v943_v0 = vsel %vm888_vm2, %v6208_v53, 0.0 }
 0x2f7   : > { %5153 = vpow2.f32 %v931_v11 }
 0x2f8   : > { %v6210_v13 = vpop.eup %5141 }
 0x2f9   : > { %v937_v16 = vsel %vm888_vm2, %v6210_v13, 0.0 }
 0x2fc   : > { %v6214_v15 = vpop.eup %5143 }
 0x2fd   : > { %v6216_v59 = vpop.eup %5145  ;;  %v946_v4 = vsel %vm888_vm2, %v6214_v15, 0.0 }
 0x2fe   : > { %v6222_v20 = vpop.eup %5147  ;;  %v940_v29 = vsel %vm888_vm2, %v6216_v59, 0.0 }
 0x2ff   : > { %v955_v25 = vsel %vm888_vm2, %v6222_v20, 0.0 }
 0x300   : > { %v6224_v23 = vpop.eup %5149 }
 0x301   : > { %v958_v36 = vsel %vm888_vm2, %v6224_v23, 0.0 }
 0x302   : > { %v6230_v30 = vpop.eup %5151 }
 0x303   : > { %v949_v34 = vsel %vm888_vm2, %v6230_v30, 0.0 }
 0x304   : > { %v6236_v40 = vpop.eup %5153 }
 0x305   : > { %v952_v42 = vsel %vm888_vm2, %v6236_v40, 0.0 }
 0x30d   : > { %944 = vadd.xlane.f32.xlu1 %v943_v0 }
 0x311   : > { %938 = vadd.xlane.f32.xlu1 %v937_v16  ;;  %947 = vadd.xlane.f32.xlu0 %v946_v4 }
 0x315   : > { %956 = vadd.xlane.f32.xlu1 %v955_v25  ;;  %941 = vadd.xlane.f32.xlu0 %v940_v29 }
 0x319   : > { %950 = vadd.xlane.f32.xlu1 %v949_v34  ;;  %959 = vadd.xlane.f32.xlu0 %v958_v36 }
 0x31d   : > { %953 = vadd.xlane.f32.xlu0 %v952_v42 }
 0x355   : > { %v1205_v45 = vpop.xlane.xlu1 %1204 }
 0x356   : > { %v1223_v47 = vsub.f32 %v6164_v19, %v1205_v45 }
 0x358   : > { %v1233_v49 = vmul.f32 1.442695, %v1223_v47 }
 0x359   : > { %v1199_v51 = vpop.xlane.xlu1 %1198  ;;  %v1208_v52 = vpop.xlane.xlu0 %1207 }
 0x35a   : > { %5155 = vpow2.f32 %v1233_v49  ;;  %v1221_v54 = vsub.f32 %v6168_v21, %v1199_v51  ;;  %v1224_v56 = vsub.f32 %v6170_v22, %v1208_v52 }
 0x35c   : > { %v1229_v57 = vmul.f32 1.442695, %v1221_v54  ;;  %v1235_v58 = vmul.f32 1.442695, %v1224_v56 }
 0x35d   : > { %v1217_v62 = vpop.xlane.xlu1 %1216  ;;  %v1202_v1 = vpop.xlane.xlu0 %1201 }
 0x35e   : > { %5157 = vpow2.f32 %v1229_v57  ;;  %v1227_v2 = vsub.f32 %v6178_v27, %v1217_v62  ;;  %v1222_v3 = vsub.f32 %v6176_v26, %v1202_v1 }
 0x35f   : > { %5159 = vpow2.f32 %v1235_v58 }
 0x360   : > { %v1231_v5 = vmul.f32 1.442695, %v1222_v3  ;;  %v1241_v19 = vmul.f32 1.442695, %v1227_v2 }
 0x361   : > { %v1211_v6 = vpop.xlane.xlu1 %1210  ;;  %v1220_v33 = vpop.xlane.xlu0 %1219 }
 0x362   : > { %v1225_v7 = vsub.f32 %v6184_v31, %v1211_v6  ;;  %v1228_v21 = vsub.f32 %v6186_v32, %v1220_v33  ;;  %5161 = vpow2.f32 %v1231_v5 }
 0x363   : > { %5163 = vpow2.f32 %v1241_v19 }
 0x364   : > { %v1237_v22 = vmul.f32 1.442695, %v1225_v7  ;;  %v1243_v38 = vmul.f32 1.442695, %v1228_v21 }
 0x365   : > { %v1214_v8 = vpop.xlane.xlu0 %1213  ;;  %v6247_v41 = vpop.permute.xlu1 %1299 }
 0x366   : > { %5165 = vpow2.f32 %v1237_v22  ;;  %v1226_v27 = vsub.f32 %v6192_v37, %v1214_v8  ;;  %4643 = vmatprep.subr.bf16.mxu0 %v6247_v41 }
 0x367   : > { %v6251_v26 = vpop.eup %5155  ;;  %5167 = vpow2.f32 %v1243_v38 }
 0x368   : > { %v1251_v9 = vsel %vm888_vm2, %v6251_v26, 0.0  ;;  %v1239_v31 = vmul.f32 1.442695, %v1226_v27 }
 0x369   : > { %1252 = vadd.xlane.f32.xlu1 %v1251_v9  ;;  %v1298_v49 = vpop.permute.xlu0 %1297 }
 0x36a   : > { %5169 = vpow2.f32 %v1239_v31 }
 0x36b   : > { %v6255_v32 = vpop.eup %5157 }
 0x36c   : > { %v6257_v48 = vpop.eup %5159  ;;  %v1245_v11 = vsel %vm888_vm2, %v6255_v32, 0.0 }
 0x36d   : > { %1246 = vadd.xlane.f32.xlu1 %v1245_v11  ;;  %v1254_v37 = vsel %vm888_vm2, %v6257_v48, 0.0 }
 0x36e   : > { %1255 = vadd.xlane.f32.xlu0 %v1254_v37 }
 0x36f   : > { %v6263_v0 = vpop.eup %5161 }
 0x370   : > { %v1248_v16 = vsel %vm888_vm2, %v6263_v0, 0.0  ;;  %v6267_v4 = vpop.eup %5163 }
 0x371   : > { %v1263_v34 = vsel %vm888_vm2, %v6267_v4, 0.0 }
 0x372   : > { %1249 = vadd.xlane.f32.xlu0 %v1248_v16 }
 0x373   : > { %v6269_v25 = vpop.eup %5165 }
 0x374   : > { %v1257_v29 = vsel %vm888_vm2, %v6269_v25, 0.0  ;;  %v6275_v36 = vpop.eup %5167 }
 0x375   : > { %1258 = vadd.xlane.f32.xlu1 %v1257_v29  ;;  %v1266_v42 = vsel %vm888_vm2, %v6275_v36, 0.0 }
 0x376   : > { %1264 = vadd.xlane.f32.xlu0 %v1263_v34 }
 0x377   : > { %v6279_v45 = vpop.eup %5169 }
 0x378   : > { %v1260_v47 = vsel %vm888_vm2, %v6279_v45, 0.0 }
 0x37a   : > { %1267 = vadd.xlane.f32.xlu0 %v1266_v42 }
 0x37e   : > { %1261 = vadd.xlane.f32.xlu0 %v1260_v47 }
 0x386   : > { %1295 = vrot.lane.b32.xlu1 %v6154_v17, %s5710_s11 }
 0x38a   : > { %1600 = vrot.lane.b32.xlu1 %v6036_v46, %s5711_s28 }
 0x38e   : > { %1598 = vrot.lane.b32.xlu1 %v6040_v50, %s5711_s28 }
 0x392   : > { %1596 = vrot.lane.b32.xlu1 %v6024_v24, %s5711_s28 }
 0x394   : > { %1293 = vrot.lane.b32.xlu0 %v6158_v18, %s5710_s11 }
 0x396   : > { %1594 = vrot.lane.b32.xlu1 %v6028_v35, %s5711_s28  ;;  %v945_v51 = vpop.xlane.xlu1 %944 }
 0x398   : > { %1586 = vrot.lane.b32.xlu0 %v6034_v44, %s5711_s28 }
 0x39a   : > { %1588 = vrot.lane.b32.xlu1 %v6032_v43, %s5711_s28  ;;  %v939_v52 = vpop.xlane.xlu1 %938  ;;  %v948_v54 = vpop.xlane.xlu0 %947 }
 0x39b   : > { %5171 = vrcp.f32 %v948_v54 }
 0x39c   : > { %1590 = vrot.lane.b32.xlu0 %v6062_v61, %s5711_s28  ;;  %5173 = vrcp.f32 %v939_v52 }
 0x39d   : > { %5175 = vrcp.f32 %v945_v51 }
 0x39e   : > { %1592 = vrot.lane.b32.xlu1 %v6052_v55, %s5711_s28  ;;  %v957_v56 = vpop.xlane.xlu1 %956  ;;  %v942_v57 = vpop.xlane.xlu0 %941  ;;  %s5718_s28 = smov 100  }
 0x39f   : > { %5177 = vrcp.f32 %v942_v57 }
 0x3a0   : > { %2009 = vrot.lane.b32.xlu0 %v6036_v46, %s5712_s17 }
 0x3a2   : > { %2007 = vrot.lane.b32.xlu1 %v6040_v50, %s5712_s17  ;;  %v951_v58 = vpop.xlane.xlu1 %950  ;;  %v960_v62 = vpop.xlane.xlu0 %959 }
 0x3a3   : > { %5179 = vrcp.f32 %v951_v58 }
 0x3a4   : > { %2005 = vrot.lane.b32.xlu0 %v6024_v24, %s5712_s17  ;;  %5181 = vrcp.f32 %v960_v62 }
 0x3a5   : > { %5183 = vrcp.f32 %v957_v56 }
 0x3a6   : > { %2003 = vrot.lane.b32.xlu1 %v6028_v35, %s5712_s17  ;;  %v954_v1 = vpop.xlane.xlu0 %953 }
 0x3a7   : > { %5185 = vrcp.f32 %v954_v1  ;;  %v5123_v1 = vld [vmem:[#allocation9 + $0x18] sm:$0xff]  }
 0x3a8   : > { %1995 = vrot.lane.b32.xlu0 %v6034_v44, %s5712_s17  ;;  %v5172_v2 = vpop.eup %5171 }
 0x3a9   : > { %v5174_v3 = vpop.eup %5173  ;;  %v968_v6 = vmul.f32 %v5172_v2, %v6214_v15 }
 0x3aa   : > { %1997 = vrot.lane.b32.xlu1 %v6032_v43, %s5712_s17  ;;  %v5176_v5 = vpop.eup %5175  ;;  %v962_v33 = vmul.f32 %v5174_v3, %v6210_v13 }
 0x3ab   : > { %v966_v21 = vmul.f32 %v5176_v5, %v6208_v53 }
 0x3ac   : > { %1999 = vrot.lane.b32.xlu0 %v6062_v61, %s5712_s17  ;;  %v5178_v19 = vpop.eup %5177 }
 0x3ad   : > { %v964_v7 = vmul.f32 %v5178_v19, %v6216_v59  ;;  %v978_v8 = vpack.c.bf16 %v968_v6, %v966_v21  ;;  %v5124_v6 = vld [vmem:[#allocation9 + $0x10] sm:$0xff]  }
 0x3ae   : > { %2001 = vrot.lane.b32.xlu1 %v6052_v55, %s5712_s17  ;;  %s4323_s17 = sld [smem:[#allocation15 + $0x4]] }
 0x3af   : > { %v977_v22 = vpack.c.bf16 %v964_v7, %v962_v33 }
 0x3b0   : > { %v5180_v38 = vpop.eup %5179 }
 0x3b1   : > { %v5182_v27 = vpop.eup %5181  ;;  %4619 = vmatprep.mubr.msk.bf16.mxu0 %vm888_vm2, %v977_v22  ;;  %v970_v15 = vmul.f32 %v5180_v38, %v6230_v30 }
 0x3b2   : > { %v5184_v9 = vpop.eup %5183  ;;  %4620 = vmatmul.mubr.msk.bf16.vlgmr.msra.gmra.mxu0 %vm888_vm2, %v978_v8  ;;  %v976_v59 = vmul.f32 %v5182_v27, %v6224_v23  ;;  %v5126_v23 = vld [vmem:[#allocation9] sm:$0xff]  }
 0x3b3   : > { %4644 = vmatpush3.bf16.msra.mxu0 %v6247_v41  ;;  %v974_v11 = vmul.f32 %v5184_v9, %v6222_v20  ;;  %v5125_v41 = vld [vmem:[#allocation9 + $0x8] sm:$0xff]  }
 0x3b4   : > { %v5186_v31 = vpop.eup %5185  ;;  %4645 = vmatprep.subr.bf16.mxu0 %v1298_v49  ;;  %4671 = vmatprep.subr.bf16.mxu1 %v5125_v41 }
 0x3b5   : > { %v972_v13 = vmul.f32 %v5186_v31, %v6236_v40  ;;  %v980_v37 = vpack.c.bf16 %v976_v59, %v974_v11  ;;  %4672 = vmatpush3.bf16.msra.mxu1 %v5125_v41  ;;  %v6335_v11 = vld [vmem:[%s5964_s30 + $0x18] sm:$0xff]  ;;  %v6343_v41 = vld [vmem:[%s5964_s30 + $0x8] sm:$0xff] }
 0x3b6   : > { %4673 = vmatprep.subr.bf16.mxu1 %v5126_v23 }
 0x3b7   : > { %v979_v53 = vpack.c.bf16 %v972_v13, %v970_v15  ;;  %4646 = vmatpush3.bf16.msra.mxu0 %v1298_v49 }
 0x3b9   : > { %4623 = vmatprep.mubr.msk.bf16.mxu0 %vm888_vm2, %v979_v53  ;;  %4674 = vmatpush3.bf16.msra.mxu1 %v5126_v23  ;;  %v6347_v23 = vld [vmem:[%s5964_s30 + $0x10] sm:$0xff] }
 0x3ba   : > { %4624 = vmatmul.mubr.msk.bf16.gmra.mxu0 %vm888_vm2, %v980_v37 }
 0x3f2   : > { %v1253_v16 = vpop.xlane.xlu1 %1252 }
 0x3f6   : > { %v1247_v29 = vpop.xlane.xlu1 %1246 }
 0x3f7   : > { %v1256_v34 = vpop.xlane.xlu0 %1255  ;;  %5187 = vrcp.f32 %v1247_v29  ;;  %v6339_v29 = vld [vmem:[%s5964_s30] sm:$0xff] }
 0x3f8   : > { %5189 = vrcp.f32 %v1256_v34 }
 0x3f9   : > { %5191 = vrcp.f32 %v1253_v16 }
 0x3fb   : > { %v1250_v30 = vpop.xlane.xlu0 %1249 }
 0x3fc   : > { %5193 = vrcp.f32 %v1250_v30 }
 0x3fe   : > { %v1259_v40 = vpop.xlane.xlu1 %1258 }
 0x3ff   : > { %v1265_v20 = vpop.xlane.xlu0 %1264 }
 0x402   : > { %v1296_v42 = vpop.permute.xlu1 %1295 }
 0x403   : > { %v1268_v47 = vpop.xlane.xlu0 %1267  ;;  %4647 = vmatprep.subr.bf16.mxu0 %v1296_v42 }
 0x404   : > { %4648 = vmatpush3.bf16.msra.mxu0 %v1296_v42  ;;  %5195 = vrcp.f32 %v1268_v47  ;;  %v5188_v49 = vpop.eup %5187 }
 0x405   : > { %5197 = vrcp.f32 %v1259_v40  ;;  %v5190_v51 = vpop.eup %5189  ;;  %v1270_v58 = vmul.f32 %v5188_v49, %v6255_v32 }
 0x406   : > { %5199 = vrcp.f32 %v1265_v20  ;;  %v5192_v54 = vpop.eup %5191  ;;  %v1276_v57 = vmul.f32 %v5190_v51, %v6257_v48  ;;  %v6322_v7 = vpop.permute.xlu1 %1600 }
 0x407   : > { %v1262_v52 = vpop.xlane.xlu0 %1261  ;;  %v1274_v3 = vmul.f32 %v5192_v54, %v6251_v26 }
 0x408   : > { %5201 = vrcp.f32 %v1262_v52 }
 0x409   : > { %v5194_v56 = vpop.eup %5193  ;;  %v1286_v19 = vpack.c.bf16 %v1276_v57, %v1274_v3  ;;  %v6361_v3 = vld [vmem:[%s5964_s30 + $0x28] sm:$0xff] }
 0x40a   : > { %v1272_v62 = vmul.f32 %v5194_v56, %v6263_v0 }
 0x40b   : > { %v1294_v2 = vpop.permute.xlu0 %1293 }
 0x40c   : > { %4649 = vmatprep.subr.bf16.mxu0 %v1294_v2  ;;  %v1285_v5 = vpack.c.bf16 %v1272_v62, %v1270_v58  ;;  %v6353_v58 = vld [vmem:[%s5964_s30 + $0x38] sm:$0xff] }
 0x40d   : > { %4650 = vmatpush3.bf16.msra.mxu0 %v1294_v2 }
 0x40e   : > { %4651 = vmatprep.mubr.msk.bf16.mxu0 %vm888_vm2, %v1285_v5  ;;  %4659 = vmatprep.subr.bf16.mxu0 %v5123_v1 }
 0x410   : > { %4652 = vmatmul.mubr.msk.bf16.vlgmr.msra.gmra.mxu0 %vm888_vm2, %v1286_v19  ;;  %v6365_v19 = vld [vmem:[%s5964_s30 + $0x30] sm:$0xff] }
 0x411   : > { %4660 = vmatpush3.bf16.msra.mxu0 %v5123_v1  ;;  %v5196_v48 = vpop.eup %5195  ;;  %v6357_v1 = vld [vmem:[%s5964_s30 + $0x20] sm:$0xff] }
 0x412   : > { %4661 = vmatprep.subr.bf16.mxu0 %v5124_v6  ;;  %v5198_v32 = vpop.eup %5197  ;;  %v1284_v26 = vmul.f32 %v5196_v48, %v6275_v36  ;;  %v6332_v36 = vpop.f32.mrf.mxu0 }
 0x413   : > { %v5200_v33 = vpop.eup %5199  ;;  %v1278_v21 = vmul.f32 %v5198_v32, %v6269_v25  ;;  %v1059_v25 = vstv %s1058_s18  ;;  %s4353_s18 = sld [smem:[#allocation15 + $0x6]] }
 0x414   : > { %v1282_v38 = vmul.f32 %v5200_v33, %v6267_v4 }
 0x415   : > { %v5202_v0 = vpop.eup %5201  ;;  %4662 = vmatpush3.bf16.msra.mxu0 %v5124_v6 }
 0x416   : > { %4955 = vmatprep.subr.msk.bf16.mxu0 %vm798_vm1, %v6322_v7  ;;  %v1280_v22 = vmul.f32 %v5202_v0, %v6279_v45  ;;  %v1288_v27 = vpack.c.bf16 %v1284_v26, %v1282_v38  ;;  %v1383_v26 = vstv %s4272_s3 }
 0x418   : > { %v1287_v8 = vpack.c.bf16 %v1280_v22, %v1278_v21 }
 0x41a   : > { %4655 = vmatprep.mubr.msk.bf16.mxu0 %vm888_vm2, %v1287_v8 }
 0x41b   : > { %4656 = vmatmul.mubr.msk.bf16.gmra.mxu0 %vm888_vm2, %v1288_v27 }
 0x472   : > { %v4621_v9 = vpop.f32.mrf.mxu0 }
 0x473   : > { %v1062_v4 = vmul.f32 %v4621_v9, %v1059_v25 }
 0x474   : > { %v1027_v31 = vpop.f32.mrf.mxu0 }
 0x475   : > { %v1060_v45 = vmul.f32 %v1059_v25, %v1027_v31  ;;  %v1070_v40 = vadd.f32 %v6347_v23, %v1062_v4 }
 0x476   : > { %v4622_v15 = vpop.f32.mrf.mxu0 }
 0x477   : > { %v1063_v13 = vmul.f32 %v4622_v15, %v1059_v25  ;;  %v1068_v34 = vadd.f32 %v6339_v29, %v1060_v45 }
 0x478   : > { %v1030_v59 = vpop.f32.mrf.mxu0 }
 0x479   : > { %v1061_v53 = vmul.f32 %v1059_v25, %v1030_v59  ;;  %v1071_v37 = vadd.f32 %v6335_v11, %v1063_v13 }
 0x47a   : > { %v4625_v16 = vpop.f32.mrf.mxu0 }
 0x47b   : > { %v1069_v30 = vadd.f32 %v6343_v41, %v1061_v53  ;;  %v1077_v47 = vpack.c.bf16 %v1071_v37, %v1070_v40  ;;  %v1066_v54 = vmul.f32 %v4625_v16, %v1059_v25  ;;  %v1624_v37 = vsel %vm798_vm1, %v6322_v7, 0  ;;  %v1599_v16 = vpop.permute.xlu1 %1598 }
 0x47c   : > { %v1043_v20 = vpop.f32.mrf.mxu0  ;;  %v1621_v7 = vsel %vm798_vm1, %v1599_v16, 0 }
 0x47d   : > { %v1076_v42 = vpack.c.bf16 %v1069_v30, %v1068_v34  ;;  %v1064_v51 = vmul.f32 %v1059_v25, %v1043_v20  ;;  %v1074_v6 = vadd.f32 %v6365_v19, %v1066_v54 }
 0x47e   : > { %v4626_v49 = vpop.f32.mrf.mxu0 }
 0x47f   : > { %v1067_v52 = vmul.f32 %v4626_v49, %v1059_v25  ;;  %4675 = vmatprep.mubr.msk.bf16.mxu1 %vm507_vm0, %v1076_v42  ;;  %v1072_v2 = vadd.f32 %v6357_v1, %v1064_v51 }
 0x480   : > { %v1046_v56 = vpop.f32.mrf.mxu0  ;;  %4676 = vmatmul.mubr.msk.bf16.vlgmr.msra.gmra.mxu1 %vm507_vm0, %v1077_v47 }
 0x481   : > { %v1065_v57 = vmul.f32 %v1059_v25, %v1046_v56  ;;  %v1075_v62 = vadd.f32 %v6353_v58, %v1067_v52 }
 0x483   : > { %v1073_v5 = vadd.f32 %v6361_v3, %v1065_v57  ;;  %v1079_v32 = vpack.c.bf16 %v1075_v62, %v1074_v6  ;;  %v1597_v57 = vpop.permute.xlu1 %1596 }
 0x484   : > { %v1618_v6 = vsel %vm798_vm1, %v1597_v57, 0 }
 0x485   : > { %v1078_v48 = vpack.c.bf16 %v1073_v5, %v1072_v2  ;;  %v1587_v2 = vpop.permute.xlu0 %1586 }
 0x487   : > { %4679 = vmatprep.mubr.msk.bf16.mxu1 %vm507_vm0, %v1078_v48  ;;  %v1595_v5 = vpop.permute.xlu1 %1594 }
 0x488   : > { %4680 = vmatmul.mubr.msk.bf16.gmra.mxu1 %vm507_vm0, %v1079_v32 }
 0x489   : > { %v1591_v48 = vpop.permute.xlu0 %1590 }
 0x48b   : > { %v1589_v32 = vpop.permute.xlu1 %1588 }
 0x4d0   : > { %v4653_v33 = vpop.f32.mrf.mxu0 }
 0x4d1   : > { %v1386_v8 = vmul.f32 %v4653_v33, %v1383_v26  ;;  %v1615_v33 = vsel %vm798_vm1, %v1595_v5, 0 }
 0x4d2   : > { %v1351_v0 = vpop.f32.mrf.mxu0 }
 0x4d3   : > { %v1384_v22 = vmul.f32 %v1383_v26, %v1351_v0  ;;  %v1394_v45 = vadd.f32 %v6347_v23, %v1386_v8  ;;  %v2010_v0 = vpop.permute.xlu0 %2009 }
 0x4d4   : > { %v4654_v21 = vpop.f32.mrf.mxu0 }
 0x4d5   : > { %v1387_v38 = vmul.f32 %v4654_v21, %v1383_v26  ;;  %v1392_v25 = vadd.f32 %v6339_v29, %v1384_v22  ;;  %v2033_v21 = vsel %vm798_vm1, %v2010_v0, 0 }
 0x4d6   : > { %v1354_v27 = vpop.f32.mrf.mxu0 }
 0x4d7   : > { %v1385_v9 = vmul.f32 %v1383_v26, %v1354_v27  ;;  %v1395_v31 = vadd.f32 %v6335_v11, %v1387_v38  ;;  %v2006_v38 = vpop.permute.xlu0 %2005 }
 0x4d9   : > { %v1393_v15 = vadd.f32 %v6343_v41, %v1385_v9  ;;  %v1401_v59 = vpack.c.bf16 %v1395_v31, %v1394_v45  ;;  %v2027_v9 = vsel %vm798_vm1, %v2006_v38, 0 }
 0x4db   : > { %v1400_v13 = vpack.c.bf16 %v1393_v15, %v1392_v25  ;;  %v4657_v4 = vpop.f32.mrf.mxu0  ;;  %v1996_v8 = vpop.permute.xlu0 %1995 }
 0x4dc   : > { %v1390_v20 = vmul.f32 %v4657_v4, %v1383_v26 }
 0x4dd   : > { %v1367_v53 = vpop.f32.mrf.mxu0  ;;  %4663 = vmatprep.mubr.msk.bf16.mxu0 %vm507_vm0, %v1400_v13 }
 0x4de   : > { %4664 = vmatmul.mubr.msk.bf16.vlgmr.msra.gmra.mxu0 %vm507_vm0, %v1401_v59  ;;  %v1388_v30 = vmul.f32 %v1383_v26, %v1367_v53  ;;  %v1398_v54 = vadd.f32 %v6365_v19, %v1390_v20 }
 0x4df   : > { %4684 = vmatpush3.bf16.xpose.msra.mxu0 %v1624_v37  ;;  %v4658_v34 = vpop.f32.mrf.mxu0  ;;  %v2000_v45 = vpop.permute.xlu0 %1999 }
 0x4e0   : > { %v1391_v40 = vmul.f32 %v4658_v34, %v1383_v26  ;;  %4956 = vmatprep.subr.msk.bf16.mxu0 %vm798_vm1, %v1599_v16  ;;  %v1396_v51 = vadd.f32 %v6357_v1, %v1388_v30 }
 0x4e1   : > { %v1370_v42 = vpop.f32.mrf.mxu0 }
 0x4e2   : > { %v1389_v47 = vmul.f32 %v1383_v26, %v1370_v42  ;;  %v1399_v49 = vadd.f32 %v6353_v58, %v1391_v40  ;;  %v1593_v26 = vpop.permute.xlu1 %1592 }
 0x4e4   : > { %v1397_v52 = vadd.f32 %v6361_v3, %v1389_v47  ;;  %v1403_v62 = vpack.c.bf16 %v1399_v49, %v1398_v54 }
 0x4e6   : > { %v1402_v56 = vpack.c.bf16 %v1397_v52, %v1396_v51  ;;  %v2008_v22 = vpop.permute.xlu1 %2007 }
 0x4e7   : > { %4686 = vmatpush3.bf16.xpose.msra.mxu0 %v1621_v7  ;;  %v2030_v27 = vsel %vm798_vm1, %v2008_v22, 0 }
 0x4e8   : > { %4957 = vmatprep.subr.msk.bf16.mxu0 %vm798_vm1, %v1597_v57  ;;  %4667 = vmatprep.mubr.msk.bf16.mxu0 %vm507_vm0, %v1402_v56 }
 0x4e9   : > { %4668 = vmatmul.mubr.msk.bf16.gmra.mxu0 %vm507_vm0, %v1403_v62 }
 0x4ea   : > { %4691 = vmatprep.mubr.msk.bf16.mxu0 %vm798_vm1, %v1587_v2  ;;  %v2004_v31 = vpop.permute.xlu1 %2003 }
 0x4eb   : > { %v2024_v25 = vsel %vm798_vm1, %v2004_v31, 0 }
 0x4ee   : > { %v1998_v15 = vpop.permute.xlu1 %1997 }
 0x4ef   : > { %4688 = vmatpush3.bf16.xpose.msra.mxu0 %v1618_v6 }
 0x4f0   : > { %4958 = vmatprep.subr.msk.bf16.mxu0 %vm798_vm1, %v1595_v5 }
 0x4f2   : > { %v2002_v13 = vpop.permute.xlu1 %2001 }
 0x4f7   : > { %4690 = vmatpush3.bf16.xpose.msra.mxu0 %v1615_v33 }
 0x4f8   : > { %4959 = vmatprep.subr.msk.bf16.mxu0 %vm798_vm1, %v2010_v0 }
 0x4fe   : > { %4692 = vmatmul.mubr.msk.bf16.vlgmr.msra.gmra.mxu0 %vm798_vm1, %v1589_v32 }
 0x4ff   : > { %4695 = vmatprep.mubr.msk.bf16.mxu0 %vm798_vm1, %v1591_v48  ;;  %4728 = vmatpush3.bf16.xpose.msra.mxu0 %v2033_v21 }
 0x500   : > { %4960 = vmatprep.subr.msk.bf16.mxu0 %vm798_vm1, %v2008_v22 }
 0x506   : > { %4696 = vmatmul.mubr.msk.bf16.gmra.mxu0 %vm798_vm1, %v1593_v26 }
 0x507   : > { %4730 = vmatpush3.bf16.xpose.msra.mxu0 %v2030_v27  ;;  %4735 = vmatprep.mubr.msk.bf16.mxu0 %vm798_vm1, %v1996_v8 }
 0x508   : > { %4961 = vmatprep.subr.msk.bf16.mxu0 %vm798_vm1, %v2006_v38 }
 0x50f   : > { %4732 = vmatpush3.bf16.xpose.msra.mxu0 %v2027_v9 }
 0x510   : > { %4962 = vmatprep.subr.msk.bf16.mxu0 %vm798_vm1, %v2004_v31 }
 0x517   : > { %4734 = vmatpush3.bf16.xpose.msra.mxu0 %v2024_v25 }
 0x51e   : > { %4736 = vmatmul.mubr.msk.bf16.vlgmr.msra.gmra.mxu0 %vm798_vm1, %v1998_v15 }
 0x51f   : > { %4739 = vmatprep.mubr.msk.bf16.mxu0 %vm798_vm1, %v2000_v45 }
 0x526   : > { %4740 = vmatmul.mubr.msk.bf16.gmra.mxu0 %vm798_vm1, %v2002_v13 }
 0x59e   : > { %v6406_v4 = vpop.f32.mrf.mxu0 }
 0x5a0   : > { %v6408_v59 = vpop.f32.mrf.mxu0 }
 0x5a2   : > { %v6410_v53 = vpop.f32.mrf.mxu0 }
 0x5a4   : > { %v6412_v37 = vpop.f32.mrf.mxu0 }
 0x5a9   : > { %v6414_v16 = vpop.f32.mrf.mxu0 }
 0x5ab   : > { %v6416_v34 = vpop.f32.mrf.mxu0 }
 0x5ad   : > { %v6418_v30 = vpop.f32.mrf.mxu0 }
 0x5af   : > { %v6420_v40 = vpop.f32.mrf.mxu0 }
 0x5be   : > { %v4693_v20 = vpop.f32.mrf.mxu0 }
 0x5bf   : > { %v1697_v52 = vsel %vm888_vm2, %v4693_v20, -inf }
 0x5c0   : > { %v1660_v42 = vpop.f32.mrf.mxu0 }
 0x5c1   : > { %v1691_v47 = vsel %vm888_vm2, %v1660_v42, -inf }
 0x5c2   : > { %1692 = vmax.xlane.f32.xlu0 %v1691_v47  ;;  %v4694_v49 = vpop.f32.mrf.mxu0 }
 0x5c3   : > { %v1700_v57 = vsel %vm888_vm2, %v4694_v49, -inf }
 0x5c4   : > { %v1663_v51 = vpop.f32.mrf.mxu0 }
 0x5c5   : > { %v1694_v54 = vsel %vm888_vm2, %v1663_v51, -inf }
 0x5c6   : > { %1698 = vmax.xlane.f32.xlu0 %v1697_v52  ;;  %1695 = vmax.xlane.f32.xlu1 %v1694_v54  ;;  %v4697_v56 = vpop.f32.mrf.mxu0 }
 0x5c7   : > { %v1709_v6 = vsel %vm888_vm2, %v4697_v56, -inf }
 0x5c8   : > { %v1676_v7 = vpop.f32.mrf.mxu0 }
 0x5c9   : > { %v1703_v62 = vsel %vm888_vm2, %v1676_v7, -inf }
 0x5ca   : > { %1701 = vmax.xlane.f32.xlu0 %v1700_v57  ;;  %1704 = vmax.xlane.f32.xlu1 %v1703_v62  ;;  %v4698_v2 = vpop.f32.mrf.mxu0 }
 0x5cb   : > { %v1712_v32 = vsel %vm888_vm2, %v4698_v2, -inf }
 0x5cc   : > { %v1679_v5 = vpop.f32.mrf.mxu0 }
 0x5cd   : > { %v1706_v48 = vsel %vm888_vm2, %v1679_v5, -inf }
 0x5ce   : > { %1710 = vmax.xlane.f32.xlu1 %v1709_v6  ;;  %1707 = vmax.xlane.f32.xlu0 %v1706_v48 }
 0x5d2   : > { %1713 = vmax.xlane.f32.xlu0 %v1712_v32 }
 0x5df   : > { %1789 = vrot.lane.b32.xlu1 %v6146_v12, %s5713_s24 }
 0x64b   : > { %v1693_v33 = vpop.xlane.xlu0 %1692 }
 0x64c   : > { %v1715_v0 = vsub.f32 %v1660_v42, %v1693_v33 }
 0x64e   : > { %v1723_v8 = vmul.f32 1.442695, %v1715_v0 }
 0x64f   : > { %v1696_v26 = vpop.xlane.xlu1 %1695  ;;  %v1699_v21 = vpop.xlane.xlu0 %1698 }
 0x650   : > { %v1717_v22 = vsub.f32 %v4693_v20, %v1699_v21  ;;  %v1716_v27 = vsub.f32 %v1663_v51, %v1696_v26 }
 0x652   : > { %v1727_v38 = vmul.f32 1.442695, %v1717_v22  ;;  %v1725_v45 = vmul.f32 1.442695, %v1716_v27 }
 0x653   : > { %v1705_v9 = vpop.xlane.xlu1 %1704  ;;  %v1702_v31 = vpop.xlane.xlu0 %1701 }
 0x654   : > { %v1718_v25 = vsub.f32 %v4694_v49, %v1702_v31  ;;  %5203 = vpow2.f32 %v1727_v38  ;;  %v1719_v13 = vsub.f32 %v1676_v7, %v1705_v9 }
 0x655   : > { %5205 = vpow2.f32 %v1723_v8 }
 0x656   : > { %v1729_v15 = vmul.f32 1.442695, %v1718_v25  ;;  %v1731_v42 = vmul.f32 1.442695, %v1719_v13 }
 0x657   : > { %v1711_v47 = vpop.xlane.xlu1 %1710  ;;  %v1708_v52 = vpop.xlane.xlu0 %1707 }
 0x658   : > { %v1721_v54 = vsub.f32 %v4697_v56, %v1711_v47  ;;  %5207 = vpow2.f32 %v1729_v15  ;;  %v1720_v62 = vsub.f32 %v1679_v5, %v1708_v52  ;;  %v6478_v15 = vpop.f32.mrf.mxu0 }
 0x659   : > { %5209 = vpow2.f32 %v1725_v45 }
 0x65a   : > { %v1735_v57 = vmul.f32 1.442695, %v1721_v54  ;;  %v1733_v48 = vmul.f32 1.442695, %v1720_v62  ;;  %v6480_v45 = vpop.f32.mrf.mxu0 }
 0x65b   : > { %v1790_v20 = vpop.permute.xlu1 %1789  ;;  %v1714_v6 = vpop.xlane.xlu0 %1713 }
 0x65c   : > { %5211 = vpow2.f32 %v1735_v57  ;;  %v1722_v51 = vsub.f32 %v4698_v2, %v1714_v6  ;;  %4699 = vmatprep.subr.bf16.mxu1 %v1790_v20  ;;  %v6482_v13 = vpop.f32.mrf.mxu0  ;;  %v2100_v57 = vsel %vm888_vm2, %v6480_v45, -inf }
 0x65d   : > { %4700 = vmatpush3.bf16.msra.mxu1 %v1790_v20  ;;  %5213 = vpow2.f32 %v1731_v42  ;;  %v2106_v20 = vsel %vm888_vm2, %v6478_v15, -inf }
 0x65e   : > { %v1737_v49 = vmul.f32 1.442695, %v1722_v51  ;;  %v6484_v47 = vpop.f32.mrf.mxu0 }
 0x65f   : > { %v2103_v54 = vsel %vm888_vm2, %v6484_v47, -inf }
 0x660   : > { %5215 = vpow2.f32 %v1737_v49  ;;  %v6486_v52 = vpop.f32.mrf.mxu0  ;;  %v2109_v49 = vsel %vm888_vm2, %v6482_v13, -inf }
 0x661   : > { %v6432_v32 = vpop.eup %5203  ;;  %5217 = vpow2.f32 %v1733_v48  ;;  %v2118_v51 = vsel %vm888_vm2, %v6486_v52, -inf }
 0x662   : > { %v1745_v56 = vsel %vm888_vm2, %v6432_v32, 0.0  ;;  %v6436_v7 = vpop.eup %5205  ;;  %v6492_v42 = vpop.f32.mrf.mxu0 }
 0x663   : > { %1746 = vadd.xlane.f32.xlu1 %v1745_v56  ;;  %v1739_v2 = vsel %vm888_vm2, %v6436_v7, 0.0  ;;  %v2112_v62 = vsel %vm888_vm2, %v6492_v42, -inf }
 0x664   : > { %v6498_v6 = vpop.f32.mrf.mxu0 }
 0x665   : > { %v6438_v5 = vpop.eup %5207 }
 0x666   : > { %v1748_v33 = vsel %vm888_vm2, %v6438_v5, 0.0  ;;  %v6444_v0 = vpop.eup %5209  ;;  %v6504_v48 = vpop.f32.mrf.mxu0 }
 0x667   : > { %1740 = vadd.xlane.f32.xlu1 %v1739_v2  ;;  %1749 = vadd.xlane.f32.xlu0 %v1748_v33  ;;  %v1742_v22 = vsel %vm888_vm2, %v6444_v0, 0.0  ;;  %v2115_v56 = vsel %vm888_vm2, %v6504_v48, -inf  ;;  %v2121_v2 = vsel %vm888_vm2, %v6498_v6, -inf }
 0x669   : > { %v6446_v26 = vpop.eup %5211 }
 0x66a   : > { %v1757_v21 = vsel %vm888_vm2, %v6446_v26, 0.0  ;;  %v6452_v38 = vpop.eup %5213 }
 0x66b   : > { %1758 = vadd.xlane.f32.xlu1 %v1757_v21  ;;  %1743 = vadd.xlane.f32.xlu0 %v1742_v22  ;;  %v1751_v9 = vsel %vm888_vm2, %v6452_v38, 0.0 }
 0x66d   : > { %v6454_v8 = vpop.eup %5215 }
 0x66e   : > { %v1760_v27 = vsel %vm888_vm2, %v6454_v8, 0.0  ;;  %v6460_v31 = vpop.eup %5217 }
 0x66f   : > { %1752 = vadd.xlane.f32.xlu1 %v1751_v9  ;;  %1761 = vadd.xlane.f32.xlu0 %v1760_v27  ;;  %v1754_v25 = vsel %vm888_vm2, %v6460_v31, 0.0 }
 0x673   : > { %1755 = vadd.xlane.f32.xlu0 %v1754_v25 }
 0x680   : > { %1785 = vrot.lane.b32.xlu1 %v6154_v17, %s5713_s24 }
 0x684   : > { %1783 = vrot.lane.b32.xlu1 %v6158_v18, %s5713_s24 }
 0x688   : > { %2416 = vrot.lane.b32.xlu1 %v6040_v50, %s5714_s26 }
 0x689   : > { %1787 = vrot.lane.b32.xlu0 %v6150_v14, %s5713_s24 }
 0x68c   : > { %2412 = vrot.lane.b32.xlu1 %v6028_v35, %s5714_s26 }
 0x68d   : > { %2418 = vrot.lane.b32.xlu0 %v6036_v46, %s5714_s26 }
 0x690   : > { %2406 = vrot.lane.b32.xlu1 %v6032_v43, %s5714_s26 }
 0x691   : > { %2414 = vrot.lane.b32.xlu0 %v6024_v24, %s5714_s26 }
 0x694   : > { %2410 = vrot.lane.b32.xlu1 %v6052_v55, %s5714_s26 }
 0x695   : > { %2404 = vrot.lane.b32.xlu0 %v6034_v44, %s5714_s26 }
 0x699   : > { %2408 = vrot.lane.b32.xlu0 %v6062_v61, %s5714_s26  ;;  %s470_s26 = scalar_lea.vmem [#allocation16], %s4225_s5  ;;  %s4382_s5 = sshll.u32 %s5798_s19, 10 }
 0x69a   : > { %s4056_s19 = scalar_lea.sflag [#allocation4], %s5958_s4 }
 0x6b8   : > { %2104 = vmax.xlane.f32.xlu1 %v2103_v54  ;;  %2101 = vmax.xlane.f32.xlu0 %v2100_v57 }
 0x6bc   : > { %2113 = vmax.xlane.f32.xlu1 %v2112_v62  ;;  %2107 = vmax.xlane.f32.xlu0 %v2106_v20 }
 0x6c0   : > { %2119 = vmax.xlane.f32.xlu1 %v2118_v51  ;;  %2110 = vmax.xlane.f32.xlu0 %v2109_v49 }
 0x6c4   : > { %2116 = vmax.xlane.f32.xlu0 %v2115_v56 }
 0x6c8   : > { %2122 = vmax.xlane.f32.xlu0 %v2121_v2 }
 0x6d1   : > { %2198 = vrot.lane.b32.xlu1 %v6146_v12, %s5715_s2 }
 0x6ec   : > { %v1747_v33 = vpop.xlane.xlu1 %1746 }
 0x6f0   : > { %v1741_v21 = vpop.xlane.xlu1 %1740  ;;  %v1750_v22 = vpop.xlane.xlu0 %1749 }
 0x6f1   : > { %5219 = vrcp.f32 %v1741_v21 }
 0x6f4   : > { %v1759_v27 = vpop.xlane.xlu1 %1758  ;;  %v1744_v9 = vpop.xlane.xlu0 %1743 }
 0x6f5   : > { %5221 = vrcp.f32 %v1744_v9 }
 0x6f6   : > { %5223 = vrcp.f32 %v1750_v22 }
 0x6f7   : > { %5225 = vrcp.f32 %v1747_v33 }
 0x6f8   : > { %v1753_v25 = vpop.xlane.xlu1 %1752  ;;  %v1762_v54 = vpop.xlane.xlu0 %1761 }
 0x6f9   : > { %5227 = vrcp.f32 %v1753_v25 }
 0x6fc   : > { %v1786_v57 = vpop.permute.xlu1 %1785  ;;  %v1756_v62 = vpop.xlane.xlu0 %1755 }
 0x6fd   : > { %5229 = vrcp.f32 %v1756_v62  ;;  %v5127_v62 = vld [vmem:[#allocation9 + $0x28] sm:$0xff]  }
 0x6fe   : > { %5231 = vrcp.f32 %v1762_v54  ;;  %v5220_v49 = vpop.eup %5219 }
 0x6ff   : > { %5233 = vrcp.f32 %v1759_v27  ;;  %v1764_v21 = vmul.f32 %v5220_v49, %v6436_v7 }
 0x700   : > { %v1784_v20 = vpop.permute.xlu1 %1783  ;;  %v1788_v51 = vpop.permute.xlu0 %1787 }
 0x701   : > { %4701 = vmatprep.subr.bf16.mxu1 %v1788_v51 }
 0x702   : > { %4702 = vmatpush3.bf16.msra.mxu1 %v1788_v51  ;;  %v5222_v12 = vpop.eup %5221 }
 0x703   : > { %4703 = vmatprep.subr.bf16.mxu1 %v1786_v57  ;;  %v5224_v56 = vpop.eup %5223  ;;  %v1766_v22 = vmul.f32 %v5222_v12, %v6444_v0 }
 0x704   : > { %v2419_v2 = vpop.permute.xlu0 %2418  ;;  %v5226_v9 = vpop.eup %5225  ;;  %v1770_v27 = vmul.f32 %v5224_v56, %v6438_v5  ;;  %v5128_v56 = vld [vmem:[#allocation9 + $0x20] sm:$0xff]  }
 0x705   : > { %4963 = vmatprep.subr.msk.bf16.mxu0 %vm798_vm1, %v2419_v2  ;;  %v2442_v33 = vsel %vm798_vm1, %v2419_v2, 0  ;;  %v2417_v25 = vpop.permute.xlu1 %2416  ;;  %v1779_v54 = vpack.c.bf16 %v1766_v22, %v1764_v21  ;;  %v1768_v0 = vmul.f32 %v5226_v9, %v6432_v32 }
 0x706   : > { %4704 = vmatpush3.bf16.msra.mxu1 %v1786_v57  ;;  %4772 = vmatpush3.bf16.xpose.msra.mxu0 %v2442_v33  ;;  %v5228_v51 = vpop.eup %5227  ;;  %v2439_v22 = vsel %vm798_vm1, %v2417_v25, 0 }
 0x707   : > { %4705 = vmatprep.subr.bf16.mxu1 %v1784_v20  ;;  %4964 = vmatprep.subr.msk.bf16.mxu0 %vm798_vm1, %v2417_v25  ;;  %v1780_v12 = vpack.c.bf16 %v1770_v27, %v1768_v0  ;;  %v1772_v2 = vmul.f32 %v5228_v51, %v6452_v38 }
 0x708   : > { %4707 = vmatprep.mubr.msk.bf16.mxu1 %vm888_vm2, %v1779_v54  ;;  %v2415_v7 = vpop.permute.xlu0 %2414 }
 0x709   : > { %v2413_v9 = vpop.permute.xlu1 %2412 }
 0x70a   : > { %v5230_v49 = vpop.eup %5229  ;;  %4706 = vmatpush3.bf16.msra.mxu1 %v1784_v20  ;;  %v2436_v20 = vsel %vm798_vm1, %v2415_v7, 0  ;;  %v2433_v25 = vsel %vm798_vm1, %v2413_v9, 0 }
 0x70b   : > { %v1774_v57 = vmul.f32 %v5230_v49, %v6460_v31  ;;  %4715 = vmatprep.subr.bf16.mxu1 %v5127_v62  ;;  %v5232_v21 = vpop.eup %5231 }
 0x70c   : > { %v2405_v5 = vpop.permute.xlu0 %2404  ;;  %v5234_v54 = vpop.eup %5233  ;;  %v1778_v32 = vmul.f32 %v5232_v21, %v6454_v8 }
 0x70d   : > { %4708 = vmatmul.mubr.msk.bf16.vlgmr.msra.gmra.mxu1 %vm888_vm2, %v1780_v12  ;;  %4779 = vmatprep.mubr.msk.bf16.mxu0 %vm798_vm1, %v2405_v5  ;;  %v1781_v33 = vpack.c.bf16 %v1774_v57, %v1772_v2  ;;  %v1776_v38 = vmul.f32 %v5234_v54, %v6446_v26  ;;  %v2407_v27 = vpop.permute.xlu1 %2406 }
 0x70e   : > { %4774 = vmatpush3.bf16.xpose.msra.mxu0 %v2439_v22  ;;  %4716 = vmatpush3.bf16.msra.mxu1 %v5127_v62 }
 0x70f   : > { %4711 = vmatprep.mubr.msk.bf16.mxu1 %vm888_vm2, %v1781_v33  ;;  %4965 = vmatprep.subr.msk.bf16.mxu0 %vm798_vm1, %v2415_v7  ;;  %v1782_v31 = vpack.c.bf16 %v1778_v32, %v1776_v38 }
 0x710   : > { %4717 = vmatprep.subr.bf16.mxu1 %v5128_v56  ;;  %v2409_v62 = vpop.permute.xlu0 %2408 }
 0x711   : > { %v2411_v26 = vpop.permute.xlu1 %2410 }
 0x712   : > { %4718 = vmatpush3.bf16.msra.mxu1 %v5128_v56 }
 0x715   : > { %4712 = vmatmul.mubr.msk.bf16.gmra.mxu1 %vm888_vm2, %v1782_v31 }
 0x716   : > { %4776 = vmatpush3.bf16.xpose.msra.mxu0 %v2436_v20 }
 0x717   : > { %4966 = vmatprep.subr.msk.bf16.mxu0 %vm798_vm1, %v2413_v9 }
 0x71e   : > { %4778 = vmatpush3.bf16.xpose.msra.mxu0 %v2433_v25 }
 0x725   : > { %4780 = vmatmul.mubr.msk.bf16.vlgmr.msra.gmra.mxu0 %vm798_vm1, %v2407_v27 }
 0x726   : > { %4783 = vmatprep.mubr.msk.bf16.mxu0 %vm798_vm1, %v2409_v62 }
 0x72d   : > { %4784 = vmatmul.mubr.msk.bf16.gmra.mxu0 %vm798_vm1, %v2411_v26 }
 0x741   : > { %v2105_v8 = vpop.xlane.xlu1 %2104  ;;  %v2102_v51 = vpop.xlane.xlu0 %2101 }
 0x742   : > { %v2124_v7 = vsub.f32 %v6480_v45, %v2102_v51  ;;  %v2125_v2 = vsub.f32 %v6484_v47, %v2105_v8 }
 0x744   : > { %v2132_v21 = vmul.f32 1.442695, %v2124_v7  ;;  %v2134_v54 = vmul.f32 1.442695, %v2125_v2 }
 0x745   : > { %v2114_v0 = vpop.xlane.xlu1 %2113  ;;  %v2108_v49 = vpop.xlane.xlu0 %2107 }
 0x746   : > { %v2126_v12 = vsub.f32 %v6478_v15, %v2108_v49  ;;  %v2128_v45 = vsub.f32 %v6492_v42, %v2114_v0 }
 0x748   : > { %v2136_v57 = vmul.f32 1.442695, %v2126_v12  ;;  %v2140_v47 = vmul.f32 1.442695, %v2128_v45 }
 0x749   : > { %v2120_v5 = vpop.xlane.xlu1 %2119  ;;  %v2111_v56 = vpop.xlane.xlu0 %2110 }
 0x74a   : > { %v2130_v22 = vsub.f32 %v6486_v52, %v2120_v5  ;;  %v2127_v33 = vsub.f32 %v6482_v13, %v2111_v56  ;;  %5235 = vpow2.f32 %v2136_v57 }
 0x74b   : > { %5237 = vpow2.f32 %v2132_v21 }
 0x74c   : > { %v2138_v32 = vmul.f32 1.442695, %v2127_v33  ;;  %v2144_v38 = vmul.f32 1.442695, %v2130_v22 }
 0x74d   : > { %v6542_v31 = vpop.permute.xlu1 %2198  ;;  %v2117_v15 = vpop.xlane.xlu0 %2116 }
 0x74e   : > { %4743 = vmatprep.subr.bf16.mxu1 %v6542_v31  ;;  %5239 = vpow2.f32 %v2138_v32  ;;  %v2129_v52 = vsub.f32 %v6504_v48, %v2117_v15  ;;  %v1873_v15 = vstv %s4293_s12 }
 0x74f   : > { %5241 = vpow2.f32 %v2134_v54 }
 0x750   : > { %5243 = vpow2.f32 %v2144_v38  ;;  %v2142_v25 = vmul.f32 1.442695, %v2129_v52 }
 0x751   : > { %v2123_v20 = vpop.xlane.xlu0 %2122  ;;  %5245 = vpow2.f32 %v2140_v47 }
 0x752   : > { %v2131_v13 = vsub.f32 %v6498_v6, %v2123_v20 }
 0x754   : > { %v2146_v9 = vmul.f32 1.442695, %v2131_v13 }
 0x756   : > { %5247 = vpow2.f32 %v2146_v9 }
 0x757   : > { %v6547_v42 = vpop.eup %5235  ;;  %5249 = vpow2.f32 %v2142_v25 }
 0x758   : > { %v2154_v27 = vsel %vm888_vm2, %v6547_v42, 0.0  ;;  %v6551_v62 = vpop.eup %5237 }
 0x759   : > { %2155 = vadd.xlane.f32.xlu1 %v2154_v27  ;;  %v2148_v6 = vsel %vm888_vm2, %v6551_v62, 0.0 }
 0x75b   : > { %v6553_v26 = vpop.eup %5239 }
 0x75c   : > { %v6555_v8 = vpop.eup %5241  ;;  %v2157_v48 = vsel %vm888_vm2, %v6553_v26, 0.0 }
 0x75d   : > { %v6561_v51 = vpop.eup %5243  ;;  %2149 = vadd.xlane.f32.xlu1 %v2148_v6  ;;  %2158 = vadd.xlane.f32.xlu0 %v2157_v48  ;;  %v2151_v0 = vsel %vm888_vm2, %v6555_v8, 0.0 }
 0x75e   : > { %v2166_v7 = vsel %vm888_vm2, %v6561_v51, 0.0  ;;  %v6567_v49 = vpop.eup %5245 }
 0x75f   : > { %v2160_v57 = vsel %vm888_vm2, %v6567_v49, 0.0 }
 0x761   : > { %2167 = vadd.xlane.f32.xlu1 %v2166_v7  ;;  %2152 = vadd.xlane.f32.xlu0 %v2151_v0 }
 0x763   : > { %v6569_v12 = vpop.eup %5247 }
 0x764   : > { %v2169_v2 = vsel %vm888_vm2, %v6569_v12, 0.0  ;;  %v6575_v21 = vpop.eup %5249 }
 0x765   : > { %2161 = vadd.xlane.f32.xlu1 %v2160_v57  ;;  %2170 = vadd.xlane.f32.xlu0 %v2169_v2  ;;  %v2163_v5 = vsel %vm888_vm2, %v6575_v21, 0.0 }
 0x769   : > { %2164 = vadd.xlane.f32.xlu0 %v2163_v5 }
 0x776   : > { %2194 = vrot.lane.b32.xlu1 %v6154_v17, %s5715_s2  ;;  %v6593_v17 = vpop.f32.mrf.mxu1 }
 0x77a   : > { %2192 = vrot.lane.b32.xlu1 %v6158_v18, %s5715_s2  ;;  %v6595_v18 = vpop.f32.mrf.mxu1 }
 0x77c   : > { %v6597_v56 = vpop.f32.mrf.mxu1 }
 0x77e   : > { %2813 = vrot.lane.b32.xlu1 %v6040_v50, %s5716_s20 }
 0x77f   : > { %2196 = vrot.lane.b32.xlu0 %v6150_v14, %s5715_s2  ;;  %v6599_v14 = vpop.f32.mrf.mxu1 }
 0x781   : > { %v6601_v22 = vpop.f32.mrf.mxu1 }
 0x782   : > { %2809 = vrot.lane.b32.xlu1 %v6028_v35, %s5716_s20 }
 0x783   : > { %2815 = vrot.lane.b32.xlu0 %v6036_v46, %s5716_s20  ;;  %v6603_v33 = vpop.f32.mrf.mxu1 }
 0x785   : > { %v6605_v54 = vpop.f32.mrf.mxu1 }
 0x786   : > { %2803 = vrot.lane.b32.xlu1 %v6032_v43, %s5716_s20 }
 0x787   : > { %2811 = vrot.lane.b32.xlu0 %v6024_v24, %s5716_s20  ;;  %v6607_v32 = vpop.f32.mrf.mxu1 }
 0x78a   : > { %2807 = vrot.lane.b32.xlu1 %v6052_v55, %s5716_s20 }
 0x78b   : > { %2801 = vrot.lane.b32.xlu0 %v6034_v44, %s5716_s20 }
 0x78f   : > { %2805 = vrot.lane.b32.xlu0 %v6062_v61, %s5716_s20 }
 0x7cd   : > { %v4709_v45 = vpop.f32.mrf.mxu1 }
 0x7ce   : > { %v1876_v13 = vmul.f32 %v4709_v45, %v1873_v15 }
 0x7cf   : > { %v1841_v38 = vpop.f32.mrf.mxu1 }
 0x7d0   : > { %v1874_v52 = vmul.f32 %v1873_v15, %v1841_v38  ;;  %v1884_v0 = vadd.f32 %v6347_v23, %v1876_v13 }
 0x7d1   : > { %v4710_v47 = vpop.f32.mrf.mxu1 }
 0x7d2   : > { %v1877_v20 = vmul.f32 %v4710_v47, %v1873_v15  ;;  %v1882_v48 = vadd.f32 %v6339_v29, %v1874_v52 }
 0x7d3   : > { %v1844_v9 = vpop.f32.mrf.mxu1 }
 0x7d4   : > { %v1875_v25 = vmul.f32 %v1873_v15, %v1844_v9  ;;  %v1885_v27 = vadd.f32 %v6335_v11, %v1877_v20 }
 0x7d5   : > { %v4713_v6 = vpop.f32.mrf.mxu1 }
 0x7d6   : > { %v1883_v7 = vadd.f32 %v6343_v41, %v1875_v25  ;;  %v1891_v5 = vpack.c.bf16 %v1885_v27, %v1884_v0  ;;  %v1880_v45 = vmul.f32 %v4713_v6, %v1873_v15 }
 0x7d7   : > { %v1857_v2 = vpop.f32.mrf.mxu1 }
 0x7d8   : > { %v1890_v57 = vpack.c.bf16 %v1883_v7, %v1882_v48  ;;  %v1878_v39 = vmul.f32 %v1873_v15, %v1857_v2  ;;  %v1888_v47 = vadd.f32 %v6365_v19, %v1880_v45 }
 0x7d9   : > { %v4714_v28 = vpop.f32.mrf.mxu1 }
 0x7da   : > { %v1881_v60 = vmul.f32 %v4714_v28, %v1873_v15  ;;  %4719 = vmatprep.mubr.msk.bf16.mxu1 %vm507_vm0, %v1890_v57  ;;  %v1886_v41 = vadd.f32 %v6357_v1, %v1878_v39 }
 0x7db   : > { %v1860_v38 = vpop.f32.mrf.mxu1  ;;  %4720 = vmatmul.mubr.msk.bf16.vlgmr.msra.gmra.mxu1 %vm507_vm0, %v1891_v5 }
 0x7dc   : > { %v1879_v11 = vmul.f32 %v1873_v15, %v1860_v38  ;;  %4744 = vmatpush3.bf16.msra.mxu1 %v6542_v31  ;;  %v1889_v29 = vadd.f32 %v6353_v58, %v1881_v60 }
 0x7de   : > { %v1887_v23 = vadd.f32 %v6361_v3, %v1879_v11  ;;  %v1893_v20 = vpack.c.bf16 %v1889_v29, %v1888_v47 }
 0x7e0   : > { %v1892_v52 = vpack.c.bf16 %v1887_v23, %v1886_v41 }
 0x7e2   : > { %4723 = vmatprep.mubr.msk.bf16.mxu1 %vm507_vm0, %v1892_v52  ;;  %v2156_v28 = vpop.xlane.xlu1 %2155 }
 0x7e3   : > { %4724 = vmatmul.mubr.msk.bf16.gmra.mxu1 %vm507_vm0, %v1893_v20 }
 0x7e5   : > { %v6622_v13 = vpop.f32.mrf.mxu0 }
 0x7e6   : > { %v2150_v15 = vpop.xlane.xlu1 %2149  ;;  %v2159_v9 = vpop.xlane.xlu0 %2158  ;;  %v2515_v25 = vsel %vm888_vm2, %v6622_v13, -inf }
 0x7e7   : > { %v6624_v31 = vpop.f32.mrf.mxu0  ;;  %5251 = vrcp.f32 %v2150_v15 }
 0x7e8   : > { %v2509_v39 = vsel %vm888_vm2, %v6624_v31, -inf }
 0x7e9   : > { %v6628_v60 = vpop.f32.mrf.mxu0  ;;  %2510 = vmax.xlane.f32.xlu0 %v2509_v39 }
 0x7ea   : > { %v2168_v58 = vpop.xlane.xlu1 %2167  ;;  %v2153_v1 = vpop.xlane.xlu0 %2152  ;;  %v2518_v2 = vsel %vm888_vm2, %v6628_v60, -inf }
 0x7eb   : > { %v6630_v3 = vpop.f32.mrf.mxu0  ;;  %5253 = vrcp.f32 %v2153_v1 }
 0x7ec   : > { %v2512_v19 = vsel %vm888_vm2, %v6630_v3, -inf  ;;  %5255 = vrcp.f32 %v2159_v9 }
 0x7ed   : > { %v6636_v27 = vpop.f32.mrf.mxu0  ;;  %2513 = vmax.xlane.f32.xlu1 %v2512_v19  ;;  %2516 = vmax.xlane.f32.xlu0 %v2515_v25  ;;  %5257 = vrcp.f32 %v2156_v28 }
 0x7ee   : > { %v2162_v6 = vpop.xlane.xlu1 %2161  ;;  %v2171_v48 = vpop.xlane.xlu0 %2170  ;;  %v2527_v11 = vsel %vm888_vm2, %v6636_v27, -inf }
 0x7ef   : > { %v6638_v7 = vpop.f32.mrf.mxu0  ;;  %5259 = vrcp.f32 %v2162_v6 }
 0x7f0   : > { %v2521_v0 = vsel %vm888_vm2, %v6638_v7, -inf }
 0x7f1   : > { %v6644_v57 = vpop.f32.mrf.mxu0  ;;  %2522 = vmax.xlane.f32.xlu1 %v2521_v0  ;;  %2519 = vmax.xlane.f32.xlu0 %v2518_v2 }
 0x7f2   : > { %v2195_v5 = vpop.permute.xlu1 %2194  ;;  %v2165_v45 = vpop.xlane.xlu0 %2164  ;;  %v2530_v52 = vsel %vm888_vm2, %v6644_v57, -inf }
 0x7f3   : > { %5261 = vrcp.f32 %v2165_v45  ;;  %v6646_v38 = vpop.f32.mrf.mxu0 }
 0x7f4   : > { %v2524_v29 = vsel %vm888_vm2, %v6646_v38, -inf  ;;  %5263 = vrcp.f32 %v2171_v48  ;;  %v5252_v47 = vpop.eup %5251  ;;  %v5129_v48 = vld [vmem:[#allocation9 + $0x38] sm:$0xff]  }
 0x7f5   : > { %2528 = vmax.xlane.f32.xlu1 %v2527_v11  ;;  %2525 = vmax.xlane.f32.xlu0 %v2524_v29  ;;  %5265 = vrcp.f32 %v2168_v58  ;;  %v2173_v9 = vmul.f32 %v5252_v47, %v6551_v62  ;;  %v784_v47 = vadd.f32 %v6136_v63, %v6091_v10 }
 0x7f6   : > { %v2193_v41 = vpop.permute.xlu1 %2192  ;;  %v2197_v23 = vpop.permute.xlu0 %2196 }
 0x7f7   : > { %4745 = vmatprep.subr.bf16.mxu1 %v2197_v23 }
 0x7f8   : > { %4746 = vmatpush3.bf16.msra.mxu1 %v2197_v23  ;;  %v5254_v20 = vpop.eup %5253  ;;  %v5130_v23 = vld [vmem:[#allocation9 + $0x30] sm:$0xff]  }
 0x7f9   : > { %2531 = vmax.xlane.f32.xlu0 %v2530_v52  ;;  %4747 = vmatprep.subr.bf16.mxu1 %v2195_v5  ;;  %v5256_v28 = vpop.eup %5255  ;;  %v2175_v39 = vmul.f32 %v5254_v20, %v6555_v8  ;;  %v788_v52 = vadd.f32 %v6332_v36, %v6091_v10 }
 0x7fa   : > { %v2816_v15 = vpop.permute.xlu0 %2815  ;;  %v5258_v19 = vpop.eup %5257  ;;  %v2179_v6 = vmul.f32 %v5256_v28, %v6553_v26 }
 0x7fb   : > { %4967 = vmatprep.subr.msk.bf16.mxu0 %vm798_vm1, %v2816_v15  ;;  %v2839_v1 = vsel %vm798_vm1, %v2816_v15, 0  ;;  %v2814_v58 = vpop.permute.xlu1 %2813  ;;  %v2188_v25 = vpack.c.bf16 %v2175_v39, %v2173_v9  ;;  %v2177_v8 = vmul.f32 %v5258_v19, %v6547_v42  ;;  %v6674_v63 = vpack.c.bf16 %v788_v52, %v784_v47 }
 0x7fc   : > { %4748 = vmatpush3.bf16.msra.mxu1 %v2195_v5  ;;  %4816 = vmatpush3.bf16.xpose.msra.mxu0 %v2839_v1  ;;  %v5260_v0 = vpop.eup %5259  ;;  %v2836_v42 = vsel %vm798_vm1, %v2814_v58, 0 }
 0x7fd   : > { %4749 = vmatprep.subr.bf16.mxu1 %v2193_v41  ;;  %4968 = vmatprep.subr.msk.bf16.mxu0 %vm798_vm1, %v2814_v58  ;;  %v2189_v45 = vpack.c.bf16 %v2179_v6, %v2177_v8  ;;  %v2181_v5 = vmul.f32 %v5260_v0, %v6567_v49 }
 0x7fe   : > { %4751 = vmatprep.mubr.msk.bf16.mxu1 %vm888_vm2, %v2188_v25  ;;  %v2812_v62 = vpop.permute.xlu0 %2811 }
 0x7ff   : > { %v2810_v28 = vpop.permute.xlu1 %2809 }
 0x800   : > { %v5262_v2 = vpop.eup %5261  ;;  %4750 = vmatpush3.bf16.msra.mxu1 %v2193_v41  ;;  %v2830_v15 = vsel %vm798_vm1, %v2810_v28, 0 }
 0x801   : > { %4759 = vmatprep.subr.bf16.mxu1 %v5129_v48  ;;  %v2183_v11 = vmul.f32 %v5262_v2, %v6575_v21  ;;  %v5264_v29 = vpop.eup %5263  ;;  %v2833_v21 = vsel %vm798_vm1, %v2812_v62, 0 }
 0x802   : > { %v2802_v26 = vpop.permute.xlu0 %2801  ;;  %v5266_v20 = vpop.eup %5265  ;;  %v2187_v49 = vmul.f32 %v5264_v29, %v6569_v12 }
 0x803   : > { %4752 = vmatmul.mubr.msk.bf16.vlgmr.msra.gmra.mxu1 %vm888_vm2, %v2189_v45  ;;  %4823 = vmatprep.mubr.msk.bf16.mxu0 %vm798_vm1, %v2802_v26  ;;  %v2190_v41 = vpack.c.bf16 %v2183_v11, %v2181_v5  ;;  %v2185_v10 = vmul.f32 %v5266_v20, %v6561_v51  ;;  %v2804_v12 = vpop.permute.xlu1 %2803 }
 0x804   : > { %4760 = vmatpush3.bf16.msra.mxu1 %v5129_v48  ;;  %4818 = vmatpush3.bf16.xpose.msra.mxu0 %v2836_v42 }
 0x805   : > { %4755 = vmatprep.mubr.msk.bf16.mxu1 %vm888_vm2, %v2190_v41  ;;  %4969 = vmatprep.subr.msk.bf16.mxu0 %vm798_vm1, %v2812_v62  ;;  %v2191_v36 = vpack.c.bf16 %v2187_v49, %v2185_v10 }
 0x806   : > { %4761 = vmatprep.subr.bf16.mxu1 %v5130_v23  ;;  %v2806_v9 = vpop.permute.xlu0 %2805 }
 0x807   : > { %v2808_v51 = vpop.permute.xlu1 %2807 }
 0x808   : > { %4762 = vmatpush3.bf16.msra.mxu1 %v5130_v23 }
 0x809   : > { %4787 = vmatprep.subr.bf16.mxu1 %v6674_v63 }
 0x80b   : > { %4756 = vmatmul.mubr.msk.bf16.gmra.mxu1 %vm888_vm2, %v2191_v36 }
 0x80c   : > { %4820 = vmatpush3.bf16.xpose.msra.mxu0 %v2833_v21 }
 0x80d   : > { %4970 = vmatprep.subr.msk.bf16.mxu0 %vm798_vm1, %v2810_v28 }
 0x814   : > { %4822 = vmatpush3.bf16.xpose.msra.mxu0 %v2830_v15 }
 0x81b   : > { %4824 = vmatmul.mubr.msk.bf16.vlgmr.msra.gmra.mxu0 %vm798_vm1, %v2804_v12 }
 0x81c   : > { %4827 = vmatprep.mubr.msk.bf16.mxu0 %vm798_vm1, %v2806_v9 }
 0x823   : > { %4828 = vmatmul.mubr.msk.bf16.gmra.mxu0 %vm798_vm1, %v2808_v51 }
 0x872   : > { %v2511_v39 = vpop.xlane.xlu0 %2510 }
 0x873   : > { %v2533_v1 = vsub.f32 %v6624_v31, %v2511_v39 }
 0x875   : > { %v2541_v19 = vmul.f32 1.442695, %v2533_v1  ;;  %v1564_v1 = vadd.f32 %v6593_v17, %v6406_v4  ;;  %v1580_v4 = vadd.f32 %v6601_v22, %v6414_v16  ;;  %v1575_v16 = vadd.f32 %v6607_v32, %v6420_v40 }
 0x876   : > { %v2514_v58 = vpop.xlane.xlu1 %2513  ;;  %v2517_v25 = vpop.xlane.xlu0 %2516 }
 0x877   : > { %5267 = vpow2.f32 %v2541_v19  ;;  %v2534_v6 = vsub.f32 %v6630_v3, %v2514_v58  ;;  %v2535_v48 = vsub.f32 %v6622_v13, %v2517_v25  ;;  %v1556_v58 = vadd.f32 %v6595_v18, %v6408_v59 }
 0x878   : > { %v1572_v18 = vadd.f32 %v6603_v33, %v6416_v34 }
 0x879   : > { %v2543_v0 = vmul.f32 1.442695, %v2534_v6  ;;  %v2545_v62 = vmul.f32 1.442695, %v2535_v48  ;;  %v1567_v48 = vadd.f32 %v6597_v56, %v6410_v53 }
 0x87a   : > { %v2523_v8 = vpop.xlane.xlu1 %2522  ;;  %v2520_v2 = vpop.xlane.xlu0 %2519 }
 0x87b   : > { %5269 = vpow2.f32 %v2543_v0  ;;  %v2537_v45 = vsub.f32 %v6638_v7, %v2523_v8  ;;  %v2536_v5 = vsub.f32 %v6628_v60, %v2520_v2  ;;  %v1559_v8 = vadd.f32 %v6599_v14, %v6412_v37 }
 0x87c   : > { %5271 = vpow2.f32 %v2545_v62  ;;  %v1583_v37 = vadd.f32 %v6605_v54, %v6418_v30  ;;  %v2282_v54 = vstv %s4308_s29 }
 0x87d   : > { %v2549_v11 = vmul.f32 1.442695, %v2537_v45  ;;  %v2547_v31 = vmul.f32 1.442695, %v2536_v5 }
 0x87e   : > { %v2529_v29 = vpop.xlane.xlu1 %2528  ;;  %v2526_v26 = vpop.xlane.xlu0 %2525 }
 0x87f   : > { %5273 = vpow2.f32 %v2549_v11  ;;  %v2539_v23 = vsub.f32 %v6636_v27, %v2529_v29  ;;  %v2538_v3 = vsub.f32 %v6646_v38, %v2526_v26 }
 0x880   : > { %5275 = vpow2.f32 %v2547_v31 }
 0x881   : > { %v2553_v13 = vmul.f32 1.442695, %v2539_v23  ;;  %v2551_v47 = vmul.f32 1.442695, %v2538_v3  ;;  %v6766_v3 = vld [vmem:[%s5964_s30 + $0x18] sm:$0xff] }
 0x882   : > { %v2532_v52 = vpop.xlane.xlu0 %2531 }
 0x883   : > { %5277 = vpow2.f32 %v2553_v13  ;;  %v2540_v42 = vsub.f32 %v6644_v57, %v2532_v52  ;;  %v6770_v52 = vld [vmem:[%s5964_s30] sm:$0xff] }
 0x884   : > { %v6693_v7 = vpop.eup %5267  ;;  %5279 = vpow2.f32 %v2551_v47 }
 0x885   : > { %v2555_v60 = vmul.f32 1.442695, %v2540_v42  ;;  %v2557_v41 = vsel %vm888_vm2, %v6693_v7, 0.0 }
 0x886   : > { %2558 = vadd.xlane.f32.xlu1 %v2557_v41 }
 0x887   : > { %5281 = vpow2.f32 %v2555_v60  ;;  %v6774_v60 = vld [vmem:[%s5964_s30 + $0x8] sm:$0xff] }
 0x888   : > { %v6697_v20 = vpop.eup %5269 }
 0x889   : > { %v6699_v27 = vpop.eup %5271  ;;  %v2560_v38 = vsel %vm888_vm2, %v6697_v20, 0.0 }
 0x88a   : > { %2561 = vadd.xlane.f32.xlu0 %v2560_v38  ;;  %v2563_v57 = vsel %vm888_vm2, %v6699_v27, 0.0  ;;  %v6778_v38 = vld [vmem:[%s5964_s30 + $0x10] sm:$0xff] }
 0x88b   : > { %2564 = vadd.xlane.f32.xlu1 %v2563_v57 }
 0x88c   : > { %v6705_v49 = vpop.eup %5273 }
 0x88d   : > { %v6707_v10 = vpop.eup %5275  ;;  %v2569_v36 = vsel %vm888_vm2, %v6705_v49, 0.0 }
 0x88e   : > { %v2566_v21 = vsel %vm888_vm2, %v6707_v10, 0.0 }
 0x88f   : > { %2570 = vadd.xlane.f32.xlu1 %v2569_v36  ;;  %2567 = vadd.xlane.f32.xlu0 %v2566_v21 }
 0x890   : > { %v6713_v28 = vpop.eup %5277 }
 0x891   : > { %v6715_v15 = vpop.eup %5279  ;;  %v2575_v12 = vsel %vm888_vm2, %v6713_v28, 0.0 }
 0x892   : > { %v2572_v9 = vsel %vm888_vm2, %v6715_v15, 0.0 }
 0x893   : > { %2576 = vadd.xlane.f32.xlu1 %v2575_v12  ;;  %2573 = vadd.xlane.f32.xlu0 %v2572_v9 }
 0x894   : > { %v6721_v51 = vpop.eup %5281 }
 0x895   : > { %v2578_v39 = vsel %vm888_vm2, %v6721_v51, 0.0 }
 0x897   : > { %2579 = vadd.xlane.f32.xlu0 %v2578_v39 }
 0x89b   : > { %v4721_v19 = vpop.f32.mrf.mxu1 }
 0x89c   : > { %v6729_v25 = vadd.f32 %v4721_v19, %v1564_v1 }
 0x89d   : > { %v1956_v6 = vpop.f32.mrf.mxu1 }
 0x89e   : > { %v6733_v0 = vadd.f32 %v1956_v6, %v1556_v58 }
 0x89f   : > { %v4722_v62 = vpop.f32.mrf.mxu1 }
 0x8a0   : > { %v6737_v2 = vadd.f32 %v4722_v62, %v1567_v48  ;;  %v6785_v48 = vld [vmem:[%s5964_s30 + $0x38] sm:$0xff] }
 0x8a1   : > { %v1959_v45 = vpop.f32.mrf.mxu1 }
 0x8a2   : > { %v6741_v17 = vadd.f32 %v1959_v45, %v1559_v8  ;;  %v7411_v8 = vld [vmem:[#allocation25_spill] sm:$0xff] }
 0x8a3   : > { %v4725_v59 = vpop.f32.mrf.mxu1  ;;  %v6790_v45 = vld [vmem:[%s5964_s30 + $0x20] sm:$0xff] }
 0x8a4   : > { %v6745_v5 = vadd.f32 %v4725_v59, %v1580_v4  ;;  %3228 = vrot.lane.b32.xlu1 %v6036_v46, %s5717_s23  ;;  %v6794_v59 = vld [vmem:[%s5964_s30 + $0x28] sm:$0xff] }
 0x8a5   : > { %v1972_v53 = vpop.f32.mrf.mxu1 }
 0x8a6   : > { %v6750_v56 = vadd.f32 %v1972_v53, %v1572_v18  ;;  %v6798_v53 = vld [vmem:[%s5964_s30 + $0x30] sm:$0xff] }
 0x8a7   : > { %v4726_v14 = vpop.f32.mrf.mxu1 }
 0x8a8   : > { %v6754_v22 = vadd.f32 %v4726_v14, %v1583_v37  ;;  %3224 = vrot.lane.b32.xlu1 %v6024_v24, %s5717_s23 }
 0x8a9   : > { %v1975_v34 = vpop.f32.mrf.mxu1 }
 0x8aa   : > { %v6757_v33 = vadd.f32 %v1975_v34, %v1575_v16  ;;  %v7412_v34 = vld [vmem:[#allocation24_spill] sm:$0xff] }
 0x8ac   : > { %3222 = vrot.lane.b32.xlu1 %v6028_v35, %s5717_s23 }
 0x8ad   : > { %3226 = vrot.lane.b32.xlu0 %v6040_v50, %s5717_s23 }
 0x8b0   : > { %3216 = vrot.lane.b32.xlu1 %v6032_v43, %s5717_s23 }
 0x8b1   : > { %3214 = vrot.lane.b32.xlu0 %v6034_v44, %s5717_s23 }
 0x8b4   : > { %3220 = vrot.lane.b32.xlu1 %v6052_v55, %s5717_s23 }
 0x8b5   : > { %3218 = vrot.lane.b32.xlu0 %v6062_v61, %s5717_s23  ;;  %s7313_s23 = scalar_lea.hbm %s7370_s10, %s4382_s5 }
 0x8c3   : > { %v4753_v30 = vpop.f32.mrf.mxu1 }
 0x8c4   : > { %v2285_v29 = vmul.f32 %v4753_v30, %v2282_v54  ;;  %v7413_v30 = vld [vmem:[#allocation23_spill] sm:$0xff] }
 0x8c5   : > { %v2250_v40 = vpop.f32.mrf.mxu1 }
 0x8c6   : > { %v2283_v11 = vmul.f32 %v2282_v54, %v2250_v40  ;;  %v2293_v57 = vadd.f32 %v6778_v38, %v2285_v29 }
 0x8c7   : > { %v4754_v32 = vpop.f32.mrf.mxu1 }
 0x8c8   : > { %v2286_v31 = vmul.f32 %v4754_v32, %v2282_v54  ;;  %v2291_v42 = vadd.f32 %v6770_v52, %v2283_v11 }
 0x8c9   : > { %v2253_v26 = vpop.f32.mrf.mxu1 }
 0x8ca   : > { %v2284_v23 = vmul.f32 %v2282_v54, %v2253_v26  ;;  %v2294_v13 = vadd.f32 %v6766_v3, %v2286_v31 }
 0x8cb   : > { %v4757_v47 = vpop.f32.mrf.mxu1 }
 0x8cc   : > { %v2292_v41 = vadd.f32 %v6774_v60, %v2284_v23  ;;  %v2300_v12 = vpack.c.bf16 %v2294_v13, %v2293_v57  ;;  %v2289_v19 = vmul.f32 %v4757_v47, %v2282_v54 }
 0x8cd   : > { %v2266_v36 = vpop.f32.mrf.mxu1 }
 0x8ce   : > { %v2299_v21 = vpack.c.bf16 %v2292_v41, %v2291_v42  ;;  %v2287_v39 = vmul.f32 %v2282_v54, %v2266_v36  ;;  %v2297_v37 = vadd.f32 %v6798_v53, %v2289_v19 }
 0x8cf   : > { %v4758_v9 = vpop.f32.mrf.mxu1 }
 0x8d0   : > { %v2290_v1 = vmul.f32 %v4758_v9, %v2282_v54  ;;  %4763 = vmatprep.mubr.msk.bf16.mxu1 %vm507_vm0, %v2299_v21  ;;  %v2295_v4 = vadd.f32 %v6790_v45, %v2287_v39  ;;  %v5131_v9 = vld [vmem:[#allocation9 + $0x48] sm:$0xff]  }
 0x8d1   : > { %v2269_v58 = vpop.f32.mrf.mxu1  ;;  %4764 = vmatmul.mubr.msk.bf16.vlgmr.msra.gmra.mxu1 %vm507_vm0, %v2300_v12 }
 0x8d2   : > { %v2288_v6 = vmul.f32 %v2282_v54, %v2269_v58  ;;  %4788 = vmatpush3.bf16.msra.mxu1 %v6674_v63  ;;  %v2298_v62 = vadd.f32 %v6785_v48, %v2290_v1 }
 0x8d3   : > { %4789 = vmatprep.subr.bf16.mxu1 %v7411_v8 }
 0x8d4   : > { %v2296_v18 = vadd.f32 %v6794_v59, %v2288_v6  ;;  %v2302_v16 = vpack.c.bf16 %v2298_v62, %v2297_v37 }
 0x8d6   : > { %v2301_v14 = vpack.c.bf16 %v2296_v18, %v2295_v4  ;;  %4790 = vmatpush3.bf16.msra.mxu1 %v7411_v8 }
 0x8d7   : > { %4791 = vmatprep.subr.bf16.mxu1 %v7412_v34 }
 0x8d8   : > { %4767 = vmatprep.mubr.msk.bf16.mxu1 %vm507_vm0, %v2301_v14 }
 0x8d9   : > { %4768 = vmatmul.mubr.msk.bf16.gmra.mxu1 %vm507_vm0, %v2302_v16 }
 0x8da   : > { %4792 = vmatpush3.bf16.msra.mxu1 %v7412_v34 }
 0x8db   : > { %4793 = vmatprep.subr.bf16.mxu1 %v7413_v30  ;;  %v6807_v40 = vpop.f32.mrf.mxu0 }
 0x8dc   : > { %v2912_v26 = vsel %vm888_vm2, %v6807_v40, -inf }
 0x8dd   : > { %v6809_v54 = vpop.f32.mrf.mxu0 }
 0x8de   : > { %4794 = vmatpush3.bf16.msra.mxu1 %v7413_v30  ;;  %v2906_v32 = vsel %vm888_vm2, %v6809_v54, -inf }
 0x8df   : > { %v6814_v11 = vpop.f32.mrf.mxu0  ;;  %2907 = vmax.xlane.f32.xlu0 %v2906_v32  ;;  %4803 = vmatprep.subr.bf16.mxu1 %v5131_v9 }
 0x8e0   : > { %v2915_v42 = vsel %vm888_vm2, %v6814_v11, -inf }
 0x8e1   : > { %v6816_v31 = vpop.f32.mrf.mxu0 }
 0x8e2   : > { %v2909_v29 = vsel %vm888_vm2, %v6816_v31, -inf }
 0x8e3   : > { %v6822_v23 = vpop.f32.mrf.mxu0  ;;  %2910 = vmax.xlane.f32.xlu1 %v2909_v29  ;;  %2913 = vmax.xlane.f32.xlu0 %v2912_v26 }
 0x8e4   : > { %v2924_v36 = vsel %vm888_vm2, %v6822_v23, -inf }
 0x8e5   : > { %v6824_v13 = vpop.f32.mrf.mxu0 }
 0x8e6   : > { %v2918_v47 = vsel %vm888_vm2, %v6824_v13, -inf }
 0x8e7   : > { %v6830_v41 = vpop.f32.mrf.mxu0  ;;  %2919 = vmax.xlane.f32.xlu1 %v2918_v47  ;;  %2916 = vmax.xlane.f32.xlu0 %v2915_v42 }
 0x8e8   : > { %v2927_v12 = vsel %vm888_vm2, %v6830_v41, -inf }
 0x8e9   : > { %v6832_v57 = vpop.f32.mrf.mxu0 }
 0x8ea   : > { %v2921_v21 = vsel %vm888_vm2, %v6832_v57, -inf }
 0x8eb   : > { %2925 = vmax.xlane.f32.xlu1 %v2924_v36  ;;  %2922 = vmax.xlane.f32.xlu0 %v2921_v21 }
 0x8ef   : > { %2928 = vmax.xlane.f32.xlu0 %v2927_v12 }
 0x8fc   : > { %3008 = vrot.lane.b32.xlu1 %v6674_v63, %s5710_s11 }
 0x90f   : > { %v2559_v39 = vpop.xlane.xlu1 %2558 }
 0x910   : > { %5283 = vrcp.f32 %v2559_v39 }
 0x913   : > { %v2562_v1 = vpop.xlane.xlu0 %2561 }
 0x914   : > { %v2565_v19 = vpop.xlane.xlu1 %2564  ;;  %5285 = vrcp.f32 %v2562_v1 }
 0x915   : > { %5287 = vrcp.f32 %v2565_v19 }
 0x918   : > { %v2571_v58 = vpop.xlane.xlu1 %2570  ;;  %v2568_v6 = vpop.xlane.xlu0 %2567 }
 0x919   : > { %5289 = vrcp.f32 %v2568_v6  ;;  %v5132_v6 = vld [vmem:[#allocation9 + $0x40] sm:$0xff]  }
 0x91a   : > { %5291 = vrcp.f32 %v2571_v58 }
 0x91c   : > { %v2577_v62 = vpop.xlane.xlu1 %2576  ;;  %v2574_v4 = vpop.xlane.xlu0 %2573 }
 0x91d   : > { %5293 = vrcp.f32 %v2574_v4  ;;  %v5284_v18 = vpop.eup %5283 }
 0x91e   : > { %5295 = vrcp.f32 %v2577_v62  ;;  %v2582_v29 = vmul.f32 %v5284_v18, %v6693_v7 }
 0x920   : > { %v3229_v37 = vpop.permute.xlu1 %3228  ;;  %v2580_v14 = vpop.xlane.xlu0 %2579 }
 0x921   : > { %v5286_v16 = vpop.eup %5285  ;;  %v3252_v32 = vsel %vm798_vm1, %v3229_v37, 0  ;;  %5297 = vrcp.f32 %v2580_v14  ;;  %4971 = vmatprep.subr.msk.bf16.mxu0 %vm798_vm1, %v3229_v37 }
 0x922   : > { %4860 = vmatpush3.bf16.xpose.msra.mxu0 %v3252_v32  ;;  %v2584_v26 = vmul.f32 %v5286_v16, %v6697_v20  ;;  %v5288_v36 = vpop.eup %5287 }
 0x923   : > { %v2586_v12 = vmul.f32 %v5288_v36, %v6699_v27 }
 0x924   : > { %v3227_v47 = vpop.permute.xlu0 %3226  ;;  %v2597_v42 = vpack.c.bf16 %v2584_v26, %v2582_v29  ;;  %v3225_v20 = vpop.permute.xlu1 %3224 }
 0x925   : > { %4972 = vmatprep.subr.msk.bf16.mxu0 %vm798_vm1, %v3227_v47  ;;  %v3249_v58 = vsel %vm798_vm1, %v3227_v47, 0  ;;  %v3246_v32 = vsel %vm798_vm1, %v3225_v20, 0 }
 0x926   : > { %4795 = vmatprep.mubr.msk.bf16.mxu1 %vm888_vm2, %v2597_v42  ;;  %v5290_v21 = vpop.eup %5289 }
 0x927   : > { %v2588_v39 = vmul.f32 %v5290_v21, %v6707_v10  ;;  %v5292_v19 = vpop.eup %5291 }
 0x928   : > { %v3215_v1 = vpop.permute.xlu0 %3214  ;;  %v2590_v27 = vmul.f32 %v5292_v19, %v6705_v49  ;;  %v3223_v26 = vpop.permute.xlu1 %3222 }
 0x929   : > { %4867 = vmatprep.mubr.msk.bf16.mxu0 %vm798_vm1, %v3215_v1  ;;  %v2598_v7 = vpack.c.bf16 %v2588_v39, %v2586_v12  ;;  %v3243_v49 = vsel %vm798_vm1, %v3223_v26, 0 }
 0x92a   : > { %4862 = vmatpush3.bf16.xpose.msra.mxu0 %v3249_v58  ;;  %v5294_v62 = vpop.eup %5293 }
 0x92b   : > { %4973 = vmatprep.subr.msk.bf16.mxu0 %vm798_vm1, %v3225_v20  ;;  %v5296_v4 = vpop.eup %5295  ;;  %4796 = vmatmul.mubr.msk.bf16.vlgmr.msra.gmra.mxu1 %vm888_vm2, %v2598_v7  ;;  %v2592_v10 = vmul.f32 %v5294_v62, %v6715_v15 }
 0x92c   : > { %4804 = vmatpush3.bf16.msra.mxu1 %v5131_v9  ;;  %v2594_v14 = vmul.f32 %v5296_v4, %v6713_v28  ;;  %v3217_v15 = vpop.permute.xlu1 %3216  ;;  %v3219_v9 = vpop.permute.xlu0 %3218 }
 0x92d   : > { %v2599_v37 = vpack.c.bf16 %v2592_v10, %v2590_v27  ;;  %4805 = vmatprep.subr.bf16.mxu1 %v5132_v6 }
 0x92e   : > { %v5298_v18 = vpop.eup %5297 }
 0x92f   : > { %v2596_v16 = vmul.f32 %v5298_v18, %v6721_v51  ;;  %4799 = vmatprep.mubr.msk.bf16.mxu1 %vm888_vm2, %v2599_v37 }
 0x930   : > { %4806 = vmatpush3.bf16.msra.mxu1 %v5132_v6  ;;  %v3221_v28 = vpop.permute.xlu1 %3220 }
 0x931   : > { %v2600_v29 = vpack.c.bf16 %v2596_v16, %v2594_v14 }
 0x932   : > { %4864 = vmatpush3.bf16.xpose.msra.mxu0 %v3246_v32 }
 0x933   : > { %4974 = vmatprep.subr.msk.bf16.mxu0 %vm798_vm1, %v3223_v26  ;;  %4800 = vmatmul.mubr.msk.bf16.gmra.mxu1 %vm888_vm2, %v2600_v29 }
 0x93a   : > { %4866 = vmatpush3.bf16.xpose.msra.mxu0 %v3243_v49 }
 0x941   : > { %4868 = vmatmul.mubr.msk.bf16.vlgmr.msra.gmra.mxu0 %vm798_vm1, %v3217_v15 }
 0x942   : > { %4871 = vmatprep.mubr.msk.bf16.mxu0 %vm798_vm1, %v3219_v9 }
 0x949   : > { %4872 = vmatmul.mubr.msk.bf16.gmra.mxu0 %vm798_vm1, %v3221_v28 }
 0x968   : > { %v2908_v51 = vpop.xlane.xlu0 %2907 }
 0x969   : > { %v2930_v47 = vsub.f32 %v6809_v54, %v2908_v51 }
 0x96b   : > { %v2938_v39 = vmul.f32 1.442695, %v2930_v47 }
 0x96c   : > { %v2911_v42 = vpop.xlane.xlu1 %2910  ;;  %v2914_v36 = vpop.xlane.xlu0 %2913 }
 0x96d   : > { %v2932_v21 = vsub.f32 %v6807_v40, %v2914_v36  ;;  %v2931_v1 = vsub.f32 %v6816_v31, %v2911_v42 }
 0x96f   : > { %v2942_v12 = vmul.f32 1.442695, %v2932_v21  ;;  %v2940_v6 = vmul.f32 1.442695, %v2931_v1 }
 0x970   : > { %v2920_v19 = vpop.xlane.xlu1 %2919  ;;  %v2917_v58 = vpop.xlane.xlu0 %2916 }
 0x971   : > { %v2933_v7 = vsub.f32 %v6814_v11, %v2917_v58  ;;  %5299 = vpow2.f32 %v2942_v12  ;;  %v2934_v62 = vsub.f32 %v6824_v13, %v2920_v19 }
 0x972   : > { %5301 = vpow2.f32 %v2938_v39 }
 0x973   : > { %v2944_v20 = vmul.f32 1.442695, %v2933_v7  ;;  %v2946_v10 = vmul.f32 1.442695, %v2934_v62 }
 0x974   : > { %v2926_v4 = vpop.xlane.xlu1 %2925  ;;  %v2923_v54 = vpop.xlane.xlu0 %2922 }
 0x975   : > { %v2936_v27 = vsub.f32 %v6822_v23, %v2926_v4  ;;  %5303 = vpow2.f32 %v2944_v20  ;;  %v2935_v31 = vsub.f32 %v6832_v57, %v2923_v54 }
 0x976   : > { %5305 = vpow2.f32 %v2940_v6 }
 0x977   : > { %v2950_v40 = vmul.f32 1.442695, %v2936_v27  ;;  %v2948_v13 = vmul.f32 1.442695, %v2935_v31 }
 0x978   : > { %v6873_v18 = vpop.permute.xlu1 %3008  ;;  %v2929_v37 = vpop.xlane.xlu0 %2928 }
 0x979   : > { %5307 = vpow2.f32 %v2950_v40  ;;  %v2937_v11 = vsub.f32 %v6830_v41, %v2929_v37  ;;  %4831 = vmatprep.subr.bf16.mxu1 %v6873_v18 }
 0x97a   : > { %5309 = vpow2.f32 %v2946_v10 }
 0x97b   : > { %v2952_v14 = vmul.f32 1.442695, %v2937_v11 }
 0x97d   : > { %5311 = vpow2.f32 %v2952_v14 }
 0x97e   : > { %v6877_v16 = vpop.eup %5299  ;;  %5313 = vpow2.f32 %v2948_v13 }
 0x97f   : > { %v2960_v23 = vsel %vm888_vm2, %v6877_v16, 0.0  ;;  %v6881_v32 = vpop.eup %5301 }
 0x980   : > { %2961 = vadd.xlane.f32.xlu1 %v2960_v23  ;;  %v2954_v41 = vsel %vm888_vm2, %v6881_v32, 0.0 }
 0x982   : > { %v6883_v57 = vpop.eup %5303 }
 0x983   : > { %v2963_v29 = vsel %vm888_vm2, %v6883_v57, 0.0  ;;  %v6889_v26 = vpop.eup %5305 }
 0x984   : > { %2955 = vadd.xlane.f32.xlu1 %v2954_v41  ;;  %2964 = vadd.xlane.f32.xlu0 %v2963_v29  ;;  %v2957_v9 = vsel %vm888_vm2, %v6889_v26, 0.0 }
 0x986   : > { %v6891_v49 = vpop.eup %5307 }
 0x987   : > { %v2972_v15 = vsel %vm888_vm2, %v6891_v49, 0.0  ;;  %v6897_v28 = vpop.eup %5309 }
 0x988   : > { %2973 = vadd.xlane.f32.xlu1 %v2972_v15  ;;  %2958 = vadd.xlane.f32.xlu0 %v2957_v9  ;;  %v2966_v42 = vsel %vm888_vm2, %v6897_v28, 0.0 }
 0x98a   : > { %v6899_v51 = vpop.eup %5311 }
 0x98b   : > { %v2975_v47 = vsel %vm888_vm2, %v6899_v51, 0.0  ;;  %v6905_v36 = vpop.eup %5313 }
 0x98c   : > { %2967 = vadd.xlane.f32.xlu1 %v2966_v42  ;;  %2976 = vadd.xlane.f32.xlu0 %v2975_v47  ;;  %v2969_v21 = vsel %vm888_vm2, %v6905_v36, 0.0 }
 0x990   : > { %2970 = vadd.xlane.f32.xlu0 %v2969_v21 }
 0x991   : > { %v4765_v12 = vpop.f32.mrf.mxu1 }
 0x992   : > { %v6910_v39 = vadd.f32 %v4765_v12, %v6729_v25 }
 0x993   : > { %v2365_v1 = vpop.f32.mrf.mxu1 }
 0x994   : > { %v6913_v19 = vadd.f32 %v2365_v1, %v6733_v0 }
 0x995   : > { %v4766_v58 = vpop.f32.mrf.mxu1 }
 0x996   : > { %v6916_v7 = vadd.f32 %v4766_v58, %v6737_v2 }
 0x997   : > { %v2368_v20 = vpop.f32.mrf.mxu1 }
 0x998   : > { %v6919_v6 = vadd.f32 %v2368_v20, %v6741_v17 }
 0x999   : > { %v4769_v62 = vpop.f32.mrf.mxu1 }
 0x99a   : > { %v6922_v4 = vadd.f32 %v4769_v62, %v6745_v5  ;;  %v2679_v5 = vstv %s4323_s17 }
 0x99b   : > { %v2381_v54 = vpop.f32.mrf.mxu1 }
 0x99c   : > { %v6925_v25 = vadd.f32 %v2381_v54, %v6750_v56 }
 0x99d   : > { %v4770_v27 = vpop.f32.mrf.mxu1  ;;  %3004 = vrot.lane.b32.xlu1 %v7412_v34, %s5710_s11 }
 0x99e   : > { %v6928_v0 = vadd.f32 %v4770_v27, %v6754_v22 }
 0x99f   : > { %v6944_v2 = vpop.f32.mrf.mxu1 }
 0x9a1   : > { %3002 = vrot.lane.b32.xlu1 %v7413_v30, %s5710_s11 }
 0x9a5   : > { %3635 = vrot.lane.b32.xlu1 %v6040_v50, %s5718_s28 }
 0x9a6   : > { %3006 = vrot.lane.b32.xlu0 %v7411_v8, %s5710_s11  ;;  %s4338_s11 = sld [smem:[#allocation15 + $0x5]] }
 0x9a9   : > { %3631 = vrot.lane.b32.xlu1 %v6028_v35, %s5718_s28 }
 0x9aa   : > { %3637 = vrot.lane.b32.xlu0 %v6036_v46, %s5718_s28 }
 0x9ad   : > { %3625 = vrot.lane.b32.xlu1 %v6032_v43, %s5718_s28 }
 0x9ae   : > { %3633 = vrot.lane.b32.xlu0 %v6024_v24, %s5718_s28 }
 0x9b1   : > { %3629 = vrot.lane.b32.xlu1 %v6052_v55, %s5718_s28 }
 0x9b2   : > { %3623 = vrot.lane.b32.xlu0 %v6034_v44, %s5718_s28 }
 0x9b6   : > { %3627 = vrot.lane.b32.xlu0 %v6062_v61, %s5718_s28  ;;  %s5719_s28 = smov [#allocation16]  }
 0x9b7   : > { %s5618_s17 = sshll.u32 %s5719_s28, 4  ;;  %s5619_s17 = int_to_ptr.vmem [resolvable:$false] %s5618_s17 }
 0x9eb   : > { %v4797_v50 = vpop.f32.mrf.mxu1 }
 0x9ec   : > { %v2682_v46 = vmul.f32 %v4797_v50, %v2679_v5 }
 0x9ed   : > { %v2647_v17 = vpop.f32.mrf.mxu1 }
 0x9ee   : > { %v2680_v35 = vmul.f32 %v2679_v5, %v2647_v17  ;;  %v2690_v61 = vadd.f32 %v6778_v38, %v2682_v46 }
 0x9ef   : > { %v4798_v56 = vpop.f32.mrf.mxu1 }
 0x9f0   : > { %v2683_v22 = vmul.f32 %v4798_v56, %v2679_v5  ;;  %v2688_v55 = vadd.f32 %v6770_v52, %v2680_v35 }
 0x9f1   : > { %v2650_v40 = vpop.f32.mrf.mxu1 }
 0x9f2   : > { %v2681_v43 = vmul.f32 %v2679_v5, %v2650_v40  ;;  %v2691_v24 = vadd.f32 %v6766_v3, %v2683_v22 }
 0x9f3   : > { %v4801_v10 = vpop.f32.mrf.mxu1 }
 0x9f4   : > { %v2689_v44 = vadd.f32 %v6774_v60, %v2681_v43  ;;  %v2697_v11 = vpack.c.bf16 %v2691_v24, %v2690_v61  ;;  %v2686_v41 = vmul.f32 %v4801_v10, %v2679_v5 }
 0x9f5   : > { %v2663_v31 = vpop.f32.mrf.mxu1 }
 0x9f6   : > { %v2696_v37 = vpack.c.bf16 %v2689_v44, %v2688_v55  ;;  %v2684_v13 = vmul.f32 %v2679_v5, %v2663_v31  ;;  %v2694_v21 = vadd.f32 %v6798_v53, %v2686_v41 }
 0x9f7   : > { %v4802_v14 = vpop.f32.mrf.mxu1 }
 0x9f8   : > { %v2687_v23 = vmul.f32 %v4802_v14, %v2679_v5  ;;  %4807 = vmatprep.mubr.msk.bf16.mxu1 %vm507_vm0, %v2696_v37  ;;  %v2692_v47 = vadd.f32 %v6790_v45, %v2684_v13 }
 0x9f9   : > { %v2666_v29 = vpop.f32.mrf.mxu1  ;;  %4808 = vmatmul.mubr.msk.bf16.vlgmr.msra.gmra.mxu1 %vm507_vm0, %v2697_v11 }
 0x9fa   : > { %v2685_v15 = vmul.f32 %v2679_v5, %v2666_v29  ;;  %4832 = vmatpush3.bf16.msra.mxu1 %v6873_v18  ;;  %v2695_v9 = vadd.f32 %v6785_v48, %v2687_v23 }
 0x9fc   : > { %v2693_v42 = vadd.f32 %v6794_v59, %v2685_v15  ;;  %v2699_v1 = vpack.c.bf16 %v2695_v9, %v2694_v21 }
 0x9fe   : > { %v2698_v12 = vpack.c.bf16 %v2693_v42, %v2692_v47 }
 0xa00   : > { %4811 = vmatprep.mubr.msk.bf16.mxu1 %vm507_vm0, %v2698_v12 }
 0xa01   : > { %v6958_v58 = vpop.f32.mrf.mxu0  ;;  %4812 = vmatmul.mubr.msk.bf16.gmra.mxu1 %vm507_vm0, %v2699_v1 }
 0xa02   : > { %v3325_v50 = vsel %vm888_vm2, %v6958_v58, -inf }
 0xa03   : > { %v6961_v20 = vpop.f32.mrf.mxu0 }
 0xa04   : > { %v3319_v18 = vsel %vm888_vm2, %v6961_v20, -inf }
 0xa05   : > { %v6965_v62 = vpop.f32.mrf.mxu0  ;;  %3320 = vmax.xlane.f32.xlu0 %v3319_v18 }
 0xa06   : > { %v3328_v22 = vsel %vm888_vm2, %v6965_v62, -inf }
 0xa07   : > { %v6967_v54 = vpop.f32.mrf.mxu0 }
 0xa08   : > { %v3322_v27 = vsel %vm888_vm2, %v6967_v54, -inf }
 0xa09   : > { %v6973_v17 = vpop.f32.mrf.mxu0  ;;  %3323 = vmax.xlane.f32.xlu1 %v3322_v27  ;;  %3326 = vmax.xlane.f32.xlu0 %v3325_v50  ;;  %v2962_v5 = vpop.xlane.xlu1 %2961 }
 0xa0a   : > { %v3337_v10 = vsel %vm888_vm2, %v6973_v17, -inf }
 0xa0b   : > { %v6975_v56 = vpop.f32.mrf.mxu0 }
 0xa0c   : > { %v3331_v35 = vsel %vm888_vm2, %v6975_v56, -inf }
 0xa0d   : > { %v6981_v46 = vpop.f32.mrf.mxu0  ;;  %3332 = vmax.xlane.f32.xlu1 %v3331_v35  ;;  %3329 = vmax.xlane.f32.xlu0 %v3328_v22  ;;  %v2956_v40 = vpop.xlane.xlu1 %2955 }
 0xa0e   : > { %v2965_v43 = vpop.xlane.xlu0 %2964  ;;  %5315 = vrcp.f32 %v2956_v40  ;;  %v3340_v31 = vsel %vm888_vm2, %v6981_v46, -inf }
 0xa0f   : > { %v6983_v24 = vpop.f32.mrf.mxu0 }
 0xa10   : > { %v3334_v55 = vsel %vm888_vm2, %v6983_v24, -inf }
 0xa11   : > { %3338 = vmax.xlane.f32.xlu1 %v3337_v10  ;;  %3335 = vmax.xlane.f32.xlu0 %v3334_v55  ;;  %v2974_v44 = vpop.xlane.xlu1 %2973 }
 0xa12   : > { %v2959_v61 = vpop.xlane.xlu0 %2958 }
 0xa13   : > { %5317 = vrcp.f32 %v2959_v61 }
 0xa14   : > { %5319 = vrcp.f32 %v2965_v43 }
 0xa15   : > { %3341 = vmax.xlane.f32.xlu0 %v3340_v31  ;;  %v2968_v37 = vpop.xlane.xlu1 %2967  ;;  %5321 = vrcp.f32 %v2962_v5  ;;  %v5133_v5 = vld [vmem:[#allocation9 + $0x58] sm:$0xff]  }
 0xa16   : > { %v2977_v11 = vpop.xlane.xlu0 %2976  ;;  %5323 = vrcp.f32 %v2968_v37 }
 0xa19   : > { %v3005_v14 = vpop.permute.xlu1 %3004 }
 0xa1a   : > { %v2971_v13 = vpop.xlane.xlu0 %2970 }
 0xa1b   : > { %5325 = vrcp.f32 %v2971_v13  ;;  %v5316_v29 = vpop.eup %5315 }
 0xa1c   : > { %5327 = vrcp.f32 %v2977_v11  ;;  %v2979_v42 = vmul.f32 %v5316_v29, %v6881_v32 }
 0xa1d   : > { %v3003_v23 = vpop.permute.xlu1 %3002  ;;  %5329 = vrcp.f32 %v2974_v44  ;;  %v5134_v44 = vld [vmem:[#allocation9 + $0x50] sm:$0xff]  }
 0xa1e   : > { %v3007_v41 = vpop.permute.xlu0 %3006 }
 0xa1f   : > { %4833 = vmatprep.subr.bf16.mxu1 %v3007_v41 }
 0xa20   : > { %4834 = vmatpush3.bf16.msra.mxu1 %v3007_v41  ;;  %v5318_v15 = vpop.eup %5317 }
 0xa21   : > { %4835 = vmatprep.subr.bf16.mxu1 %v3005_v14  ;;  %v5320_v9 = vpop.eup %5319  ;;  %v2981_v21 = vmul.f32 %v5318_v15, %v6889_v26  ;;  %v3636_v18 = vpop.permute.xlu1 %3635 }
 0xa22   : > { %3417 = vrot.lane.b32.xlu1 %v6674_v63, %s5713_s24  ;;  %v3638_v47 = vpop.permute.xlu0 %3637  ;;  %v5322_v1 = vpop.eup %5321  ;;  %v2985_v50 = vmul.f32 %v5320_v9, %v6883_v57  ;;  %v3658_v61 = vsel %vm798_vm1, %v3636_v18, 0 }
 0xa23   : > { %v3661_v12 = vsel %vm798_vm1, %v3638_v47, 0  ;;  %4975 = vmatprep.subr.msk.bf16.mxu0 %vm798_vm1, %v3638_v47  ;;  %v2994_v27 = vpack.c.bf16 %v2981_v21, %v2979_v42  ;;  %v5324_v35 = vpop.eup %5323  ;;  %v2983_v26 = vmul.f32 %v5322_v1, %v6877_v16 }
 0xa24   : > { %4836 = vmatpush3.bf16.msra.mxu1 %v3005_v14  ;;  %4904 = vmatpush3.bf16.xpose.msra.mxu0 %v3661_v12  ;;  %v2987_v43 = vmul.f32 %v5324_v35, %v6897_v28 }
 0xa25   : > { %4837 = vmatprep.subr.bf16.mxu1 %v3003_v23  ;;  %4976 = vmatprep.subr.msk.bf16.mxu0 %vm798_vm1, %v3636_v18  ;;  %v2995_v40 = vpack.c.bf16 %v2985_v50, %v2983_v26  ;;  %v3632_v14 = vpop.permute.xlu1 %3631 }
 0xa26   : > { %4839 = vmatprep.mubr.msk.bf16.mxu1 %vm888_vm2, %v2994_v27  ;;  %v3634_v32 = vpop.permute.xlu0 %3633  ;;  %v3652_v13 = vsel %vm798_vm1, %v3632_v14, 0 }
 0xa27   : > { %v3655_v11 = vsel %vm798_vm1, %v3634_v32, 0 }
 0xa28   : > { %v5326_v22 = vpop.eup %5325  ;;  %4838 = vmatpush3.bf16.msra.mxu1 %v3003_v23 }
 0xa29   : > { %v2989_v10 = vmul.f32 %v5326_v22, %v6905_v36  ;;  %4847 = vmatprep.subr.bf16.mxu1 %v5133_v5  ;;  %v5328_v55 = vpop.eup %5327  ;;  %v3626_v23 = vpop.permute.xlu1 %3625 }
 0xa2a   : > { %v3624_v57 = vpop.permute.xlu0 %3623  ;;  %v5330_v37 = vpop.eup %5329  ;;  %v2993_v16 = vmul.f32 %v5328_v55, %v6899_v51 }
 0xa2b   : > { %4840 = vmatmul.mubr.msk.bf16.vlgmr.msra.gmra.mxu1 %vm888_vm2, %v2995_v40  ;;  %4911 = vmatprep.mubr.msk.bf16.mxu0 %vm798_vm1, %v3624_v57  ;;  %v2996_v31 = vpack.c.bf16 %v2989_v10, %v2987_v43  ;;  %v2991_v28 = vmul.f32 %v5330_v37, %v6891_v49 }
 0xa2c   : > { %4906 = vmatpush3.bf16.xpose.msra.mxu0 %v3658_v61  ;;  %4848 = vmatpush3.bf16.msra.mxu1 %v5133_v5 }
 0xa2d   : > { %4843 = vmatprep.mubr.msk.bf16.mxu1 %vm888_vm2, %v2996_v31  ;;  %4977 = vmatprep.subr.msk.bf16.mxu0 %vm798_vm1, %v3634_v32  ;;  %v2997_v36 = vpack.c.bf16 %v2993_v16, %v2991_v28  ;;  %v3630_v49 = vpop.permute.xlu1 %3629 }
 0xa2e   : > { %4849 = vmatprep.subr.bf16.mxu1 %v5134_v44  ;;  %v3628_v41 = vpop.permute.xlu0 %3627 }
 0xa30   : > { %4850 = vmatpush3.bf16.msra.mxu1 %v5134_v44 }
 0xa33   : > { %4844 = vmatmul.mubr.msk.bf16.gmra.mxu1 %vm888_vm2, %v2997_v36 }
 0xa34   : > { %4908 = vmatpush3.bf16.xpose.msra.mxu0 %v3655_v11 }
 0xa35   : > { %4978 = vmatprep.subr.msk.bf16.mxu0 %vm798_vm1, %v3632_v14 }
 0xa3c   : > { %4910 = vmatpush3.bf16.xpose.msra.mxu0 %v3652_v13 }
 0xa43   : > { %4912 = vmatmul.mubr.msk.bf16.vlgmr.msra.gmra.mxu0 %vm798_vm1, %v3626_v23 }
 0xa44   : > { %4915 = vmatprep.mubr.msk.bf16.mxu0 %vm798_vm1, %v3628_v41 }
 0xa4b   : > { %4916 = vmatmul.mubr.msk.bf16.gmra.mxu0 %vm798_vm1, %v3630_v49 }
 0xa8e   : > { %v3321_v51 = vpop.xlane.xlu0 %3320 }
 0xa8f   : > { %v3343_v29 = vsub.f32 %v6961_v20, %v3321_v51 }
 0xa91   : > { %v3351_v21 = vmul.f32 1.442695, %v3343_v29 }
 0xa92   : > { %v3324_v15 = vpop.xlane.xlu1 %3323  ;;  %v3327_v9 = vpop.xlane.xlu0 %3326 }
 0xa93   : > { %v3345_v47 = vsub.f32 %v6958_v58, %v3327_v9  ;;  %v3344_v12 = vsub.f32 %v6967_v54, %v3324_v15 }
 0xa95   : > { %v3355_v42 = vmul.f32 1.442695, %v3345_v47  ;;  %v3353_v5 = vmul.f32 1.442695, %v3344_v12 }
 0xa96   : > { %v3333_v1 = vpop.xlane.xlu1 %3332  ;;  %v3330_v18 = vpop.xlane.xlu0 %3329 }
 0xa97   : > { %v3346_v27 = vsub.f32 %v6965_v62, %v3330_v18  ;;  %5331 = vpow2.f32 %v3355_v42  ;;  %v3347_v35 = vsub.f32 %v6975_v56, %v3333_v1 }
 0xa98   : > { %5333 = vpow2.f32 %v3351_v21 }
 0xa99   : > { %v3357_v50 = vmul.f32 1.442695, %v3346_v27  ;;  %v3359_v22 = vmul.f32 1.442695, %v3347_v35 }
 0xa9a   : > { %v3339_v32 = vpop.xlane.xlu1 %3338  ;;  %v3336_v20 = vpop.xlane.xlu0 %3335 }
 0xa9b   : > { %v3349_v26 = vsub.f32 %v6973_v17, %v3339_v32  ;;  %5335 = vpow2.f32 %v3357_v50  ;;  %v3348_v54 = vsub.f32 %v6983_v24, %v3336_v20  ;;  %v3092_v50 = vstv %s4338_s11  ;;  %s5620_s11 = scalar_lea.vmem %s5619_s17, 2048 }
 0xa9c   : > { %5337 = vpow2.f32 %v3353_v5 }
 0xa9d   : > { %v3363_v58 = vmul.f32 1.442695, %v3349_v26  ;;  %v3361_v56 = vmul.f32 1.442695, %v3348_v54 }
 0xa9e   : > { %v7024_v40 = vpop.permute.xlu1 %3417  ;;  %v3342_v43 = vpop.xlane.xlu0 %3341 }
 0xa9f   : > { %5339 = vpow2.f32 %v3363_v58  ;;  %v3350_v62 = vsub.f32 %v6981_v46, %v3342_v43  ;;  %4875 = vmatprep.subr.bf16.mxu1 %v7024_v40 }
 0xaa0   : > { %5341 = vpow2.f32 %v3359_v22 }
 0xaa1   : > { %v3365_v10 = vmul.f32 1.442695, %v3350_v62 }
 0xaa3   : > { %5343 = vpow2.f32 %v3365_v10 }
 0xaa4   : > { %v7028_v55 = vpop.eup %5331  ;;  %5345 = vpow2.f32 %v3361_v56 }
 0xaa5   : > { %v3373_v17 = vsel %vm888_vm2, %v7028_v55, 0.0  ;;  %v7032_v57 = vpop.eup %5333 }
 0xaa6   : > { %3374 = vadd.xlane.f32.xlu1 %v3373_v17  ;;  %v3367_v46 = vsel %vm888_vm2, %v7032_v57, 0.0 }
 0xaa8   : > { %v7034_v24 = vpop.eup %5335 }
 0xaa9   : > { %v3376_v44 = vsel %vm888_vm2, %v7034_v24, 0.0  ;;  %v7040_v61 = vpop.eup %5337 }
 0xaaa   : > { %3368 = vadd.xlane.f32.xlu1 %v3367_v46  ;;  %3377 = vadd.xlane.f32.xlu0 %v3376_v44  ;;  %v3370_v16 = vsel %vm888_vm2, %v7040_v61, 0.0 }
 0xaac   : > { %v7042_v31 = vpop.eup %5339 }
 0xaad   : > { %v3385_v37 = vsel %vm888_vm2, %v7042_v31, 0.0  ;;  %v7048_v28 = vpop.eup %5341 }
 0xaae   : > { %3386 = vadd.xlane.f32.xlu1 %v3385_v37  ;;  %3371 = vadd.xlane.f32.xlu0 %v3370_v16  ;;  %v3379_v14 = vsel %vm888_vm2, %v7048_v28, 0.0 }
 0xab0   : > { %v7050_v36 = vpop.eup %5343 }
 0xab1   : > { %v3388_v11 = vsel %vm888_vm2, %v7050_v36, 0.0  ;;  %v7056_v13 = vpop.eup %5345 }
 0xab2   : > { %3380 = vadd.xlane.f32.xlu1 %v3379_v14  ;;  %3389 = vadd.xlane.f32.xlu0 %v3388_v11  ;;  %v3382_v23 = vsel %vm888_vm2, %v7056_v13, 0.0 }
 0xab6   : > { %3383 = vadd.xlane.f32.xlu0 %v3382_v23 }
 0xab9   : > { %v4809_v41 = vpop.f32.mrf.mxu1 }
 0xaba   : > { %v7061_v49 = vadd.f32 %v4809_v41, %v6910_v39 }
 0xabb   : > { %v2762_v51 = vpop.f32.mrf.mxu1 }
 0xabc   : > { %v7064_v29 = vadd.f32 %v2762_v51, %v6913_v19 }
 0xabd   : > { %v4810_v15 = vpop.f32.mrf.mxu1 }
 0xabe   : > { %v7067_v9 = vadd.f32 %v4810_v15, %v6916_v7  ;;  %v2401_v7 = vadd.f32 %v6944_v2, %v6757_v33 }
 0xabf   : > { %v2765_v47 = vpop.f32.mrf.mxu1 }
 0xac0   : > { %v7070_v42 = vadd.f32 %v2765_v47, %v6919_v6 }
 0xac1   : > { %v4813_v21 = vpop.f32.mrf.mxu1 }
 0xac2   : > { %v7073_v12 = vadd.f32 %v4813_v21, %v6922_v4 }
 0xac3   : > { %v2778_v1 = vpop.f32.mrf.mxu1  ;;  %3413 = vrot.lane.b32.xlu1 %v7412_v34, %s5713_s24 }
 0xac4   : > { %v7078_v39 = vadd.f32 %v2778_v1, %v6925_v25 }
 0xac5   : > { %v4814_v19 = vpop.f32.mrf.mxu1 }
 0xac6   : > { %v7083_v18 = vadd.f32 %v4814_v19, %v6928_v0 }
 0xac7   : > { %v2781_v6 = vpop.f32.mrf.mxu1  ;;  %3411 = vrot.lane.b32.xlu1 %v7413_v30, %s5713_s24 }
 0xac8   : > { %v7087_v4 = vadd.f32 %v2781_v6, %v2401_v7 }
 0xacc   : > { %3415 = vrot.lane.b32.xlu0 %v7411_v8, %s5713_s24 }
 0xaeb   : > { %v4841_v27 = vpop.f32.mrf.mxu1 }
 0xaec   : > { %v3095_v33 = vmul.f32 %v4841_v27, %v3092_v50 }
 0xaed   : > { %v3060_v25 = vpop.f32.mrf.mxu1 }
 0xaee   : > { %v3093_v35 = vmul.f32 %v3092_v50, %v3060_v25  ;;  %v3103_v54 = vadd.f32 %v6778_v38, %v3095_v33 }
 0xaef   : > { %v4842_v5 = vpop.f32.mrf.mxu1 }
 0xaf0   : > { %v3096_v32 = vmul.f32 %v4842_v5, %v3092_v50  ;;  %v3101_v58 = vadd.f32 %v6770_v52, %v3093_v35 }
 0xaf1   : > { %v3063_v2 = vpop.f32.mrf.mxu1 }
 0xaf2   : > { %v3094_v0 = vmul.f32 %v3092_v50, %v3063_v2  ;;  %v3104_v20 = vadd.f32 %v6766_v3, %v3096_v32 }
 0xaf3   : > { %v4845_v26 = vpop.f32.mrf.mxu1 }
 0xaf4   : > { %v3102_v22 = vadd.f32 %v6774_v60, %v3094_v0  ;;  %v3110_v10 = vpack.c.bf16 %v3104_v20, %v3103_v54  ;;  %v3099_v44 = vmul.f32 %v4845_v26, %v3092_v50 }
 0xaf5   : > { %v3076_v43 = vpop.f32.mrf.mxu1 }
 0xaf6   : > { %v3109_v62 = vpack.c.bf16 %v3102_v22, %v3101_v58  ;;  %v3097_v17 = vmul.f32 %v3092_v50, %v3076_v43  ;;  %v3107_v16 = vadd.f32 %v6798_v53, %v3099_v44 }
 0xaf7   : > { %v4846_v56 = vpop.f32.mrf.mxu1 }
 0xaf8   : > { %v3100_v46 = vmul.f32 %v4846_v56, %v3092_v50  ;;  %4851 = vmatprep.mubr.msk.bf16.mxu1 %vm507_vm0, %v3109_v62  ;;  %v3105_v60 = vadd.f32 %v6790_v45, %v3097_v17 }
 0xaf9   : > { %v3079_v37 = vpop.f32.mrf.mxu1  ;;  %4852 = vmatmul.mubr.msk.bf16.vlgmr.msra.gmra.mxu1 %vm507_vm0, %v3110_v10 }
 0xafa   : > { %v3098_v3 = vmul.f32 %v3092_v50, %v3079_v37  ;;  %4876 = vmatpush3.bf16.msra.mxu1 %v7024_v40  ;;  %v3108_v52 = vadd.f32 %v6785_v48, %v3100_v46  ;;  %v5135_v46 = vld [vmem:[#allocation9 + $0x68] sm:$0xff]  }
 0xafc   : > { %v3106_v38 = vadd.f32 %v6794_v59, %v3098_v3  ;;  %v3112_v14 = vpack.c.bf16 %v3108_v52, %v3107_v16 }
 0xafe   : > { %v3111_v11 = vpack.c.bf16 %v3106_v38, %v3105_v60  ;;  %v5136_v60 = vld [vmem:[#allocation9 + $0x60] sm:$0xff]  }
 0xb00   : > { %4855 = vmatprep.mubr.msk.bf16.mxu1 %vm507_vm0, %v3111_v11 }
 0xb01   : > { %4856 = vmatmul.mubr.msk.bf16.gmra.mxu1 %vm507_vm0, %v3112_v14 }
 0xb03   : > { %v7104_v23 = vpop.f32.mrf.mxu0 }
 0xb04   : > { %v3734_v53 = vsel %vm888_vm2, %v7104_v23, -inf }
 0xb05   : > { %v7106_v41 = vpop.f32.mrf.mxu0 }
 0xb06   : > { %v3728_v40 = vsel %vm888_vm2, %v7106_v41, -inf }
 0xb07   : > { %v7110_v48 = vpop.f32.mrf.mxu0  ;;  %3729 = vmax.xlane.f32.xlu0 %v3728_v40 }
 0xb08   : > { %v3737_v21 = vsel %vm888_vm2, %v7110_v48, -inf }
 0xb09   : > { %v7112_v45 = vpop.f32.mrf.mxu0 }
 0xb0a   : > { %v3731_v59 = vsel %vm888_vm2, %v7112_v45, -inf }
 0xb0b   : > { %v7118_v51 = vpop.f32.mrf.mxu0  ;;  %3732 = vmax.xlane.f32.xlu1 %v3731_v59  ;;  %3735 = vmax.xlane.f32.xlu0 %v3734_v53 }
 0xb0c   : > { %v3746_v6 = vsel %vm888_vm2, %v7118_v51, -inf }
 0xb0d   : > { %v7120_v15 = vpop.f32.mrf.mxu0 }
 0xb0e   : > { %v3740_v47 = vsel %vm888_vm2, %v7120_v15, -inf }
 0xb0f   : > { %v7126_v1 = vpop.f32.mrf.mxu0  ;;  %3741 = vmax.xlane.f32.xlu1 %v3740_v47  ;;  %3738 = vmax.xlane.f32.xlu0 %v3737_v21 }
 0xb10   : > { %v3749_v27 = vsel %vm888_vm2, %v7126_v1, -inf }
 0xb11   : > { %v7128_v19 = vpop.f32.mrf.mxu0 }
 0xb12   : > { %v3743_v7 = vsel %vm888_vm2, %v7128_v19, -inf }
 0xb13   : > { %3747 = vmax.xlane.f32.xlu1 %v3746_v6  ;;  %3744 = vmax.xlane.f32.xlu0 %v3743_v7 }
 0xb17   : > { %3750 = vmax.xlane.f32.xlu0 %v3749_v27 }
 0xb24   : > { %3826 = vrot.lane.b32.xlu1 %v6674_v63, %s5715_s2 }
 0xb2f   : > { %v3375_v25 = vpop.xlane.xlu1 %3374 }
 0xb33   : > { %v3369_v50 = vpop.xlane.xlu1 %3368  ;;  %v3378_v5 = vpop.xlane.xlu0 %3377 }
 0xb34   : > { %5347 = vrcp.f32 %v3369_v50 }
 0xb37   : > { %v3387_v35 = vpop.xlane.xlu1 %3386  ;;  %v3372_v32 = vpop.xlane.xlu0 %3371 }
 0xb38   : > { %5349 = vrcp.f32 %v3372_v32 }
 0xb39   : > { %5351 = vrcp.f32 %v3378_v5 }
 0xb3a   : > { %5353 = vrcp.f32 %v3375_v25 }
 0xb3b   : > { %v3381_v33 = vpop.xlane.xlu1 %3380  ;;  %v3390_v2 = vpop.xlane.xlu0 %3389 }
 0xb3c   : > { %5355 = vrcp.f32 %v3381_v33 }
 0xb3f   : > { %v3384_v0 = vpop.xlane.xlu0 %3383  ;;  %v3414_v20 = vpop.permute.xlu1 %3413 }
 0xb40   : > { %5357 = vrcp.f32 %v3384_v0 }
 0xb41   : > { %5359 = vrcp.f32 %v3390_v2  ;;  %v5348_v58 = vpop.eup %5347 }
 0xb42   : > { %5361 = vrcp.f32 %v3387_v35  ;;  %v3392_v54 = vmul.f32 %v5348_v58, %v7032_v57 }
 0xb43   : > { %v3416_v26 = vpop.permute.xlu0 %3415  ;;  %v3412_v10 = vpop.permute.xlu1 %3411 }
 0xb44   : > { %4877 = vmatprep.subr.bf16.mxu1 %v3416_v26 }
 0xb45   : > { %4878 = vmatpush3.bf16.msra.mxu1 %v3416_v26  ;;  %v5350_v63 = vpop.eup %5349 }
 0xb46   : > { %4879 = vmatprep.subr.bf16.mxu1 %v3414_v20  ;;  %v5352_v22 = vpop.eup %5351  ;;  %v3394_v43 = vmul.f32 %v5350_v63, %v7040_v61 }
 0xb47   : > { %v5354_v62 = vpop.eup %5353  ;;  %v3398_v17 = vmul.f32 %v5352_v22, %v7034_v24 }
 0xb48   : > { %v3407_v56 = vpack.c.bf16 %v3394_v43, %v3392_v54  ;;  %v3396_v37 = vmul.f32 %v5354_v62, %v7028_v55 }
 0xb49   : > { %4880 = vmatpush3.bf16.msra.mxu1 %v3414_v20  ;;  %v5356_v44 = vpop.eup %5355 }
 0xb4a   : > { %4881 = vmatprep.subr.bf16.mxu1 %v3412_v10  ;;  %4883 = vmatprep.mubr.msk.bf16.mxu1 %vm888_vm2, %v3407_v56  ;;  %v3408_v52 = vpack.c.bf16 %v3398_v17, %v3396_v37  ;;  %v3400_v57 = vmul.f32 %v5356_v44, %v7048_v28 }
 0xb4d   : > { %v5358_v3 = vpop.eup %5357  ;;  %4882 = vmatpush3.bf16.msra.mxu1 %v3412_v10 }
 0xb4e   : > { %v3402_v61 = vmul.f32 %v5358_v3, %v7056_v13  ;;  %4891 = vmatprep.subr.bf16.mxu1 %v5135_v46  ;;  %v5360_v38 = vpop.eup %5359 }
 0xb4f   : > { %v5362_v16 = vpop.eup %5361  ;;  %v3406_v11 = vmul.f32 %v5360_v38, %v7050_v36 }
 0xb50   : > { %4884 = vmatmul.mubr.msk.bf16.vlgmr.msra.gmra.mxu1 %vm888_vm2, %v3408_v52  ;;  %v3409_v24 = vpack.c.bf16 %v3402_v61, %v3400_v57  ;;  %v3404_v55 = vmul.f32 %v5362_v16, %v7042_v31 }
 0xb51   : > { %4892 = vmatpush3.bf16.msra.mxu1 %v5135_v46 }
 0xb52   : > { %4887 = vmatprep.mubr.msk.bf16.mxu1 %vm888_vm2, %v3409_v24  ;;  %4893 = vmatprep.subr.bf16.mxu1 %v5136_v60  ;;  %v3410_v14 = vpack.c.bf16 %v3406_v11, %v3404_v55 }
 0xb55   : > { %4894 = vmatpush3.bf16.msra.mxu1 %v5136_v60 }
 0xb58   : > { %4888 = vmatmul.mubr.msk.bf16.gmra.mxu1 %vm888_vm2, %v3410_v14 }
 0xb90   : > { %v3730_v28 = vpop.xlane.xlu0 %3729 }
 0xb91   : > { %v3752_v13 = vsub.f32 %v7106_v41, %v3730_v28 }
 0xb93   : > { %v3760_v21 = vmul.f32 1.442695, %v3752_v13 }
 0xb94   : > { %v3733_v40 = vpop.xlane.xlu1 %3732  ;;  %v3736_v59 = vpop.xlane.xlu0 %3735 }
 0xb95   : > { %v3754_v53 = vsub.f32 %v7104_v23, %v3736_v59  ;;  %v3753_v7 = vsub.f32 %v7112_v45, %v3733_v40 }
 0xb97   : > { %v3764_v47 = vmul.f32 1.442695, %v3754_v53  ;;  %v3762_v25 = vmul.f32 1.442695, %v3753_v7  ;;  %v7223_v53 = vld [vmem:[%s5964_s30 + $0x18] sm:$0xff]  ;;  %v7231_v7 = vld [vmem:[%s5964_s30 + $0x8] sm:$0xff] }
 0xb98   : > { %v3742_v6 = vpop.xlane.xlu1 %3741  ;;  %v3739_v36 = vpop.xlane.xlu0 %3738 }
 0xb99   : > { %v3755_v27 = vsub.f32 %v7110_v48, %v3739_v36  ;;  %5363 = vpow2.f32 %v3764_v47  ;;  %v3756_v50 = vsub.f32 %v7120_v15, %v3742_v6  ;;  %v7235_v36 = vld [vmem:[%s5964_s30 + $0x10] sm:$0xff] }
 0xb9a   : > { %5365 = vpow2.f32 %v3760_v21 }
 0xb9b   : > { %v3766_v31 = vmul.f32 1.442695, %v3755_v27  ;;  %v3768_v32 = vmul.f32 1.442695, %v3756_v50 }
 0xb9c   : > { %v3748_v5 = vpop.xlane.xlu1 %3747  ;;  %v3745_v41 = vpop.xlane.xlu0 %3744 }
 0xb9d   : > { %v3758_v35 = vsub.f32 %v7118_v51, %v3748_v5  ;;  %5367 = vpow2.f32 %v3766_v31  ;;  %v3757_v45 = vsub.f32 %v7128_v19, %v3745_v41 }
 0xb9e   : > { %5369 = vpow2.f32 %v3762_v25 }
 0xb9f   : > { %v3772_v23 = vmul.f32 1.442695, %v3758_v35  ;;  %v3770_v15 = vmul.f32 1.442695, %v3757_v45 }
 0xba0   : > { %v7157_v33 = vpop.permute.xlu1 %3826  ;;  %v3751_v2 = vpop.xlane.xlu0 %3750 }
 0xba1   : > { %5371 = vpow2.f32 %v3772_v23  ;;  %v3759_v48 = vsub.f32 %v7126_v1, %v3751_v2  ;;  %4919 = vmatprep.subr.bf16.mxu1 %v7157_v33  ;;  %v7242_v2 = vld [vmem:[%s5964_s30 + $0x38] sm:$0xff] }
 0xba2   : > { %5373 = vpow2.f32 %v3768_v32 }
 0xba3   : > { %v3774_v0 = vmul.f32 1.442695, %v3759_v48 }
 0xba5   : > { %5375 = vpow2.f32 %v3774_v0  ;;  %v7246_v0 = vld [vmem:[%s5964_s30 + $0x20] sm:$0xff] }
 0xba6   : > { %v7161_v20 = vpop.eup %5363  ;;  %5377 = vpow2.f32 %v3770_v15 }
 0xba7   : > { %v3782_v51 = vsel %vm888_vm2, %v7161_v20, 0.0  ;;  %v7165_v26 = vpop.eup %5365 }
 0xba8   : > { %3783 = vadd.xlane.f32.xlu1 %v3782_v51  ;;  %v3776_v1 = vsel %vm888_vm2, %v7165_v26, 0.0  ;;  %v7250_v51 = vld [vmem:[%s5964_s30 + $0x28] sm:$0xff] }
 0xbaa   : > { %v7167_v19 = vpop.eup %5367 }
 0xbab   : > { %v3785_v58 = vsel %vm888_vm2, %v7167_v19, 0.0  ;;  %v7173_v63 = vpop.eup %5369 }
 0xbac   : > { %3777 = vadd.xlane.f32.xlu1 %v3776_v1  ;;  %3786 = vadd.xlane.f32.xlu0 %v3785_v58  ;;  %v3779_v43 = vsel %vm888_vm2, %v7173_v63, 0.0  ;;  %v7254_v58 = vld [vmem:[%s5964_s30 + $0x30] sm:$0xff] }
 0xbae   : > { %v7175_v22 = vpop.eup %5371 }
 0xbaf   : > { %v3794_v54 = vsel %vm888_vm2, %v7175_v22, 0.0  ;;  %v7181_v62 = vpop.eup %5373 }
 0xbb0   : > { %3795 = vadd.xlane.f32.xlu1 %v3794_v54  ;;  %3780 = vadd.xlane.f32.xlu0 %v3779_v43  ;;  %v3788_v17 = vsel %vm888_vm2, %v7181_v62, 0.0 }
 0xbb2   : > { %v7183_v10 = vpop.eup %5375 }
 0xbb3   : > { %v3797_v56 = vsel %vm888_vm2, %v7183_v10, 0.0  ;;  %v7189_v46 = vpop.eup %5377 }
 0xbb4   : > { %3789 = vadd.xlane.f32.xlu1 %v3788_v17  ;;  %3798 = vadd.xlane.f32.xlu0 %v3797_v56  ;;  %v3791_v44 = vsel %vm888_vm2, %v7189_v46, 0.0 }
 0xbb8   : > { %3792 = vadd.xlane.f32.xlu0 %v3791_v44 }
 0xbb9   : > { %v4853_v37 = vpop.f32.mrf.mxu1 }
 0xbba   : > { %v7194_v3 = vadd.f32 %v4853_v37, %v7061_v49 }
 0xbbb   : > { %v3175_v52 = vpop.f32.mrf.mxu1 }
 0xbbc   : > { %v7197_v57 = vadd.f32 %v3175_v52, %v7064_v29 }
 0xbbd   : > { %v4854_v61 = vpop.f32.mrf.mxu1 }
 0xbbe   : > { %v7200_v60 = vadd.f32 %v4854_v61, %v7067_v9 }
 0xbbf   : > { %v3178_v38 = vpop.f32.mrf.mxu1 }
 0xbc0   : > { %v7203_v24 = vadd.f32 %v3178_v38, %v7070_v42 }
 0xbc1   : > { %v4857_v16 = vpop.f32.mrf.mxu1 }
 0xbc2   : > { %v7206_v11 = vadd.f32 %v4857_v16, %v7073_v12 }
 0xbc3   : > { %v3191_v55 = vpop.f32.mrf.mxu1 }
 0xbc4   : > { %v7209_v49 = vadd.f32 %v3191_v55, %v7078_v39  ;;  %v3501_v39 = vstv %s4353_s18 }
 0xbc5   : > { %v4858_v14 = vpop.f32.mrf.mxu1  ;;  %3822 = vrot.lane.b32.xlu1 %v7412_v34, %s5715_s2 }
 0xbc6   : > { %v7212_v29 = vadd.f32 %v4858_v14, %v7083_v18 }
 0xbc7   : > { %v7220_v9 = vpop.f32.mrf.mxu1 }
 0xbc9   : > { %3820 = vrot.lane.b32.xlu1 %v7413_v30, %s5715_s2 }
 0xbce   : > { %3824 = vrot.lane.b32.xlu0 %v7411_v8, %s5715_s2  ;;  %v7227_v8 = vld [vmem:[%s5964_s30] sm:$0xff]  ;;  %s4368_s30 = sld [smem:[#allocation15 + $0x7]]  ;;  %s4069_s2 = sshll.u32 %s470_s26, 4  ;;  %s7315_s2 = int_to_ptr.vmem [resolvable:$true] %s4069_s2 }
 0xbcf   : > { %s5614_s29 = scalar_lea.vmem %s7315_s2, 1024  ;;  %p5621_p1 = scmp.lt.s32.totalorder %s7315_s2, %s5619_s17 }
 0xbd0   : > { %p5615_p5 = scmp.ne.s32.totalorder %s7315_s2, %s5614_s29  ;;  %p5622_p0 = scmp.lt.s32.totalorder %s5620_s11, %s5614_s29 }
 0xbd2   : > { %p5616_p10 = pnand %p5615_p5, %p7414_p2  ;;  %p5623_p6 = por %p5622_p0, %p5621_p1 }
 0xbd4   : > { %p5617_p3 = pneg %p5616_p10 }
 0xbd6   : > { %p5624_p8 = pnand %p5623_p6, %p5617_p3 }
 0xc10   : > { %v4885_v42 = vpop.f32.mrf.mxu1 }
 0xc11   : > { %v3504_v40 = vmul.f32 %v4885_v42, %v3501_v39 }
 0xc12   : > { %v3469_v12 = vpop.f32.mrf.mxu1 }
 0xc13   : > { %v3502_v28 = vmul.f32 %v3501_v39, %v3469_v12  ;;  %v3512_v27 = vadd.f32 %v7235_v36, %v3504_v40 }
 0xc14   : > { %v4886_v18 = vpop.f32.mrf.mxu1 }
 0xc15   : > { %v3505_v13 = vmul.f32 %v4886_v18, %v3501_v39  ;;  %v3510_v21 = vadd.f32 %v7227_v8, %v3502_v28 }
 0xc16   : > { %v3472_v34 = vpop.f32.mrf.mxu1 }
 0xc17   : > { %v3503_v59 = vmul.f32 %v3501_v39, %v3472_v34  ;;  %v3513_v30 = vadd.f32 %v7223_v53, %v3505_v13 }
 0xc18   : > { %v4889_v47 = vpop.f32.mrf.mxu1 }
 0xc19   : > { %v3511_v6 = vadd.f32 %v7231_v7, %v3503_v59  ;;  %v3519_v50 = vpack.c.bf16 %v3513_v30, %v3512_v27  ;;  %v3508_v23 = vmul.f32 %v4889_v47, %v3501_v39 }
 0xc1a   : > { %v3485_v31 = vpop.f32.mrf.mxu1 }
 0xc1b   : > { %v3518_v25 = vpack.c.bf16 %v3511_v6, %v3510_v21  ;;  %v3506_v41 = vmul.f32 %v3501_v39, %v3485_v31  ;;  %v3516_v54 = vadd.f32 %v7254_v58, %v3508_v23 }
 0xc1c   : > { %v4890_v5 = vpop.f32.mrf.mxu1 }
 0xc1d   : > { %v3509_v35 = vmul.f32 %v4890_v5, %v3501_v39  ;;  %4895 = vmatprep.mubr.msk.bf16.mxu1 %vm507_vm0, %v3518_v25  ;;  %v3514_v15 = vadd.f32 %v7246_v0, %v3506_v41 }
 0xc1e   : > { %v3488_v32 = vpop.f32.mrf.mxu1  ;;  %4896 = vmatmul.mubr.msk.bf16.vlgmr.msra.gmra.mxu1 %vm507_vm0, %v3519_v50 }
 0xc1f   : > { %v3507_v45 = vmul.f32 %v3501_v39, %v3488_v32  ;;  %4920 = vmatpush3.bf16.msra.mxu1 %v7157_v33  ;;  %v3517_v48 = vadd.f32 %v7242_v2, %v3509_v35 }
 0xc21   : > { %v3515_v1 = vadd.f32 %v7250_v51, %v3507_v45  ;;  %v3521_v56 = vpack.c.bf16 %v3517_v48, %v3516_v54 }
 0xc23   : > { %v3520_v43 = vpack.c.bf16 %v3515_v1, %v3514_v15 }
 0xc25   : > { %4899 = vmatprep.mubr.msk.bf16.mxu1 %vm507_vm0, %v3520_v43 }
 0xc26   : > { %4900 = vmatmul.mubr.msk.bf16.gmra.mxu1 %vm507_vm0, %v3521_v56  ;;  %v3211_v56 = vadd.f32 %v7220_v9, %v7087_v4 }
 0xc31   : > { %v3784_v33 = vpop.xlane.xlu1 %3783 }
 0xc35   : > { %v3778_v17 = vpop.xlane.xlu1 %3777  ;;  %v3787_v44 = vpop.xlane.xlu0 %3786 }
 0xc36   : > { %5379 = vrcp.f32 %v3778_v17 }
 0xc39   : > { %v3796_v37 = vpop.xlane.xlu1 %3795  ;;  %v3781_v52 = vpop.xlane.xlu0 %3780 }
 0xc3a   : > { %5381 = vrcp.f32 %v3781_v52 }
 0xc3b   : > { %5383 = vrcp.f32 %v3787_v44 }
 0xc3c   : > { %5385 = vrcp.f32 %v3784_v33 }
 0xc3d   : > { %v3790_v61 = vpop.xlane.xlu1 %3789  ;;  %v3799_v38 = vpop.xlane.xlu0 %3798 }
 0xc3e   : > { %5387 = vrcp.f32 %v3790_v61 }
 0xc41   : > { %v3793_v16 = vpop.xlane.xlu0 %3792  ;;  %v3823_v55 = vpop.permute.xlu1 %3822 }
 0xc42   : > { %5389 = vrcp.f32 %v3793_v16 }
 0xc43   : > { %5391 = vrcp.f32 %v3799_v38  ;;  %v5380_v42 = vpop.eup %5379 }
 0xc44   : > { %5393 = vrcp.f32 %v3796_v37  ;;  %v3801_v18 = vmul.f32 %v5380_v42, %v7165_v26 }
 0xc45   : > { %v3825_v14 = vpop.permute.xlu0 %3824  ;;  %v3821_v40 = vpop.permute.xlu1 %3820 }
 0xc46   : > { %4921 = vmatprep.subr.bf16.mxu1 %v3825_v14 }
 0xc47   : > { %4922 = vmatpush3.bf16.msra.mxu1 %v3825_v14  ;;  %v5382_v12 = vpop.eup %5381 }
 0xc48   : > { %4923 = vmatprep.subr.bf16.mxu1 %v3823_v55  ;;  %v5384_v39 = vpop.eup %5383  ;;  %v3803_v28 = vmul.f32 %v5382_v12, %v7173_v63 }
 0xc49   : > { %v5386_v13 = vpop.eup %5385  ;;  %v3807_v59 = vmul.f32 %v5384_v39, %v7167_v19 }
 0xc4a   : > { %v3816_v34 = vpack.c.bf16 %v3803_v28, %v3801_v18  ;;  %v3805_v47 = vmul.f32 %v5386_v13, %v7161_v20  ;;  %v5137_v20 = vld [vmem:[#allocation9 + $0x78] sm:$0xff]  }
 0xc4b   : > { %4924 = vmatpush3.bf16.msra.mxu1 %v3823_v55  ;;  %v5388_v30 = vpop.eup %5387 }
 0xc4c   : > { %4925 = vmatprep.subr.bf16.mxu1 %v3821_v40  ;;  %4927 = vmatprep.mubr.msk.bf16.mxu1 %vm888_vm2, %v3816_v34  ;;  %v3817_v6 = vpack.c.bf16 %v3807_v59, %v3805_v47  ;;  %v3809_v27 = vmul.f32 %v5388_v30, %v7181_v62  ;;  %v5138_v62 = vld [vmem:[#allocation9 + $0x70] sm:$0xff]  }
 0xc4d   : > { %v4375_v47 = vld [vmem:[%s7368_s8] ss:$0 sm:$0xff] }
 0xc4f   : > { %v5390_v21 = vpop.eup %5389  ;;  %4926 = vmatpush3.bf16.msra.mxu1 %v3821_v40 }
 0xc50   : > { %v3811_v26 = vmul.f32 %v5390_v21, %v7189_v46  ;;  %v5392_v63 = vpop.eup %5391  ;;  %4935 = vmatprep.subr.bf16.mxu1 %v5137_v20 }
 0xc51   : > { %v5394_v25 = vpop.eup %5393  ;;  %v3815_v19 = vmul.f32 %v5392_v63, %v7183_v10 }
 0xc52   : > { %4928 = vmatmul.mubr.msk.bf16.vlgmr.msra.gmra.mxu1 %vm888_vm2, %v3817_v6  ;;  %v3818_v31 = vpack.c.bf16 %v3811_v26, %v3809_v27  ;;  %v3813_v50 = vmul.f32 %v5394_v25, %v7175_v22 }
 0xc53   : > { %4936 = vmatpush3.bf16.msra.mxu1 %v5137_v20 }
 0xc54   : > { %4931 = vmatprep.mubr.msk.bf16.mxu1 %vm888_vm2, %v3818_v31  ;;  %v3819_v5 = vpack.c.bf16 %v3815_v19, %v3813_v50  ;;  %4937 = vmatprep.subr.bf16.mxu1 %v5138_v62 }
 0xc57   : > { %4938 = vmatpush3.bf16.msra.mxu1 %v5138_v62 }
 0xc5a   : > { %4932 = vmatmul.mubr.msk.bf16.gmra.mxu1 %vm888_vm2, %v3819_v5 }
 0xcde   : > { %v4897_v46 = vpop.f32.mrf.mxu1 }
 0xcdf   : > { %v3617_v41 = vadd.f32 %v4897_v46, %v7194_v3 }
 0xce0   : > { %v3584_v35 = vpop.f32.mrf.mxu1 }
 0xce1   : > { %v3615_v23 = vadd.f32 %v3584_v35, %v7197_v57 }
 0xce2   : > { %v4898_v32 = vpop.f32.mrf.mxu1 }
 0xce3   : > { %v3618_v10 = vadd.f32 %v4898_v32, %v7200_v60 }
 0xce4   : > { %v3587_v45 = vpop.f32.mrf.mxu1 }
 0xce5   : > { %v3616_v22 = vadd.f32 %v3587_v45, %v7203_v24  ;;  %v3910_v24 = vstv %s4368_s30 }
 0xce6   : > { %v4901_v48 = vpop.f32.mrf.mxu1 }
 0xce7   : > { %v3621_v15 = vadd.f32 %v4901_v48, %v7206_v11 }
 0xce8   : > { %v3600_v1 = vpop.f32.mrf.mxu1 }
 0xce9   : > { %v3619_v54 = vadd.f32 %v3600_v1, %v7209_v49 }
 0xcea   : > { %v4902_v43 = vpop.f32.mrf.mxu1 }
 0xceb   : > { %v7280_v3 = vadd.f32 %v4902_v43, %v7212_v29 }
 0xcec   : > { %v3603_v57 = vpop.f32.mrf.mxu1 }
 0xced   : > { %v7282_v33 = vadd.f32 %v3603_v57, %v3211_v56 }
 0xd12   : > { %v4929_v60 = vpop.f32.mrf.mxu1 }
 0xd13   : > { %v3913_v52 = vmul.f32 %v4929_v60, %v3910_v24 }
 0xd14   : > { %v3878_v17 = vpop.f32.mrf.mxu1 }
 0xd15   : > { %v3911_v37 = vmul.f32 %v3910_v24, %v3878_v17  ;;  %v3921_v9 = vadd.f32 %v7235_v36, %v3913_v52 }
 0xd16   : > { %v4930_v44 = vpop.f32.mrf.mxu1 }
 0xd17   : > { %v3914_v11 = vmul.f32 %v4930_v44, %v3910_v24  ;;  %v3919_v4 = vadd.f32 %v7227_v8, %v3911_v37 }
 0xd18   : > { %v3881_v61 = vpop.f32.mrf.mxu1 }
 0xd19   : > { %v3912_v49 = vmul.f32 %v3910_v24, %v3881_v61  ;;  %v3922_v38 = vadd.f32 %v7223_v53, %v3914_v11 }
 0xd1a   : > { %v4933_v16 = vpop.f32.mrf.mxu1 }
 0xd1b   : > { %v3920_v29 = vadd.f32 %v7231_v7, %v3912_v49  ;;  %v3928_v42 = vpack.c.bf16 %v3922_v38, %v3921_v9  ;;  %v3917_v28 = vmul.f32 %v4933_v16, %v3910_v24 }
 0xd1c   : > { %v3894_v55 = vpop.f32.mrf.mxu1 }
 0xd1d   : > { %v3927_v14 = vpack.c.bf16 %v3920_v29, %v3919_v4  ;;  %v3915_v39 = vmul.f32 %v3910_v24, %v3894_v55  ;;  %v3925_v40 = vadd.f32 %v7254_v58, %v3917_v28 }
 0xd1e   : > { %v4934_v12 = vpop.f32.mrf.mxu1 }
 0xd1f   : > { %v3918_v18 = vmul.f32 %v4934_v12, %v3910_v24  ;;  %4939 = vmatprep.mubr.msk.bf16.mxu1 %vm507_vm0, %v3927_v14  ;;  %v3923_v7 = vadd.f32 %v7246_v0, %v3915_v39 }
 0xd20   : > { %v3897_v13 = vpop.f32.mrf.mxu1  ;;  %4940 = vmatmul.mubr.msk.bf16.vlgmr.msra.gmra.mxu1 %vm507_vm0, %v3928_v42 }
 0xd21   : > { %v3916_v53 = vmul.f32 %v3910_v24, %v3897_v13  ;;  %v3926_v8 = vadd.f32 %v7242_v2, %v3918_v18 }
 0xd23   : > { %v3924_v36 = vadd.f32 %v7250_v51, %v3916_v53  ;;  %v3930_v59 = vpack.c.bf16 %v3926_v8, %v3925_v40 }
 0xd25   : > { %v3929_v34 = vpack.c.bf16 %v3924_v36, %v3923_v7 }
 0xd27   : > { %4943 = vmatprep.mubr.msk.bf16.mxu1 %vm507_vm0, %v3929_v34 }
 0xd28   : > { %4944 = vmatmul.mubr.msk.bf16.gmra.mxu1 %vm507_vm0, %v3930_v59 }
 0xde0   : > { %v4941_v30 = vpop.f32.mrf.mxu1 }
 0xde1   : > { %v4026_v21 = vadd.f32 %v4941_v30, %v3617_v41 }
 0xde2   : > { %v3993_v6 = vpop.f32.mrf.mxu1 }
 0xde3   : > { %v4041_v2 = vadd.f32 %v4375_v47, %v4026_v21  ;;  %v4024_v27 = vadd.f32 %v3993_v6, %v3615_v23 }
 0xde4   : > { %v4942_v0 = vpop.f32.mrf.mxu1 }
 0xde5   : > { %4049 = vst.msk [vmem:[%s470_s26 + $0x10] sm:$0xff] %vm507_vm0, %v4041_v2  ;;  %v4039_v51 = vadd.f32 %v4375_v47, %v4024_v27  ;;  %v4027_v58 = vadd.f32 %v4942_v0, %v3618_v10 }
 0xde6   : > { %v3996_v26 = vpop.f32.mrf.mxu1 }
 0xde7   : > { %4047 = vst.msk [vmem:[%s470_s26] sm:$0xff] %vm507_vm0, %v4039_v51  ;;  %v4042_v63 = vadd.f32 %v4375_v47, %v4027_v58  ;;  %v4025_v31 = vadd.f32 %v3996_v26, %v3616_v22 }
 0xde8   : > { %v4945_v25 = vpop.f32.mrf.mxu1 }
 0xde9   : > { %4050 = vst.msk [vmem:[%s470_s26 + $0x18] sm:$0xff] %vm507_vm0, %v4042_v63  ;;  %v4040_v19 = vadd.f32 %v4375_v47, %v4025_v31  ;;  %v4030_v50 = vadd.f32 %v4945_v25, %v3621_v15 }
 0xdea   : > { %v4009_v5 = vpop.f32.mrf.mxu1 }
 0xdeb   : > { %4048 = vst.msk [vmem:[%s470_s26 + $0x8] sm:$0xff] %vm507_vm0, %v4040_v19  ;;  %v4045_v20 = vadd.f32 %v4375_v47, %v4030_v50  ;;  %v4028_v62 = vadd.f32 %v4009_v5, %v3619_v54 }
 0xdec   : > { %v4946_v46 = vpop.f32.mrf.mxu1 }
 0xded   : > { %4053 = vst.msk [vmem:[%s470_s26 + $0x30] sm:$0xff] %vm507_vm0, %v4045_v20  ;;  %v4043_v41 = vadd.f32 %v4375_v47, %v4028_v62  ;;  %v4031_v35 = vadd.f32 %v4946_v46, %v7280_v3 }
 0xdee   : > { %v4012_v23 = vpop.f32.mrf.mxu1 }
 0xdef   : > { %4051 = vst.msk [vmem:[%s470_s26 + $0x20] sm:$0xff] %vm507_vm0, %v4043_v41  ;;  %v4046_v32 = vadd.f32 %v4375_v47, %v4031_v35  ;;  %v4029_v10 = vadd.f32 %v4012_v23, %v7282_v33 }
 0xdf1   : > { %4054 = vst.msk [vmem:[%s470_s26 + $0x38] sm:$0xff] %vm507_vm0, %v4046_v32  ;;  %v4044_v45 = vadd.f32 %v4375_v47, %v4029_v10 }
 0xdf3   : > { %4052 = vst.msk [vmem:[%s470_s26 + $0x28] sm:$0xff] %vm507_vm0, %v4044_v45 }
 0xdf4   : > { %5627 = shalt.err (!%p5624_p8)
}
 0xdf5   : > { %s5628_s18 = scalar_lea.hbm %s7313_s23, 1024  ;;  %s5632_s24 = scalar_lea.hbm %s7370_s10, 2048 }
 0xdf6   : > { %p5629_p9 = scmp.ne.s32.totalorder %s7313_s23, %s5628_s18  ;;  %p5633_p11 = scmp.lt.s32.totalorder %s7313_s23, %s7370_s10 }
 0xdf7   : > { %p5634_p12 = scmp.lt.s32.totalorder %s5632_s24, %s5628_s18 }
 0xdf8   : > { %p5630_p4 = pnand %p5629_p9, %p7414_p2 }
 0xdf9   : > { %p5635_p13 = por %p5634_p12, %p5633_p11 }
 0xdfa   : > { %p5631_p7 = pneg %p5630_p4 }
 0xdfc   : > { %p5636_p5 = pnand %p5635_p13, %p5631_p7 }
 0xdfe   : > { %5639 = shalt.err (!%p5636_p5)
}
 0xdff   : > { %s5720_s20 = smov 128   ;;  %s5721_s12 = smov 8  }
 0xe00   : > { %5009 = dma.vmem_to_hbm [thread:$0]  (%p7414_p2), %s7315_s2, 1024, %s7313_s23, %s4056_s19, %s5720_s20, %s5720_s20, %s5721_s12  }
 0xe01 PF: > { %s4084_s29 = sand.u32 1, %s5682_s13   ;;  %p7415_p10 = scmp.ne.s32.totalorder %s7394_s21, 0 }
 0xe02   : > { %p7416_p3 = scmp.ge.s32.totalorder %s5694_s16, 2  ;;  %s4085_s28 = scalar_lea.sflag [#allocation4], %s4084_s29 }
 0xe04   : > { %p5038_p1 = pnand %p7416_p3, %p7415_p10 }
 0xe06   : > { %p5039_p0 = pneg %p5038_p1 }
 0xe08   : > { %5677 = dma.done.wait (%p5039_p0), %s4085_s28, 1024  }
 0xe09   : > { %5679 = vsyncadd (%p5039_p0), %s4085_s28, 4294966272  ;;  %p27_p6 = scmp.ge.s32.totalorder %s5889_s22, 4   ;;  %s7417_s13 = smov %s5686_s14 }
 0xe0a   : > { %s7418_s14 = smov %s5690_s15  ;;  %s7419_s15 = smov %s5901_s27 }
 0xe0b   : > { %s7420_s16 = smov %s5889_s22  ;;  %29 = sbr.rel (!%p27_p6) target bundleno = 14 (0xe), region = 134 }
 0xe10   :  { %4090 = vsyncpa [#allocation3], 1 }
 0xe11   :  { %4092 = vsyncpa [#allocation3 + $0x1], 1 }
 0xe12   :  { %4093 = vsyncpa [#allocation7], 1 }
 0xe13   :  { %4094 = vsyncpa [#allocation10], 1 }
 0xe14   :  { %4095 = vsyncpa [#allocation13], 1 }
 0xe15   :  { %4096 = vsyncpa [#allocation4], 1 }
 0xe16   :  { %4098 = vsyncpa [#allocation4 + $0x1], 1 }
 0xe17   :  { %4099 = vsyncpa [#allocation5], 1 }
 0xe18   :  { %4101 = vsyncpa [#allocation5 + $0x1], 1 }

</bundles_post_ra>
